<compile_context>
chip_gen: v7x
topology: tpu7x:2x2x1
jax: 0.10.0
libtpu: 0.0.40
codegen_flags: <defaults>
</compile_context>

<pallas_src>
import math

import jax
import jax.numpy as jnp
from jax.experimental import pallas as pl
from jax.experimental.pallas import tpu as pltpu


# ----------------------------------------------------------------------------
# small helpers
# ----------------------------------------------------------------------------
def _nbytes(shape, dtype):
    return math.prod(shape) * jnp.dtype(dtype).itemsize


def _vmem_limit(block_bytes, resident_bytes):
    # pipelined blocks are double-buffered; scratch / local temps are single.
    est = 2 * block_bytes + resident_bytes + (8 << 20)
    est = max(est, 16 << 20)
    try:
        cap = int(pltpu.get_tpu_info().vmem_capacity_bytes)
    except Exception:
        cap = 64 << 20                         # conservative (v7x per-TC VMEM)
    return int(min(est, cap - (4 << 20)))


# ----------------------------------------------------------------------------
# in-kernel helpers (traced Python, shared by both stage kernels)
# ----------------------------------------------------------------------------
def _zero_halo(zp_ref):
    """Zero only the 1-block halo ring of the padded scratch."""
    _, hp, wp, c = zp_ref.shape
    h = hp - 2
    zrow = jnp.zeros((1, 1, wp, c), zp_ref.dtype)
    zcol = jnp.zeros((1, h, 1, c), zp_ref.dtype)
    zp_ref[:, 0:1, :, :] = zrow
    zp_ref[:, hp - 1:hp, :, :] = zrow
    zp_ref[:, 1:h + 1, 0:1, :] = zcol
    zp_ref[:, 1:h + 1, wp - 1:wp, :] = zcol


def _conv3x3_block(zp_ref, w_ref, h, w, c_out):
    """3x3 conv in 2x2 space-to-depth block layout.

    zp_ref: (1, h+2, w+2, c_in) padded input scratch (halo already zero).
    w_ref:  (9, c_in, c_out) block weights.
    Returns local f32 accumulator of shape (h*w, c_out) (single store by caller).
    """
    c_in = zp_ref.shape[-1]
    m = h * w
    acc = jnp.zeros((m, c_out), jnp.float32)
    for bi in range(3):
        row = zp_ref[:, bi:bi + h, :, :]            # load each bi-row once
        for bj in range(3):
            patch = row[:, :, bj:bj + w, :].reshape(m, c_in)
            acc = acc + jnp.dot(patch, w_ref[3 * bi + bj],
                                preferred_element_type=jnp.float32)
    return acc


# ----------------------------------------------------------------------------
# stage 1: ConvTranspose2d(k=2,s=2) GEMM + concat(skip) + conv1 (+ BN1 partial stats)
# ----------------------------------------------------------------------------
def _stage1_kernel(xb_ref, skipb_ref, wup_ref, bup_ref, wb1_ref,
                   y1_ref, st1_ref, zp_ref):
    _, hp, wp, _ = zp_ref.shape
    h, w = hp - 2, wp - 2
    cub = wup_ref.shape[-1]                         # 4 * Cup (block channels)
    c4out = y1_ref.shape[-1]                        # 4 * Cout

    _zero_halo(zp_ref)

    # ConvTranspose2d(k=2, s=2) == one GEMM whose output columns are already in
    # (sub_row, sub_col, ch) block order -> pixel shuffle is free.
    up = jnp.dot(xb_ref[0], wup_ref[...], preferred_element_type=jnp.float32)
    up = up + bup_ref[...]
    up_blk = up.reshape(1, h, w, cub).astype(zp_ref.dtype)

    # channel concat with the cropped skip == lane concat into the ONE merged
    # padded scratch (single full-lane interior store).
    zp_ref[:, 1:h + 1, 1:w + 1, :] = jnp.concatenate(
        [up_blk, skipb_ref[...]], axis=-1)

    # conv1: 9 taps, K = 4*Cin per dot, local f32 accumulation.
    acc = _conv3x3_block(zp_ref, wb1_ref, h, w, c4out)

    # partial BN1 statistics for this batch element (two-pass BN).
    st1_ref[:, 0:1, :] = jnp.sum(acc, axis=0, keepdims=True).reshape(1, 1, c4out)
    st1_ref[:, 1:2, :] = jnp.sum(acc * acc, axis=0, keepdims=True).reshape(1, 1, c4out)
    y1_ref[...] = acc.reshape(1, h, w, c4out).astype(y1_ref.dtype)


def _stage1_call(params, xb, skipb, n, h, w):
    m = h * w
    cin = xb.shape[-1]
    cub = params["w_up"].shape[-1]
    c4in = params["wb1"].shape[1]
    c4out = params["wb1"].shape[2]

    out_shape = (jax.ShapeDtypeStruct((n, h, w, c4out), jnp.bfloat16),
                 jax.ShapeDtypeStruct((n, 2, c4out), jnp.float32))
    in_specs = [
        pl.BlockSpec((1, m, cin), lambda i: (i, 0, 0)),
        pl.BlockSpec((1, h, w, cub), lambda i: (i, 0, 0, 0)),
        pl.BlockSpec((cin, cub), lambda i: (0, 0)),
        pl.BlockSpec((1, cub), lambda i: (0, 0)),
        pl.BlockSpec((9, c4in, c4out), lambda i: (0, 0, 0)),
    ]
    out_specs = (
        pl.BlockSpec((1, h, w, c4out), lambda i: (i, 0, 0, 0)),
        pl.BlockSpec((1, 2, c4out), lambda i: (i, 0, 0)),
    )
    scratch_shapes = [pltpu.VMEM((1, h + 2, w + 2, c4in), jnp.bfloat16)]

    block_bytes = (_nbytes((1, m, cin), jnp.bfloat16)
                   + _nbytes((1, h, w, cub), jnp.bfloat16)
                   + _nbytes((cin, cub), jnp.bfloat16)
                   + _nbytes((1, cub), jnp.float32)
                   + _nbytes((9, c4in, c4out), jnp.bfloat16)
                   + _nbytes((1, h, w, c4out), jnp.bfloat16)
                   + _nbytes((1, 2, c4out), jnp.float32))
    resident_bytes = (_nbytes((1, h + 2, w + 2, c4in), jnp.bfloat16)
                      + 2 * _nbytes((m, c4out), jnp.float32)
                      + _nbytes((m, cub), jnp.float32))

    return pl.pallas_call(
        _stage1_kernel,
        out_shape=out_shape,
        grid=(n,),
        in_specs=in_specs,
        out_specs=out_specs,
        scratch_shapes=scratch_shapes,
        compiler_params=pltpu.CompilerParams(
            dimension_semantics=("parallel",),
            vmem_limit_bytes=_vmem_limit(block_bytes, resident_bytes)),
    )(xb, skipb, params["w_up"], params["b_up"], params["wb1"])


# ----------------------------------------------------------------------------
# stage 2: apply BN1 + ReLU, conv2 (+ BN2 partial stats)
# ----------------------------------------------------------------------------
def _stage2_kernel(y1_ref, sc1_ref, sh1_ref, wb2_ref,
                   y2_ref, st2_ref, zp_ref):
    _, hp, wp, c4 = zp_ref.shape
    h, w = hp - 2, wp - 2
    m = h * w

    _zero_halo(zp_ref)

    # BN1 (per-channel scale/shift precomputed in the wrapper, already expanded
    # to block lanes) + ReLU, written into the padded scratch interior.
    a1 = y1_ref[...].astype(jnp.float32).reshape(m, c4)
    a1 = jnp.maximum(a1 * sc1_ref[...] + sh1_ref[...], 0.0)
    zp_ref[:, 1:h + 1, 1:w + 1, :] = a1.reshape(1, h, w, c4).astype(zp_ref.dtype)

    acc = _conv3x3_block(zp_ref, wb2_ref, h, w, c4)

    st2_ref[:, 0:1, :] = jnp.sum(acc, axis=0, keepdims=True).reshape(1, 1, c4)
    st2_ref[:, 1:2, :] = jnp.sum(acc * acc, axis=0, keepdims=True).reshape(1, 1, c4)
    y2_ref[...] = acc.reshape(1, h, w, c4).astype(y2_ref.dtype)


def _stage2_call(params, y1_raw, sc1, sh1, n, h, w):
    c4 = params["wb2"].shape[-1]
    m = h * w

    out_shape = (jax.ShapeDtypeStruct((n, h, w, c4), jnp.float32),
                 jax.ShapeDtypeStruct((n, 2, c4), jnp.float32))
    in_specs = [
        pl.BlockSpec((1, h, w, c4), lambda i: (i, 0, 0, 0)),
        pl.BlockSpec((1, c4), lambda i: (0, 0)),
        pl.BlockSpec((1, c4), lambda i: (0, 0)),
        pl.BlockSpec((9, c4, c4), lambda i: (0, 0, 0)),
    ]
    out_specs = (
        pl.BlockSpec((1, h, w, c4), lambda i: (i, 0, 0, 0)),
        pl.BlockSpec((1, 2, c4), lambda i: (i, 0, 0)),
    )
    scratch_shapes = [pltpu.VMEM((1, h + 2, w + 2, c4), jnp.bfloat16)]

    block_bytes = (_nbytes((1, h, w, c4), jnp.bfloat16)
                   + 2 * _nbytes((1, c4), jnp.float32)
                   + _nbytes((9, c4, c4), jnp.bfloat16)
                   + _nbytes((1, h, w, c4), jnp.float32)
                   + _nbytes((1, 2, c4), jnp.float32))
    resident_bytes = (_nbytes((1, h + 2, w + 2, c4), jnp.bfloat16)
                      + 3 * _nbytes((m, c4), jnp.float32))

    return pl.pallas_call(
        _stage2_kernel,
        out_shape=out_shape,
        grid=(n,),
        in_specs=in_specs,
        out_specs=out_specs,
        scratch_shapes=scratch_shapes,
        compiler_params=pltpu.CompilerParams(
            dimension_semantics=("parallel",),
            vmem_limit_bytes=_vmem_limit(block_bytes, resident_bytes)),
    )(y1_raw, sc1, sh1, params["wb2"])


# ----------------------------------------------------------------------------
# BatchNorm fold (two-pass BN finalize; tiny, stays in XLA / VPU)
# ----------------------------------------------------------------------------
def _bn_fold(partial_stats, gamma, beta, count):
    """partial_stats: (N, 2, 4C) per-step sums in (sub_pixel, channel) lane order."""
    c = gamma.shape[0]
    s = jnp.sum(partial_stats.astype(jnp.float32), axis=0)        # (2, 4C)
    s = s.reshape(2, 4, c).sum(axis=1)                            # (2, C)
    mean = s[0] / count
    # biased batch variance; clamp guards single-pass cancellation in f32.
    var = jnp.maximum(s[1] / count - mean * mean, 0.0)
    inv_std = jax.lax.rsqrt(var + 1e-5)
    scale_c = gamma * inv_std
    shift_c = beta - mean * scale_c
    scale4 = jnp.tile(scale_c, 4)[None, :]                        # (1, 4C)
    shift4 = jnp.tile(shift_c, 4)[None, :]
    return scale4, shift4


# ----------------------------------------------------------------------------
# Parameter init (deterministic, xavier-uniform like the PyTorch module),
# with weights pre-packed into the 2x2-block (space-to-depth) layout.
# ----------------------------------------------------------------------------
def _xavier_uniform(key, shape, fan_in, fan_out):
    bound = math.sqrt(6.0 / (fan_in + fan_out))
    return jax.random.uniform(key, shape, jnp.float32, -bound, bound)


def _block_conv_weight(wc):
    """Fine 3x3 conv weight (3,3,cin,cout) -> 2x2-block conv weight (9, 4*cin, 4*cout).

    Block channel order is (sub_row, sub_col, channel) for both input and output.
    """
    cin, cout = wc.shape[2], wc.shape[3]
    wb = jnp.zeros((3, 3, 4 * cin, 4 * cout), jnp.float32)
    for bi in range(3):
        for ih in range(2):
            for oh in range(2):
                dh = 2 * (bi - 1) + ih - oh + 1
                if not 0 <= dh <= 2:
                    continue
                for bj in range(3):
                    for iw in range(2):
                        for ow in range(2):
                            dw = 2 * (bj - 1) + iw - ow + 1
                            if not 0 <= dw <= 2:
                                continue
                            qi = (ih * 2 + iw) * cin
                            qo = (oh * 2 + ow) * cout
                            wb = wb.at[bi, bj, qi:qi + cin, qo:qo + cout].set(
                                wc[dh, dw])
    return wb.reshape(9, 4 * cin, 4 * cout)


def init_upblock_params(key, in_channels, out_channels):
    cin, cout = in_channels, out_channels
    cup = cin // 2
    k_up, k_upb, k_c1, k_c2 = jax.random.split(key, 4)

    # ConvTranspose2d(cin, cup, 2, 2): torch weight (cin, cup, 2, 2), bias (cup,)
    w_up = _xavier_uniform(k_up, (cin, cup, 2, 2), fan_in=cup * 4, fan_out=cin * 4)
    w_up_mat = jnp.transpose(w_up, (0, 2, 3, 1)).reshape(cin, 4 * cup)
    b_bound = 1.0 / math.sqrt(cup * 4)
    b_up = jax.random.uniform(k_upb, (cup,), jnp.float32, -b_bound, b_bound)

    # Conv2d 3x3, bias=False, xavier; stored as (3, 3, cin, cout).
    w1 = _xavier_uniform(k_c1, (3, 3, cin, cout), fan_in=cin * 9, fan_out=cout * 9)
    w2 = _xavier_uniform(k_c2, (3, 3, cout, cout), fan_in=cout * 9, fan_out=cout * 9)

    # conv1 input is torch.cat([upsample, skip], dim=1): merged K = 4*Cin weight
    # (upsample lanes first, cropped-skip lanes second, matching the scratch).
    wb1 = jnp.concatenate(
        [_block_conv_weight(w1[:, :, :cup, :]),
         _block_conv_weight(w1[:, :, cup:, :])], axis=1)          # (9, 4*cin, 4*cout)
    wb2 = _block_conv_weight(w2)                                  # (9, 4*cout, 4*cout)

    return {
        "w_up": w_up_mat.astype(jnp.bfloat16),
        "b_up": jnp.tile(b_up[None, :], (1, 4)).astype(jnp.float32),   # (1, 4*cup)
        "wb1": wb1.astype(jnp.bfloat16),
        "wb2": wb2.astype(jnp.bfloat16),
        "g1": jnp.ones((cout,), jnp.float32),
        "b1": jnp.zeros((cout,), jnp.float32),
        "g2": jnp.ones((cout,), jnp.float32),
        "b2": jnp.zeros((cout,), jnp.float32),
    }


# ----------------------------------------------------------------------------
# UpBlock forward (wrapper: NCHW in, NCHW out; only boundary layout glue in XLA)
# ----------------------------------------------------------------------------
@jax.jit
def upblock_forward(params, x_nchw, skip_nchw):
    n, cin, h, w = x_nchw.shape
    cup = cin // 2
    cout = params["g1"].shape[0]

    # x: NCHW -> per-batch-element pixel rows for the ConvTranspose GEMM
    xb = jnp.transpose(x_nchw, (0, 2, 3, 1)).reshape(n, h * w, cin)
    xb = xb.astype(jnp.bfloat16)

    # skip: NCHW -> NHWC -> center crop (torchvision-style round()) -> block layout
    th, tw = 2 * h, 2 * w
    sh_, sw_ = skip_nchw.shape[2], skip_nchw.shape[3]
    top = int(round((sh_ - th) / 2.0))
    left = int(round((sw_ - tw) / 2.0))
    skip = jnp.transpose(skip_nchw, (0, 2, 3, 1))[:, top:top + th, left:left + tw, :]
    skipb = skip.reshape(n, h, 2, w, 2, cup)
    skipb = jnp.transpose(skipb, (0, 1, 3, 2, 4, 5)).reshape(n, h, w, 4 * cup)
    skipb = skipb.astype(jnp.bfloat16)

    # pass 1: upsample + concat + conv1 (+ partial BN1 stats), grid over batch
    y1_raw, st1 = _stage1_call(params, xb, skipb, n, h, w)
    count = float(4 * n * h * w)                       # fine pixels per channel
    sc1, sh1 = _bn_fold(st1, params["g1"], params["b1"], count)

    # pass 2: BN1 + ReLU + conv2 (+ partial BN2 stats), grid over batch
    y2_raw, st2 = _stage2_call(params, y1_raw, sc1, sh1, n, h, w)
    sc2, sh2 = _bn_fold(st2, params["g2"], params["b2"], count)

    # epilogue: BN2 + ReLU + 2x2-block un-shuffle -> NCHW (fused elementwise +
    # transpose pass in XLA; no extra Pallas round trip needed).
    c4 = 4 * cout
    out = jnp.maximum(y2_raw * sc2.reshape(1, 1, 1, c4)
                      + sh2.reshape(1, 1, 1, c4), 0.0)
    out = out.reshape(n, h, w, 2, 2, cout)
    out = jnp.transpose(out, (0, 1, 3, 2, 4, 5)).reshape(n, 2 * h, 2 * w, cout)
    return jnp.transpose(out, (0, 3, 1, 2))


if __name__ == "__main__":
    key = jax.random.PRNGKey(0)
    k_p, k_x, k_s = jax.random.split(key, 3)

    in_channels, out_channels = 8, 8
    N, H, W = 2, 8, 8

    params = init_upblock_params(k_p, in_channels, out_channels)
    x = jax.random.normal(k_x, (N, in_channels, H, W), jnp.float32)            # NCHW
    skip = jax.random.normal(k_s, (N, in_channels // 2, 2 * H, 2 * W), jnp.float32)

    out = upblock_forward(params, x, skip)
    out = jax.block_until_ready(out)
    assert out.shape == (N, out_channels, 2 * H, 2 * W), out.shape
    assert bool(jnp.all(jnp.isfinite(out)))
    print("KERNEL_OK")
</pallas_src>

<mosaic_0001>
module attributes {stable_mosaic.version = 11 : i64} {
  func.func @_stage1_kernel(%arg0: i32, %arg1: memref<1x64x8xbf16, #tpu.memory_space<vmem>>, %arg2: memref<1x8x8x16xbf16, #tpu.memory_space<vmem>>, %arg3: memref<8x16xbf16, #tpu.memory_space<vmem>>, %arg4: memref<1x16xf32, #tpu.memory_space<vmem>>, %arg5: memref<9x32x32xbf16, #tpu.memory_space<vmem>>, %arg6: memref<1x8x8x32xbf16, #tpu.memory_space<vmem>>, %arg7: memref<1x2x32xf32, #tpu.memory_space<vmem>>, %arg8: memref<1x10x10x32xbf16, #tpu.memory_space<vmem>>) attributes {dimension_semantics = [#tpu.dimension_semantics<parallel>], iteration_bounds = array<i64: 2>, scalar_prefetch = 0 : i64, scratch_operands = 1 : i64, tpu.core_type = #tpu.core_type<tc>, window_params = [{transform_indices = @transform_0, window_bounds = array<i64: 1, 64, 8>}, {transform_indices = @transform_1, window_bounds = array<i64: 1, 8, 8, 16>}, {pipeline_mode = #tpu.pipeline_mode<synchronous>, transform_indices = @transform_2, window_bounds = array<i64: 8, 16>}, {pipeline_mode = #tpu.pipeline_mode<synchronous>, transform_indices = @transform_3, window_bounds = array<i64: 1, 16>}, {pipeline_mode = #tpu.pipeline_mode<synchronous>, transform_indices = @transform_4, window_bounds = array<i64: 9, 32, 32>}, {transform_indices = @transform_5, window_bounds = array<i64: 1, 8, 8, 32>}, {transform_indices = @transform_6, window_bounds = array<i64: 1, 2, 32>}]} {
    %cst = arith.constant 0.000000e+00 : bf16
    %0 = vector.broadcast %cst : bf16 to vector<1x1x10x32xbf16>
    %cst_0 = arith.constant 0.000000e+00 : bf16
    %1 = vector.broadcast %cst_0 : bf16 to vector<1x8x1x32xbf16>
    %c0 = arith.constant 0 : index
    %c0_1 = arith.constant 0 : index
    %c0_2 = arith.constant 0 : index
    %c0_3 = arith.constant 0 : index
    %2 = vector.load %arg8[%c0, %c0_1, %c0_2, %c0_3] : memref<1x10x10x32xbf16, #tpu.memory_space<vmem>>, vector<1x1x10x32xbf16>
    tpu.vector_store %arg8[%c0, %c0_1, %c0_2, %c0_3], %0 {strides = array<i32>} : memref<1x10x10x32xbf16, #tpu.memory_space<vmem>>, vector<1x1x10x32xbf16>,
    %c0_4 = arith.constant 0 : index
    %c9 = arith.constant 9 : index
    %c0_5 = arith.constant 0 : index
    %c0_6 = arith.constant 0 : index
    %3 = vector.load %arg8[%c0_4, %c9, %c0_5, %c0_6] : memref<1x10x10x32xbf16, #tpu.memory_space<vmem>>, vector<1x1x10x32xbf16>
    tpu.vector_store %arg8[%c0_4, %c9, %c0_5, %c0_6], %0 {strides = array<i32>} : memref<1x10x10x32xbf16, #tpu.memory_space<vmem>>, vector<1x1x10x32xbf16>,
    %c0_7 = arith.constant 0 : index
    %c1 = arith.constant 1 : index
    %c0_8 = arith.constant 0 : index
    %c0_9 = arith.constant 0 : index
    %4 = vector.load %arg8[%c0_7, %c1, %c0_8, %c0_9] : memref<1x10x10x32xbf16, #tpu.memory_space<vmem>>, vector<1x8x1x32xbf16>
    tpu.vector_store %arg8[%c0_7, %c1, %c0_8, %c0_9], %1 {strides = array<i32>} : memref<1x10x10x32xbf16, #tpu.memory_space<vmem>>, vector<1x8x1x32xbf16>,
    %c0_10 = arith.constant 0 : index
    %c1_11 = arith.constant 1 : index
    %c9_12 = arith.constant 9 : index
    %c0_13 = arith.constant 0 : index
    %5 = vector.load %arg8[%c0_10, %c1_11, %c9_12, %c0_13] : memref<1x10x10x32xbf16, #tpu.memory_space<vmem>>, vector<1x8x1x32xbf16>
    tpu.vector_store %arg8[%c0_10, %c1_11, %c9_12, %c0_13], %1 {strides = array<i32>} : memref<1x10x10x32xbf16, #tpu.memory_space<vmem>>, vector<1x8x1x32xbf16>,
    %c0_14 = arith.constant 0 : index
    %c0_15 = arith.constant 0 : index
    %c0_16 = arith.constant 0 : index
    %6 = vector.load %arg1[%c0_14, %c0_15, %c0_16] : memref<1x64x8xbf16, #tpu.memory_space<vmem>>, vector<1x64x8xbf16>
    %7 = vector.shape_cast %6 : vector<1x64x8xbf16> to vector<64x8xbf16>
    %c0_17 = arith.constant 0 : index
    %c0_18 = arith.constant 0 : index
    %8 = vector.load %arg3[%c0_17, %c0_18] : memref<8x16xbf16, #tpu.memory_space<vmem>>, vector<8x16xbf16>
    %cst_19 = arith.constant dense<0.000000e+00> : vector<64x16xf32>
    %9 = tpu.matmul %7, %8, %cst_19 {dimension_numbers = #tpu.dot_dimension_numbers<[1], [0], [0], [1], [0, 0, 1, 1], [], []>} : vector<64x8xbf16>, vector<8x16xbf16>, vector<64x16xf32> -> vector<64x16xf32>
    %c0_20 = arith.constant 0 : index
    %c0_21 = arith.constant 0 : index
    %10 = vector.load %arg4[%c0_20, %c0_21] : memref<1x16xf32, #tpu.memory_space<vmem>>, vector<1x16xf32>
    %11 = vector.broadcast %10 : vector<1x16xf32> to vector<64x16xf32>
    %12 = arith.addf %9, %11 : vector<64x16xf32>
    %13 = vector.shape_cast %12 : vector<64x16xf32> to vector<1x8x8x16xf32>
    %14 = arith.truncf %13 : vector<1x8x8x16xf32> to vector<1x8x8x16xbf16>
    %c0_22 = arith.constant 0 : index
    %c0_23 = arith.constant 0 : index
    %c0_24 = arith.constant 0 : index
    %c0_25 = arith.constant 0 : index
    %15 = vector.load %arg2[%c0_22, %c0_23, %c0_24, %c0_25] : memref<1x8x8x16xbf16, #tpu.memory_space<vmem>>, vector<1x8x8x16xbf16>
    %16 = tpu.concatenate %14, %15 in 3 : vector<1x8x8x16xbf16>, vector<1x8x8x16xbf16> -> vector<1x8x8x32xbf16>
    %c0_26 = arith.constant 0 : index
    %c1_27 = arith.constant 1 : index
    %c1_28 = arith.constant 1 : index
    %c0_29 = arith.constant 0 : index
    %17 = vector.load %arg8[%c0_26, %c1_27, %c1_28, %c0_29] : memref<1x10x10x32xbf16, #tpu.memory_space<vmem>>, vector<1x8x8x32xbf16>
    tpu.vector_store %arg8[%c0_26, %c1_27, %c1_28, %c0_29], %16 {strides = array<i32>} : memref<1x10x10x32xbf16, #tpu.memory_space<vmem>>, vector<1x8x8x32xbf16>,
    %cst_30 = arith.constant 0.000000e+00 : f32
    %18 = vector.broadcast %cst_30 : f32 to vector<64x32xf32>
    %c0_31 = arith.constant 0 : index
    %c0_32 = arith.constant 0 : index
    %c0_33 = arith.constant 0 : index
    %c0_34 = arith.constant 0 : index
    %19 = vector.load %arg8[%c0_31, %c0_32, %c0_33, %c0_34] : memref<1x10x10x32xbf16, #tpu.memory_space<vmem>>, vector<1x8x10x32xbf16>
    %20 = vector.extract_strided_slice %19 {offsets = [0, 0, 0, 0], sizes = [1, 8, 8, 32], strides = [1, 1, 1, 1]} : vector<1x8x10x32xbf16> to vector<1x8x8x32xbf16>
    %21 = vector.shape_cast %20 : vector<1x8x8x32xbf16> to vector<64x32xbf16>
    %c0_35 = arith.constant 0 : index
    %c0_36 = arith.constant 0 : index
    %c0_37 = arith.constant 0 : index
    %22 = vector.load %arg5[%c0_35, %c0_36, %c0_37] : memref<9x32x32xbf16, #tpu.memory_space<vmem>>, vector<1x32x32xbf16>
    %23 = vector.shape_cast %22 : vector<1x32x32xbf16> to vector<32x32xbf16>
    %cst_38 = arith.constant dense<0.000000e+00> : vector<64x32xf32>
    %24 = tpu.matmul %21, %23, %cst_38 {dimension_numbers = #tpu.dot_dimension_numbers<[1], [0], [0], [1], [0, 0, 1, 1], [], []>} : vector<64x32xbf16>, vector<32x32xbf16>, vector<64x32xf32> -> vector<64x32xf32>
    %25 = arith.addf %18, %24 : vector<64x32xf32>
    %26 = vector.extract_strided_slice %19 {offsets = [0, 0, 1, 0], sizes = [1, 8, 8, 32], strides = [1, 1, 1, 1]} : vector<1x8x10x32xbf16> to vector<1x8x8x32xbf16>
    %27 = vector.shape_cast %26 : vector<1x8x8x32xbf16> to vector<64x32xbf16>
    %c1_39 = arith.constant 1 : index
    %c0_40 = arith.constant 0 : index
    %c0_41 = arith.constant 0 : index
    %28 = vector.load %arg5[%c1_39, %c0_40, %c0_41] : memref<9x32x32xbf16, #tpu.memory_space<vmem>>, vector<1x32x32xbf16>
    %29 = vector.shape_cast %28 : vector<1x32x32xbf16> to vector<32x32xbf16>
    %cst_42 = arith.constant dense<0.000000e+00> : vector<64x32xf32>
    %30 = tpu.matmul %27, %29, %cst_42 {dimension_numbers = #tpu.dot_dimension_numbers<[1], [0], [0], [1], [0, 0, 1, 1], [], []>} : vector<64x32xbf16>, vector<32x32xbf16>, vector<64x32xf32> -> vector<64x32xf32>
    %31 = arith.addf %25, %30 : vector<64x32xf32>
    %32 = vector.extract_strided_slice %19 {offsets = [0, 0, 2, 0], sizes = [1, 8, 8, 32], strides = [1, 1, 1, 1]} : vector<1x8x10x32xbf16> to vector<1x8x8x32xbf16>
    %33 = vector.shape_cast %32 : vector<1x8x8x32xbf16> to vector<64x32xbf16>
    %c2 = arith.constant 2 : index
    %c0_43 = arith.constant 0 : index
    %c0_44 = arith.constant 0 : index
    %34 = vector.load %arg5[%c2, %c0_43, %c0_44] : memref<9x32x32xbf16, #tpu.memory_space<vmem>>, vector<1x32x32xbf16>
    %35 = vector.shape_cast %34 : vector<1x32x32xbf16> to vector<32x32xbf16>
    %cst_45 = arith.constant dense<0.000000e+00> : vector<64x32xf32>
    %36 = tpu.matmul %33, %35, %cst_45 {dimension_numbers = #tpu.dot_dimension_numbers<[1], [0], [0], [1], [0, 0, 1, 1], [], []>} : vector<64x32xbf16>, vector<32x32xbf16>, vector<64x32xf32> -> vector<64x32xf32>
    %37 = arith.addf %31, %36 : vector<64x32xf32>
    %c0_46 = arith.constant 0 : index
    %c1_47 = arith.constant 1 : index
    %c0_48 = arith.constant 0 : index
    %c0_49 = arith.constant 0 : index
    %38 = vector.load %arg8[%c0_46, %c1_47, %c0_48, %c0_49] : memref<1x10x10x32xbf16, #tpu.memory_space<vmem>>, vector<1x8x10x32xbf16>
    %39 = vector.extract_strided_slice %38 {offsets = [0, 0, 0, 0], sizes = [1, 8, 8, 32], strides = [1, 1, 1, 1]} : vector<1x8x10x32xbf16> to vector<1x8x8x32xbf16>
    %40 = vector.shape_cast %39 : vector<1x8x8x32xbf16> to vector<64x32xbf16>
    %c3 = arith.constant 3 : index
    %c0_50 = arith.constant 0 : index
    %c0_51 = arith.constant 0 : index
    %41 = vector.load %arg5[%c3, %c0_50, %c0_51] : memref<9x32x32xbf16, #tpu.memory_space<vmem>>, vector<1x32x32xbf16>
    %42 = vector.shape_cast %41 : vector<1x32x32xbf16> to vector<32x32xbf16>
    %cst_52 = arith.constant dense<0.000000e+00> : vector<64x32xf32>
    %43 = tpu.matmul %40, %42, %cst_52 {dimension_numbers = #tpu.dot_dimension_numbers<[1], [0], [0], [1], [0, 0, 1, 1], [], []>} : vector<64x32xbf16>, vector<32x32xbf16>, vector<64x32xf32> -> vector<64x32xf32>
    %44 = arith.addf %37, %43 : vector<64x32xf32>
    %45 = vector.extract_strided_slice %38 {offsets = [0, 0, 1, 0], sizes = [1, 8, 8, 32], strides = [1, 1, 1, 1]} : vector<1x8x10x32xbf16> to vector<1x8x8x32xbf16>
    %46 = vector.shape_cast %45 : vector<1x8x8x32xbf16> to vector<64x32xbf16>
    %c4 = arith.constant 4 : index
    %c0_53 = arith.constant 0 : index
    %c0_54 = arith.constant 0 : index
    %47 = vector.load %arg5[%c4, %c0_53, %c0_54] : memref<9x32x32xbf16, #tpu.memory_space<vmem>>, vector<1x32x32xbf16>
    %48 = vector.shape_cast %47 : vector<1x32x32xbf16> to vector<32x32xbf16>
    %cst_55 = arith.constant dense<0.000000e+00> : vector<64x32xf32>
    %49 = tpu.matmul %46, %48, %cst_55 {dimension_numbers = #tpu.dot_dimension_numbers<[1], [0], [0], [1], [0, 0, 1, 1], [], []>} : vector<64x32xbf16>, vector<32x32xbf16>, vector<64x32xf32> -> vector<64x32xf32>
    %50 = arith.addf %44, %49 : vector<64x32xf32>
    %51 = vector.extract_strided_slice %38 {offsets = [0, 0, 2, 0], sizes = [1, 8, 8, 32], strides = [1, 1, 1, 1]} : vector<1x8x10x32xbf16> to vector<1x8x8x32xbf16>
    %52 = vector.shape_cast %51 : vector<1x8x8x32xbf16> to vector<64x32xbf16>
    %c5 = arith.constant 5 : index
    %c0_56 = arith.constant 0 : index
    %c0_57 = arith.constant 0 : index
    %53 = vector.load %arg5[%c5, %c0_56, %c0_57] : memref<9x32x32xbf16, #tpu.memory_space<vmem>>, vector<1x32x32xbf16>
    %54 = vector.shape_cast %53 : vector<1x32x32xbf16> to vector<32x32xbf16>
    %cst_58 = arith.constant dense<0.000000e+00> : vector<64x32xf32>
    %55 = tpu.matmul %52, %54, %cst_58 {dimension_numbers = #tpu.dot_dimension_numbers<[1], [0], [0], [1], [0, 0, 1, 1], [], []>} : vector<64x32xbf16>, vector<32x32xbf16>, vector<64x32xf32> -> vector<64x32xf32>
    %56 = arith.addf %50, %55 : vector<64x32xf32>
    %c0_59 = arith.constant 0 : index
    %c2_60 = arith.constant 2 : index
    %c0_61 = arith.constant 0 : index
    %c0_62 = arith.constant 0 : index
    %57 = vector.load %arg8[%c0_59, %c2_60, %c0_61, %c0_62] : memref<1x10x10x32xbf16, #tpu.memory_space<vmem>>, vector<1x8x10x32xbf16>
    %58 = vector.extract_strided_slice %57 {offsets = [0, 0, 0, 0], sizes = [1, 8, 8, 32], strides = [1, 1, 1, 1]} : vector<1x8x10x32xbf16> to vector<1x8x8x32xbf16>
    %59 = vector.shape_cast %58 : vector<1x8x8x32xbf16> to vector<64x32xbf16>
    %c6 = arith.constant 6 : index
    %c0_63 = arith.constant 0 : index
    %c0_64 = arith.constant 0 : index
    %60 = vector.load %arg5[%c6, %c0_63, %c0_64] : memref<9x32x32xbf16, #tpu.memory_space<vmem>>, vector<1x32x32xbf16>
    %61 = vector.shape_cast %60 : vector<1x32x32xbf16> to vector<32x32xbf16>
    %cst_65 = arith.constant dense<0.000000e+00> : vector<64x32xf32>
    %62 = tpu.matmul %59, %61, %cst_65 {dimension_numbers = #tpu.dot_dimension_numbers<[1], [0], [0], [1], [0, 0, 1, 1], [], []>} : vector<64x32xbf16>, vector<32x32xbf16>, vector<64x32xf32> -> vector<64x32xf32>
    %63 = arith.addf %56, %62 : vector<64x32xf32>
    %64 = vector.extract_strided_slice %57 {offsets = [0, 0, 1, 0], sizes = [1, 8, 8, 32], strides = [1, 1, 1, 1]} : vector<1x8x10x32xbf16> to vector<1x8x8x32xbf16>
    %65 = vector.shape_cast %64 : vector<1x8x8x32xbf16> to vector<64x32xbf16>
    %c7 = arith.constant 7 : index
    %c0_66 = arith.constant 0 : index
    %c0_67 = arith.constant 0 : index
    %66 = vector.load %arg5[%c7, %c0_66, %c0_67] : memref<9x32x32xbf16, #tpu.memory_space<vmem>>, vector<1x32x32xbf16>
    %67 = vector.shape_cast %66 : vector<1x32x32xbf16> to vector<32x32xbf16>
    %cst_68 = arith.constant dense<0.000000e+00> : vector<64x32xf32>
    %68 = tpu.matmul %65, %67, %cst_68 {dimension_numbers = #tpu.dot_dimension_numbers<[1], [0], [0], [1], [0, 0, 1, 1], [], []>} : vector<64x32xbf16>, vector<32x32xbf16>, vector<64x32xf32> -> vector<64x32xf32>
    %69 = arith.addf %63, %68 : vector<64x32xf32>
    %70 = vector.extract_strided_slice %57 {offsets = [0, 0, 2, 0], sizes = [1, 8, 8, 32], strides = [1, 1, 1, 1]} : vector<1x8x10x32xbf16> to vector<1x8x8x32xbf16>
    %71 = vector.shape_cast %70 : vector<1x8x8x32xbf16> to vector<64x32xbf16>
    %c8 = arith.constant 8 : index
    %c0_69 = arith.constant 0 : index
    %c0_70 = arith.constant 0 : index
    %72 = vector.load %arg5[%c8, %c0_69, %c0_70] : memref<9x32x32xbf16, #tpu.memory_space<vmem>>, vector<1x32x32xbf16>
    %73 = vector.shape_cast %72 : vector<1x32x32xbf16> to vector<32x32xbf16>
    %cst_71 = arith.constant dense<0.000000e+00> : vector<64x32xf32>
    %74 = tpu.matmul %71, %73, %cst_71 {dimension_numbers = #tpu.dot_dimension_numbers<[1], [0], [0], [1], [0, 0, 1, 1], [], []>} : vector<64x32xbf16>, vector<32x32xbf16>, vector<64x32xf32> -> vector<64x32xf32>
    %75 = arith.addf %69, %74 : vector<64x32xf32>
    %cst_72 = arith.constant dense<0.000000e+00> : vector<32xf32>
    %76 = vector.multi_reduction <add>, %75, %cst_72 [0] : vector<64x32xf32> to vector<32xf32>
    %77 = vector.shape_cast %76 : vector<32xf32> to vector<1x32xf32>
    %78 = vector.shape_cast %77 : vector<1x32xf32> to vector<1x1x32xf32>
    %c0_73 = arith.constant 0 : index
    %c0_74 = arith.constant 0 : index
    %c0_75 = arith.constant 0 : index
    %79 = vector.load %arg7[%c0_73, %c0_74, %c0_75] : memref<1x2x32xf32, #tpu.memory_space<vmem>>, vector<1x1x32xf32>
    tpu.vector_store %arg7[%c0_73, %c0_74, %c0_75], %78 {strides = array<i32>} : memref<1x2x32xf32, #tpu.memory_space<vmem>>, vector<1x1x32xf32>,
    %80 = arith.mulf %75, %75 : vector<64x32xf32>
    %cst_76 = arith.constant dense<0.000000e+00> : vector<32xf32>
    %81 = vector.multi_reduction <add>, %80, %cst_76 [0] : vector<64x32xf32> to vector<32xf32>
    %82 = vector.shape_cast %81 : vector<32xf32> to vector<1x32xf32>
    %83 = vector.shape_cast %82 : vector<1x32xf32> to vector<1x1x32xf32>
    %c0_77 = arith.constant 0 : index
    %c1_78 = arith.constant 1 : index
    %c0_79 = arith.constant 0 : index
    %84 = vector.load %arg7[%c0_77, %c1_78, %c0_79] : memref<1x2x32xf32, #tpu.memory_space<vmem>>, vector<1x1x32xf32>
    tpu.vector_store %arg7[%c0_77, %c1_78, %c0_79], %83 {strides = array<i32>} : memref<1x2x32xf32, #tpu.memory_space<vmem>>, vector<1x1x32xf32>,
    %85 = vector.shape_cast %75 : vector<64x32xf32> to vector<1x8x8x32xf32>
    %86 = arith.truncf %85 : vector<1x8x8x32xf32> to vector<1x8x8x32xbf16>
    %c0_80 = arith.constant 0 : index
    %c0_81 = arith.constant 0 : index
    %c0_82 = arith.constant 0 : index
    %c0_83 = arith.constant 0 : index
    %87 = vector.load %arg6[%c0_80, %c0_81, %c0_82, %c0_83] : memref<1x8x8x32xbf16, #tpu.memory_space<vmem>>, vector<1x8x8x32xbf16>
    tpu.vector_store %arg6[%c0_80, %c0_81, %c0_82, %c0_83], %86 {strides = array<i32>} : memref<1x8x8x32xbf16, #tpu.memory_space<vmem>>, vector<1x8x8x32xbf16>,
    return
  }
  func.func @transform_0(%arg0: i32) -> (i32, i32, i32) {
    %c0_i32 = arith.constant 0 : i32
    %c0_i32_0 = arith.constant 0 : i32
    %c0_i32_1 = arith.constant 0 : i32
    return %arg0, %c0_i32, %c0_i32_0 : i32, i32, i32
  }
  func.func @transform_1(%arg0: i32) -> (i32, i32, i32, i32) {
    %c0_i32 = arith.constant 0 : i32
    %c0_i32_0 = arith.constant 0 : i32
    %c0_i32_1 = arith.constant 0 : i32
    %c0_i32_2 = arith.constant 0 : i32
    return %arg0, %c0_i32, %c0_i32_0, %c0_i32_1 : i32, i32, i32, i32
  }
  func.func @transform_2(%arg0: i32) -> (i32, i32) {
    %c0_i32 = arith.constant 0 : i32
    %c0_i32_0 = arith.constant 0 : i32
    %c0_i32_1 = arith.constant 0 : i32
    return %c0_i32, %c0_i32_0 : i32, i32
  }
  func.func @transform_3(%arg0: i32) -> (i32, i32) {
    %c0_i32 = arith.constant 0 : i32
    %c0_i32_0 = arith.constant 0 : i32
    %c0_i32_1 = arith.constant 0 : i32
    return %c0_i32, %c0_i32_0 : i32, i32
  }
  func.func @transform_4(%arg0: i32) -> (i32, i32, i32) {
    %c0_i32 = arith.constant 0 : i32
    %c0_i32_0 = arith.constant 0 : i32
    %c0_i32_1 = arith.constant 0 : i32
    %c0_i32_2 = arith.constant 0 : i32
    return %c0_i32, %c0_i32_0, %c0_i32_1 : i32, i32, i32
  }
  func.func @transform_5(%arg0: i32) -> (i32, i32, i32, i32) {
    %c0_i32 = arith.constant 0 : i32
    %c0_i32_0 = arith.constant 0 : i32
    %c0_i32_1 = arith.constant 0 : i32
    %c0_i32_2 = arith.constant 0 : i32
    return %arg0, %c0_i32, %c0_i32_0, %c0_i32_1 : i32, i32, i32, i32
  }
  func.func @transform_6(%arg0: i32) -> (i32, i32, i32) {
    %c0_i32 = arith.constant 0 : i32
    %c0_i32_0 = arith.constant 0 : i32
    %c0_i32_1 = arith.constant 0 : i32
    return %arg0, %c0_i32, %c0_i32_0 : i32, i32, i32
  }
}

module attributes {stable_mosaic.version = 11 : i64} {
  func.func @_stage2_kernel(%arg0: i32, %arg1: memref<1x8x8x32xbf16, #tpu.memory_space<vmem>>, %arg2: memref<1x32xf32, #tpu.memory_space<vmem>>, %arg3: memref<1x32xf32, #tpu.memory_space<vmem>>, %arg4: memref<9x32x32xbf16, #tpu.memory_space<vmem>>, %arg5: memref<1x8x8x32xf32, #tpu.memory_space<vmem>>, %arg6: memref<1x2x32xf32, #tpu.memory_space<vmem>>, %arg7: memref<1x10x10x32xbf16, #tpu.memory_space<vmem>>) attributes {dimension_semantics = [#tpu.dimension_semantics<parallel>], iteration_bounds = array<i64: 2>, scalar_prefetch = 0 : i64, scratch_operands = 1 : i64, tpu.core_type = #tpu.core_type<tc>, window_params = [{transform_indices = @transform_0, window_bounds = array<i64: 1, 8, 8, 32>}, {pipeline_mode = #tpu.pipeline_mode<synchronous>, transform_indices = @transform_1, window_bounds = array<i64: 1, 32>}, {pipeline_mode = #tpu.pipeline_mode<synchronous>, transform_indices = @transform_2, window_bounds = array<i64: 1, 32>}, {pipeline_mode = #tpu.pipeline_mode<synchronous>, transform_indices = @transform_3, window_bounds = array<i64: 9, 32, 32>}, {transform_indices = @transform_4, window_bounds = array<i64: 1, 8, 8, 32>}, {transform_indices = @transform_5, window_bounds = array<i64: 1, 2, 32>}]} {
    %cst = arith.constant 0.000000e+00 : bf16
    %0 = vector.broadcast %cst : bf16 to vector<1x1x10x32xbf16>
    %cst_0 = arith.constant 0.000000e+00 : bf16
    %1 = vector.broadcast %cst_0 : bf16 to vector<1x8x1x32xbf16>
    %c0 = arith.constant 0 : index
    %c0_1 = arith.constant 0 : index
    %c0_2 = arith.constant 0 : index
    %c0_3 = arith.constant 0 : index
    %2 = vector.load %arg7[%c0, %c0_1, %c0_2, %c0_3] : memref<1x10x10x32xbf16, #tpu.memory_space<vmem>>, vector<1x1x10x32xbf16>
    tpu.vector_store %arg7[%c0, %c0_1, %c0_2, %c0_3], %0 {strides = array<i32>} : memref<1x10x10x32xbf16, #tpu.memory_space<vmem>>, vector<1x1x10x32xbf16>,
    %c0_4 = arith.constant 0 : index
    %c9 = arith.constant 9 : index
    %c0_5 = arith.constant 0 : index
    %c0_6 = arith.constant 0 : index
    %3 = vector.load %arg7[%c0_4, %c9, %c0_5, %c0_6] : memref<1x10x10x32xbf16, #tpu.memory_space<vmem>>, vector<1x1x10x32xbf16>
    tpu.vector_store %arg7[%c0_4, %c9, %c0_5, %c0_6], %0 {strides = array<i32>} : memref<1x10x10x32xbf16, #tpu.memory_space<vmem>>, vector<1x1x10x32xbf16>,
    %c0_7 = arith.constant 0 : index
    %c1 = arith.constant 1 : index
    %c0_8 = arith.constant 0 : index
    %c0_9 = arith.constant 0 : index
    %4 = vector.load %arg7[%c0_7, %c1, %c0_8, %c0_9] : memref<1x10x10x32xbf16, #tpu.memory_space<vmem>>, vector<1x8x1x32xbf16>
    tpu.vector_store %arg7[%c0_7, %c1, %c0_8, %c0_9], %1 {strides = array<i32>} : memref<1x10x10x32xbf16, #tpu.memory_space<vmem>>, vector<1x8x1x32xbf16>,
    %c0_10 = arith.constant 0 : index
    %c1_11 = arith.constant 1 : index
    %c9_12 = arith.constant 9 : index
    %c0_13 = arith.constant 0 : index
    %5 = vector.load %arg7[%c0_10, %c1_11, %c9_12, %c0_13] : memref<1x10x10x32xbf16, #tpu.memory_space<vmem>>, vector<1x8x1x32xbf16>
    tpu.vector_store %arg7[%c0_10, %c1_11, %c9_12, %c0_13], %1 {strides = array<i32>} : memref<1x10x10x32xbf16, #tpu.memory_space<vmem>>, vector<1x8x1x32xbf16>,
    %c0_14 = arith.constant 0 : index
    %c0_15 = arith.constant 0 : index
    %c0_16 = arith.constant 0 : index
    %c0_17 = arith.constant 0 : index
    %6 = vector.load %arg1[%c0_14, %c0_15, %c0_16, %c0_17] : memref<1x8x8x32xbf16, #tpu.memory_space<vmem>>, vector<1x8x8x32xbf16>
    %7 = arith.extf %6 : vector<1x8x8x32xbf16> to vector<1x8x8x32xf32>
    %8 = vector.shape_cast %7 : vector<1x8x8x32xf32> to vector<64x32xf32>
    %c0_18 = arith.constant 0 : index
    %c0_19 = arith.constant 0 : index
    %9 = vector.load %arg2[%c0_18, %c0_19] : memref<1x32xf32, #tpu.memory_space<vmem>>, vector<1x32xf32>
    %10 = vector.broadcast %9 : vector<1x32xf32> to vector<64x32xf32>
    %11 = arith.mulf %8, %10 : vector<64x32xf32>
    %c0_20 = arith.constant 0 : index
    %c0_21 = arith.constant 0 : index
    %12 = vector.load %arg3[%c0_20, %c0_21] : memref<1x32xf32, #tpu.memory_space<vmem>>, vector<1x32xf32>
    %13 = vector.broadcast %12 : vector<1x32xf32> to vector<64x32xf32>
    %14 = arith.addf %11, %13 : vector<64x32xf32>
    %cst_22 = arith.constant 0.000000e+00 : f32
    %15 = vector.broadcast %cst_22 : f32 to vector<64x32xf32>
    %16 = arith.maximumf %14, %15 : vector<64x32xf32>
    %17 = vector.shape_cast %16 : vector<64x32xf32> to vector<1x8x8x32xf32>
    %18 = arith.truncf %17 : vector<1x8x8x32xf32> to vector<1x8x8x32xbf16>
    %c0_23 = arith.constant 0 : index
    %c1_24 = arith.constant 1 : index
    %c1_25 = arith.constant 1 : index
    %c0_26 = arith.constant 0 : index
    %19 = vector.load %arg7[%c0_23, %c1_24, %c1_25, %c0_26] : memref<1x10x10x32xbf16, #tpu.memory_space<vmem>>, vector<1x8x8x32xbf16>
    tpu.vector_store %arg7[%c0_23, %c1_24, %c1_25, %c0_26], %18 {strides = array<i32>} : memref<1x10x10x32xbf16, #tpu.memory_space<vmem>>, vector<1x8x8x32xbf16>,
    %cst_27 = arith.constant 0.000000e+00 : f32
    %20 = vector.broadcast %cst_27 : f32 to vector<64x32xf32>
    %c0_28 = arith.constant 0 : index
    %c0_29 = arith.constant 0 : index
    %c0_30 = arith.constant 0 : index
    %c0_31 = arith.constant 0 : index
    %21 = vector.load %arg7[%c0_28, %c0_29, %c0_30, %c0_31] : memref<1x10x10x32xbf16, #tpu.memory_space<vmem>>, vector<1x8x10x32xbf16>
    %22 = vector.extract_strided_slice %21 {offsets = [0, 0, 0, 0], sizes = [1, 8, 8, 32], strides = [1, 1, 1, 1]} : vector<1x8x10x32xbf16> to vector<1x8x8x32xbf16>
    %23 = vector.shape_cast %22 : vector<1x8x8x32xbf16> to vector<64x32xbf16>
    %c0_32 = arith.constant 0 : index
    %c0_33 = arith.constant 0 : index
    %c0_34 = arith.constant 0 : index
    %24 = vector.load %arg4[%c0_32, %c0_33, %c0_34] : memref<9x32x32xbf16, #tpu.memory_space<vmem>>, vector<1x32x32xbf16>
    %25 = vector.shape_cast %24 : vector<1x32x32xbf16> to vector<32x32xbf16>
    %cst_35 = arith.constant dense<0.000000e+00> : vector<64x32xf32>
    %26 = tpu.matmul %23, %25, %cst_35 {dimension_numbers = #tpu.dot_dimension_numbers<[1], [0], [0], [1], [0, 0, 1, 1], [], []>} : vector<64x32xbf16>, vector<32x32xbf16>, vector<64x32xf32> -> vector<64x32xf32>
    %27 = arith.addf %20, %26 : vector<64x32xf32>
    %28 = vector.extract_strided_slice %21 {offsets = [0, 0, 1, 0], sizes = [1, 8, 8, 32], strides = [1, 1, 1, 1]} : vector<1x8x10x32xbf16> to vector<1x8x8x32xbf16>
    %29 = vector.shape_cast %28 : vector<1x8x8x32xbf16> to vector<64x32xbf16>
    %c1_36 = arith.constant 1 : index
    %c0_37 = arith.constant 0 : index
    %c0_38 = arith.constant 0 : index
    %30 = vector.load %arg4[%c1_36, %c0_37, %c0_38] : memref<9x32x32xbf16, #tpu.memory_space<vmem>>, vector<1x32x32xbf16>
    %31 = vector.shape_cast %30 : vector<1x32x32xbf16> to vector<32x32xbf16>
    %cst_39 = arith.constant dense<0.000000e+00> : vector<64x32xf32>
    %32 = tpu.matmul %29, %31, %cst_39 {dimension_numbers = #tpu.dot_dimension_numbers<[1], [0], [0], [1], [0, 0, 1, 1], [], []>} : vector<64x32xbf16>, vector<32x32xbf16>, vector<64x32xf32> -> vector<64x32xf32>
    %33 = arith.addf %27, %32 : vector<64x32xf32>
    %34 = vector.extract_strided_slice %21 {offsets = [0, 0, 2, 0], sizes = [1, 8, 8, 32], strides = [1, 1, 1, 1]} : vector<1x8x10x32xbf16> to vector<1x8x8x32xbf16>
    %35 = vector.shape_cast %34 : vector<1x8x8x32xbf16> to vector<64x32xbf16>
    %c2 = arith.constant 2 : index
    %c0_40 = arith.constant 0 : index
    %c0_41 = arith.constant 0 : index
    %36 = vector.load %arg4[%c2, %c0_40, %c0_41] : memref<9x32x32xbf16, #tpu.memory_space<vmem>>, vector<1x32x32xbf16>
    %37 = vector.shape_cast %36 : vector<1x32x32xbf16> to vector<32x32xbf16>
    %cst_42 = arith.constant dense<0.000000e+00> : vector<64x32xf32>
    %38 = tpu.matmul %35, %37, %cst_42 {dimension_numbers = #tpu.dot_dimension_numbers<[1], [0], [0], [1], [0, 0, 1, 1], [], []>} : vector<64x32xbf16>, vector<32x32xbf16>, vector<64x32xf32> -> vector<64x32xf32>
    %39 = arith.addf %33, %38 : vector<64x32xf32>
    %c0_43 = arith.constant 0 : index
    %c1_44 = arith.constant 1 : index
    %c0_45 = arith.constant 0 : index
    %c0_46 = arith.constant 0 : index
    %40 = vector.load %arg7[%c0_43, %c1_44, %c0_45, %c0_46] : memref<1x10x10x32xbf16, #tpu.memory_space<vmem>>, vector<1x8x10x32xbf16>
    %41 = vector.extract_strided_slice %40 {offsets = [0, 0, 0, 0], sizes = [1, 8, 8, 32], strides = [1, 1, 1, 1]} : vector<1x8x10x32xbf16> to vector<1x8x8x32xbf16>
    %42 = vector.shape_cast %41 : vector<1x8x8x32xbf16> to vector<64x32xbf16>
    %c3 = arith.constant 3 : index
    %c0_47 = arith.constant 0 : index
    %c0_48 = arith.constant 0 : index
    %43 = vector.load %arg4[%c3, %c0_47, %c0_48] : memref<9x32x32xbf16, #tpu.memory_space<vmem>>, vector<1x32x32xbf16>
    %44 = vector.shape_cast %43 : vector<1x32x32xbf16> to vector<32x32xbf16>
    %cst_49 = arith.constant dense<0.000000e+00> : vector<64x32xf32>
    %45 = tpu.matmul %42, %44, %cst_49 {dimension_numbers = #tpu.dot_dimension_numbers<[1], [0], [0], [1], [0, 0, 1, 1], [], []>} : vector<64x32xbf16>, vector<32x32xbf16>, vector<64x32xf32> -> vector<64x32xf32>
    %46 = arith.addf %39, %45 : vector<64x32xf32>
    %47 = vector.extract_strided_slice %40 {offsets = [0, 0, 1, 0], sizes = [1, 8, 8, 32], strides = [1, 1, 1, 1]} : vector<1x8x10x32xbf16> to vector<1x8x8x32xbf16>
    %48 = vector.shape_cast %47 : vector<1x8x8x32xbf16> to vector<64x32xbf16>
    %c4 = arith.constant 4 : index
    %c0_50 = arith.constant 0 : index
    %c0_51 = arith.constant 0 : index
    %49 = vector.load %arg4[%c4, %c0_50, %c0_51] : memref<9x32x32xbf16, #tpu.memory_space<vmem>>, vector<1x32x32xbf16>
    %50 = vector.shape_cast %49 : vector<1x32x32xbf16> to vector<32x32xbf16>
    %cst_52 = arith.constant dense<0.000000e+00> : vector<64x32xf32>
    %51 = tpu.matmul %48, %50, %cst_52 {dimension_numbers = #tpu.dot_dimension_numbers<[1], [0], [0], [1], [0, 0, 1, 1], [], []>} : vector<64x32xbf16>, vector<32x32xbf16>, vector<64x32xf32> -> vector<64x32xf32>
    %52 = arith.addf %46, %51 : vector<64x32xf32>
    %53 = vector.extract_strided_slice %40 {offsets = [0, 0, 2, 0], sizes = [1, 8, 8, 32], strides = [1, 1, 1, 1]} : vector<1x8x10x32xbf16> to vector<1x8x8x32xbf16>
    %54 = vector.shape_cast %53 : vector<1x8x8x32xbf16> to vector<64x32xbf16>
    %c5 = arith.constant 5 : index
    %c0_53 = arith.constant 0 : index
    %c0_54 = arith.constant 0 : index
    %55 = vector.load %arg4[%c5, %c0_53, %c0_54] : memref<9x32x32xbf16, #tpu.memory_space<vmem>>, vector<1x32x32xbf16>
    %56 = vector.shape_cast %55 : vector<1x32x32xbf16> to vector<32x32xbf16>
    %cst_55 = arith.constant dense<0.000000e+00> : vector<64x32xf32>
    %57 = tpu.matmul %54, %56, %cst_55 {dimension_numbers = #tpu.dot_dimension_numbers<[1], [0], [0], [1], [0, 0, 1, 1], [], []>} : vector<64x32xbf16>, vector<32x32xbf16>, vector<64x32xf32> -> vector<64x32xf32>
    %58 = arith.addf %52, %57 : vector<64x32xf32>
    %c0_56 = arith.constant 0 : index
    %c2_57 = arith.constant 2 : index
    %c0_58 = arith.constant 0 : index
    %c0_59 = arith.constant 0 : index
    %59 = vector.load %arg7[%c0_56, %c2_57, %c0_58, %c0_59] : memref<1x10x10x32xbf16, #tpu.memory_space<vmem>>, vector<1x8x10x32xbf16>
    %60 = vector.extract_strided_slice %59 {offsets = [0, 0, 0, 0], sizes = [1, 8, 8, 32], strides = [1, 1, 1, 1]} : vector<1x8x10x32xbf16> to vector<1x8x8x32xbf16>
    %61 = vector.shape_cast %60 : vector<1x8x8x32xbf16> to vector<64x32xbf16>
    %c6 = arith.constant 6 : index
    %c0_60 = arith.constant 0 : index
    %c0_61 = arith.constant 0 : index
    %62 = vector.load %arg4[%c6, %c0_60, %c0_61] : memref<9x32x32xbf16, #tpu.memory_space<vmem>>, vector<1x32x32xbf16>
    %63 = vector.shape_cast %62 : vector<1x32x32xbf16> to vector<32x32xbf16>
    %cst_62 = arith.constant dense<0.000000e+00> : vector<64x32xf32>
    %64 = tpu.matmul %61, %63, %cst_62 {dimension_numbers = #tpu.dot_dimension_numbers<[1], [0], [0], [1], [0, 0, 1, 1], [], []>} : vector<64x32xbf16>, vector<32x32xbf16>, vector<64x32xf32> -> vector<64x32xf32>
    %65 = arith.addf %58, %64 : vector<64x32xf32>
    %66 = vector.extract_strided_slice %59 {offsets = [0, 0, 1, 0], sizes = [1, 8, 8, 32], strides = [1, 1, 1, 1]} : vector<1x8x10x32xbf16> to vector<1x8x8x32xbf16>
    %67 = vector.shape_cast %66 : vector<1x8x8x32xbf16> to vector<64x32xbf16>
    %c7 = arith.constant 7 : index
    %c0_63 = arith.constant 0 : index
    %c0_64 = arith.constant 0 : index
    %68 = vector.load %arg4[%c7, %c0_63, %c0_64] : memref<9x32x32xbf16, #tpu.memory_space<vmem>>, vector<1x32x32xbf16>
    %69 = vector.shape_cast %68 : vector<1x32x32xbf16> to vector<32x32xbf16>
    %cst_65 = arith.constant dense<0.000000e+00> : vector<64x32xf32>
    %70 = tpu.matmul %67, %69, %cst_65 {dimension_numbers = #tpu.dot_dimension_numbers<[1], [0], [0], [1], [0, 0, 1, 1], [], []>} : vector<64x32xbf16>, vector<32x32xbf16>, vector<64x32xf32> -> vector<64x32xf32>
    %71 = arith.addf %65, %70 : vector<64x32xf32>
    %72 = vector.extract_strided_slice %59 {offsets = [0, 0, 2, 0], sizes = [1, 8, 8, 32], strides = [1, 1, 1, 1]} : vector<1x8x10x32xbf16> to vector<1x8x8x32xbf16>
    %73 = vector.shape_cast %72 : vector<1x8x8x32xbf16> to vector<64x32xbf16>
    %c8 = arith.constant 8 : index
    %c0_66 = arith.constant 0 : index
    %c0_67 = arith.constant 0 : index
    %74 = vector.load %arg4[%c8, %c0_66, %c0_67] : memref<9x32x32xbf16, #tpu.memory_space<vmem>>, vector<1x32x32xbf16>
    %75 = vector.shape_cast %74 : vector<1x32x32xbf16> to vector<32x32xbf16>
    %cst_68 = arith.constant dense<0.000000e+00> : vector<64x32xf32>
    %76 = tpu.matmul %73, %75, %cst_68 {dimension_numbers = #tpu.dot_dimension_numbers<[1], [0], [0], [1], [0, 0, 1, 1], [], []>} : vector<64x32xbf16>, vector<32x32xbf16>, vector<64x32xf32> -> vector<64x32xf32>
    %77 = arith.addf %71, %76 : vector<64x32xf32>
    %cst_69 = arith.constant dense<0.000000e+00> : vector<32xf32>
    %78 = vector.multi_reduction <add>, %77, %cst_69 [0] : vector<64x32xf32> to vector<32xf32>
    %79 = vector.shape_cast %78 : vector<32xf32> to vector<1x32xf32>
    %80 = vector.shape_cast %79 : vector<1x32xf32> to vector<1x1x32xf32>
    %c0_70 = arith.constant 0 : index
    %c0_71 = arith.constant 0 : index
    %c0_72 = arith.constant 0 : index
    %81 = vector.load %arg6[%c0_70, %c0_71, %c0_72] : memref<1x2x32xf32, #tpu.memory_space<vmem>>, vector<1x1x32xf32>
    tpu.vector_store %arg6[%c0_70, %c0_71, %c0_72], %80 {strides = array<i32>} : memref<1x2x32xf32, #tpu.memory_space<vmem>>, vector<1x1x32xf32>,
    %82 = arith.mulf %77, %77 : vector<64x32xf32>
    %cst_73 = arith.constant dense<0.000000e+00> : vector<32xf32>
    %83 = vector.multi_reduction <add>, %82, %cst_73 [0] : vector<64x32xf32> to vector<32xf32>
    %84 = vector.shape_cast %83 : vector<32xf32> to vector<1x32xf32>
    %85 = vector.shape_cast %84 : vector<1x32xf32> to vector<1x1x32xf32>
    %c0_74 = arith.constant 0 : index
    %c1_75 = arith.constant 1 : index
    %c0_76 = arith.constant 0 : index
    %86 = vector.load %arg6[%c0_74, %c1_75, %c0_76] : memref<1x2x32xf32, #tpu.memory_space<vmem>>, vector<1x1x32xf32>
    tpu.vector_store %arg6[%c0_74, %c1_75, %c0_76], %85 {strides = array<i32>} : memref<1x2x32xf32, #tpu.memory_space<vmem>>, vector<1x1x32xf32>,
    %87 = vector.shape_cast %77 : vector<64x32xf32> to vector<1x8x8x32xf32>
    %c0_77 = arith.constant 0 : index
    %c0_78 = arith.constant 0 : index
    %c0_79 = arith.constant 0 : index
    %c0_80 = arith.constant 0 : index
    %88 = vector.load %arg5[%c0_77, %c0_78, %c0_79, %c0_80] : memref<1x8x8x32xf32, #tpu.memory_space<vmem>>, vector<1x8x8x32xf32>
    tpu.vector_store %arg5[%c0_77, %c0_78, %c0_79, %c0_80], %87 {strides = array<i32>} : memref<1x8x8x32xf32, #tpu.memory_space<vmem>>, vector<1x8x8x32xf32>,
    return
  }
  func.func @transform_0(%arg0: i32) -> (i32, i32, i32, i32) {
    %c0_i32 = arith.constant 0 : i32
    %c0_i32_0 = arith.constant 0 : i32
    %c0_i32_1 = arith.constant 0 : i32
    %c0_i32_2 = arith.constant 0 : i32
    return %arg0, %c0_i32, %c0_i32_0, %c0_i32_1 : i32, i32, i32, i32
  }
  func.func @transform_1(%arg0: i32) -> (i32, i32) {
    %c0_i32 = arith.constant 0 : i32
    %c0_i32_0 = arith.constant 0 : i32
    %c0_i32_1 = arith.constant 0 : i32
    return %c0_i32, %c0_i32_0 : i32, i32
  }
  func.func @transform_2(%arg0: i32) -> (i32, i32) {
    %c0_i32 = arith.constant 0 : i32
    %c0_i32_0 = arith.constant 0 : i32
    %c0_i32_1 = arith.constant 0 : i32
    return %c0_i32, %c0_i32_0 : i32, i32
  }
  func.func @transform_3(%arg0: i32) -> (i32, i32, i32) {
    %c0_i32 = arith.constant 0 : i32
    %c0_i32_0 = arith.constant 0 : i32
    %c0_i32_1 = arith.constant 0 : i32
    %c0_i32_2 = arith.constant 0 : i32
    return %c0_i32, %c0_i32_0, %c0_i32_1 : i32, i32, i32
  }
  func.func @transform_4(%arg0: i32) -> (i32, i32, i32, i32) {
    %c0_i32 = arith.constant 0 : i32
    %c0_i32_0 = arith.constant 0 : i32
    %c0_i32_1 = arith.constant 0 : i32
    %c0_i32_2 = arith.constant 0 : i32
    return %arg0, %c0_i32, %c0_i32_0, %c0_i32_1 : i32, i32, i32, i32
  }
  func.func @transform_5(%arg0: i32) -> (i32, i32, i32) {
    %c0_i32 = arith.constant 0 : i32
    %c0_i32_0 = arith.constant 0 : i32
    %c0_i32_1 = arith.constant 0 : i32
    return %arg0, %c0_i32, %c0_i32_0 : i32, i32, i32
  }
}

</mosaic_0001>

<bundles_post_ra>
// kernel: tile.28
= control target key start
LH: loop header
LB: loop body
LE: loop exit
PB: predicated region body
PF: predicated region fallthrough
CT: control target
= control target key end

     0   :  { %s22_s0 = inlined_call_operand.vmem [shape: f32[8], index: 0, kind: input, shape index: {}]   ;;  %s23_s1 = inlined_call_operand.vmem [shape: f32[4,8], index: 1, kind: output, shape index: {}]  }
   0x1   :  { %v4_v0 = vld [vmem:[%s22_s0] ss:$0 sm:$0xff] }
   0x2   :  { %5 = vst [vmem:[%s23_s1] sm:$0xf] %v4_v0 }

// kernel: tile.29
= control target key start
LH: loop header
LB: loop body
LE: loop exit
PB: predicated region body
PF: predicated region fallthrough
CT: control target
= control target key end

     0   :  { %vm7_vm0 = vcmask 64512   ;;  %s37_s8 = smov 8   ;;  %s38_s9 = smov 16   ;;  %vm13_vm1 = vcmask 261312   ;;  %vm19_vm2 = vcmask 195712   ;;  %vm25_vm3 = vcmask 130112   ;;  %s55_s0 = inlined_call_operand.vmem [shape: f32[4,8], index: 0, kind: input, shape index: {}]   ;;  %s56_s1 = inlined_call_operand.vmem [shape: f32[1,32], index: 1, kind: output, shape index: {}]  }
   0x1   :  { %v4_v0 = vld [vmem:[%s55_s0] sm:$0xf]  ;;  %s36_s0 = smov 24  }
   0x2   :  { %5 = vst [vmem:[#allocation1] sm:$0xf] %v4_v0 }
   0x9   :  { %v10_v1 = vld [vmem:[#allocation1 + $0x3] sm:$0x1]   ;;  %v22_v2 = vld [vmem:[#allocation1 + $0x1] sm:$0x1]   ;;  %v6_v3 = vld [vmem:[#allocation1] sm:$0x1]  }
   0xa   :  { %11 = vrot.lane.b32.xlu0 %v10_v1, %s36_s0  ;;  %23 = vrot.lane.b32.xlu1 %v22_v2, %s37_s8  ;;  %v16_v4 = vld [vmem:[#allocation1 + $0x2] sm:$0x1]   ;;  %8 = vst.msk [vmem:[#allocation0] sm:$0x1] %vm7_vm0, %v6_v3  }
   0xe   :  { %17 = vrot.lane.b32.xlu0 %v16_v4, %s38_s9 }
  0x7c   :  { %v12_v5 = vpop.permute.xlu0 %11   ;;  %v24_v6 = vpop.permute.xlu1 %23  }
  0x7d   :  { %14 = vst.msk [vmem:[#allocation0] sm:$0x1] %vm13_vm1, %v12_v5  }
  0x80   :  { %v18_v7 = vpop.permute.xlu0 %17  }
  0x81   :  { %20 = vst.msk [vmem:[#allocation0] sm:$0x1] %vm19_vm2, %v18_v7  }
  0x82   :  { %26 = vst.msk [vmem:[#allocation0] sm:$0x1] %vm25_vm3, %v24_v6  }
  0x89   :  { %v30_v8 = vld [vmem:[#allocation0] sm:$0x1] }
  0x8a   :  { %32 = vst [vmem:[%s56_s1] sm:$0x1] %v30_v8 }

// kernel: upblock_forward.2
= control target key start
LH: loop header
LB: loop body
LE: loop exit
PB: predicated region body
PF: predicated region fallthrough
CT: control target
= control target key end

     0   :  { %s2935_s21 = smov 0   ;;  %s3587_s0 = inlined_call_operand.vmem [shape: bf16[2,64,8], index: 0, kind: input, shape index: {}]   ;;  %s3588_s1 = inlined_call_operand.vmem [shape: bf16[2,8,8,16], index: 1, kind: input, shape index: {}]   ;;  %s3589_s2 = inlined_call_operand.vmem [shape: bf16[8,16], index: 2, kind: input, shape index: {}]   ;;  %s3590_s3 = inlined_call_operand.vmem [shape: f32[1,16], index: 3, kind: input, shape index: {}]   ;;  %s3591_s4 = inlined_call_operand.vmem [shape: bf16[9,32,32], index: 4, kind: input, shape index: {}]   ;;  %s3592_s5 = inlined_call_operand.vmem [shape: bf16[2,8,8,32], index: 5, kind: output, shape index: {0}]   ;;  %s3593_s6 = inlined_call_operand.vmem [shape: f32[2,2,32], index: 6, kind: output, shape index: {1}]  }
   0x1 LB: > { %s2409_s22 = sadd.s32 4294967295, %s2896_s21   ;;  %p2413_p0 = scmp.ge.s32.totalorder %s2896_s21, 1  ;;  %s2896_s21 = sphi %s2935_s21, %s17_s21  }
   0x2   : > { %p225_p1 = scmp.lt.s32.totalorder %s2896_s21, 3 }
   0x4   : > { %p226_p2 = pnand %p2413_p0, %p225_p1 }
   0x5   : > { %v353_v0 = vld [vmem:[%s3589_s2] sm:$0xf] (!%p226_p2)  ;;  %vm394_vm0 = vcmask (!%p226_p2), 1043456   ;;  %p264_p3 = scmp.lt.s32.totalorder (!%p226_p2), %s2409_s22, 1  ;;  %vm381_vm1 = vcmask (!%p226_p2), 64512   ;;  %s2898_s8 = smov (!%p226_p2), 16  }
   0x6   : > { %229 = sbr.rel (%p226_p2) target bundleno = 602 (0x25a), region = 40  ;;  %2838 = vmatprep.subr.msk.bf16.mxu0 (!%p226_p2), %vm394_vm0, %v353_v0  ;;  %v396_v1 = vsel (!%p226_p2), %vm394_vm0, %v353_v0, 0  ;;  %vm286_vm2 = vcmask (!%p226_p2), 253952   ;;  %vm293_vm3 = vsmask.f32 (!%p226_p2), 256  ;;  %vm284_vm7 = vcmask (!%p226_p2), 257024  }
   0x7   : > { %2657 = vmatpush3.bf16.msra.mxu0 (!%p226_p2), %v396_v1  ;;  %v295_v14 = vld [vmem:[#allocation2 + $0x8] sm:$0x1] (!%p226_p2)  ;;  %vm2964_vm4 = vmand (!%p226_p2), %vm286_vm2, %vm293_vm3  ;;  %vm319_vm5 = vsmask.f32 (!%p226_p2), 7938  ;;  %v321_v16 = vld [vmem:[#allocation2 + $0xc] sm:$0x1] (!%p226_p2) }
   0x8   : > { %v296_v17 = vsel (!%p226_p2), %vm2964_vm4, 0, %v295_v14  ;;  %vm2972_vm6 = vmand (!%p226_p2), %vm286_vm2, %vm319_vm5  ;;  %v301_v19 = vld [vmem:[#allocation2 + $0x18] sm:$0x1] (!%p226_p2)  ;;  %v327_v20 = vld [vmem:[#allocation2 + $0x1c] sm:$0x1] (!%p226_p2)  ;;  %v2899_v48 = vmov (!%p226_p2), 0  }
   0x9   : > { %297 = vst [vmem:[#allocation2 + $0x8] sm:$0x1] (!%p226_p2), %v296_v17  ;;  %v322_v21 = vsel (!%p226_p2), %vm2972_vm6, 0, %v321_v16  ;;  %v302_v22 = vsel (!%p226_p2), %vm2964_vm4, 0, %v301_v19  ;;  %v328_v23 = vsel (!%p226_p2), %vm2972_vm6, 0, %v327_v20  ;;  %v2861_v49 = vld [vmem:[%s3591_s4 + $0x10] sm:$0xff] (!%p226_p2)   ;;  %vm3064_vm9 = vmand (!%p226_p2), %vm284_vm7, %vm319_vm5 }
   0xa   : > { %v304_v24 = vld [vmem:[#allocation2 + $0x20] sm:$0x1] (!%p226_p2)  ;;  %323 = vst [vmem:[#allocation2 + $0xc] sm:$0x1] (!%p226_p2), %v322_v21  ;;  %303 = vst [vmem:[#allocation2 + $0x18] sm:$0x1] (!%p226_p2), %v302_v22  ;;  %2666 = vmatprep.subr.bf16.mxu0 (!%p226_p2), %v2861_v49 }
   0xb   : > { %329 = vst [vmem:[#allocation2 + $0x1c] sm:$0x1] (!%p226_p2), %v328_v23  ;;  %v298_v25 = vld [vmem:[#allocation2 + $0x10] sm:$0x1] (!%p226_p2)  ;;  %v324_v26 = vld [vmem:[#allocation2 + $0x14] sm:$0x1] (!%p226_p2) }
   0xc   : > { %v305_v27 = vsel (!%p226_p2), %vm2964_vm4, 0, %v304_v24  ;;  %v299_v28 = vsel (!%p226_p2), %vm2964_vm4, 0, %v298_v25  ;;  %v325_v29 = vsel (!%p226_p2), %vm2972_vm6, 0, %v324_v26  ;;  %v330_v30 = vld [vmem:[#allocation2 + $0x24] sm:$0x1] (!%p226_p2)  ;;  %v2863_v51 = vld [vmem:[%s3591_s4 + $0x18] sm:$0xff] (!%p226_p2)  }
   0xd   : > { %s3605_s22 = smov (!%p264_p3, %s2409_s22), 1  ;;  %306 = vst [vmem:[#allocation2 + $0x20] sm:$0x1] %v305_v27  ;;  %300 = vst [vmem:[#allocation2 + $0x10] sm:$0x1] %v299_v28  ;;  %v331_v31 = vsel %vm2972_vm6, 0, %v330_v30 }
   0xe   : > { %s2949_s25 = sshll.u32 %s3605_s22, 5  ;;  %326 = vst [vmem:[#allocation2 + $0x14] sm:$0x1] %v325_v29  ;;  %332 = vst [vmem:[#allocation2 + $0x24] sm:$0x1] %v331_v31  ;;  %v2862_v50 = vld [vmem:[%s3591_s4 + $0x40] sm:$0xff]  }
   0xf   : > { %s268_s28 = scalar_lea.vmem %s3587_s0, %s2949_s25  ;;  %s273_s7 = scalar_lea.vmem %s3588_s1, %s2949_s25  ;;  %v307_v32 = vld [vmem:[#allocation2 + $0x28] sm:$0x1]  ;;  %v333_v34 = vld [vmem:[#allocation2 + $0x2c] sm:$0x1]  ;;  %v313_v36 = vld [vmem:[#allocation2 + $0x38] sm:$0x1]  ;;  %2714 = vmatprep.subr.bf16.mxu1 %v2862_v50 }
  0x10   : > { %v2849_v2 = vld [vmem:[%s268_s28] sm:$0xff]   ;;  %v2850_v3 = vld [vmem:[%s268_s28 + $0x8] sm:$0xff]   ;;  %v2851_v4 = vld [vmem:[%s268_s28 + $0x10] sm:$0xff]   ;;  %v308_v33 = vsel %vm2964_vm4, 0, %v307_v32  ;;  %v334_v35 = vsel %vm2972_vm6, 0, %v333_v34  ;;  %v314_v40 = vsel %vm2964_vm4, 0, %v313_v36  ;;  %2715 = vmatpush3.bf16.msra.mxu1 %v2862_v50 }
  0x11   : > { %2658 = vmatprep.mubr.msk.bf16.mxu0 %vm381_vm1, %v2849_v2  ;;  %v2853_v5 = vld [vmem:[%s273_s7] ss:$0 sps:$4 sm:$0xff]   ;;  %v2854_v6 = vld [vmem:[%s273_s7 + $0x8] ss:$0 sps:$4 sm:$0xff]   ;;  %v2855_v7 = vld [vmem:[%s273_s7 + $0x4] ss:$0 sps:$4 sm:$0xff]  }
  0x12   : > { %2659 = vmatmul.mubr.msk.bf16.vlgmr.msra.gmra.mrb[0].mxu0 %vm381_vm1, %v2850_v3  ;;  %503 = vrot.lane.b32.xlu0 %v2853_v5, %s2898_s8  ;;  %v2852_v8 = vld [vmem:[%s268_s28 + $0x18] sm:$0xff]   ;;  %v2856_v9 = vld [vmem:[%s273_s7 + $0xc] ss:$0 sps:$4 sm:$0xff]   ;;  %v2857_v10 = vld [vmem:[%s273_s7 + $0x10] ss:$0 sps:$4 sm:$0xff]   ;;  %vm519_vm8 = vcmask 130048  }
  0x13   : > { %2662 = vmatprep.mubr.msk.bf16.mxu0 %vm381_vm1, %v2851_v4  ;;  %507 = vrot.lane.b32.xlu1 %v2854_v6, %s2898_s8  ;;  %v2858_v11 = vld [vmem:[%s273_s7 + $0x14] ss:$0 sps:$4 sm:$0xff]   ;;  %v2859_v12 = vld [vmem:[%s273_s7 + $0x18] ss:$0 sps:$4 sm:$0xff]   ;;  %v2860_v13 = vld [vmem:[%s273_s7 + $0x1c] ss:$0 sps:$4 sm:$0xff]   ;;  %s3544_s7 = scalar_lea.vmem %s3592_s5, %s2949_s25 }
  0x14   : > { %309 = vst [vmem:[#allocation2 + $0x28] sm:$0x1] %v308_v33  ;;  %335 = vst [vmem:[#allocation2 + $0x2c] sm:$0x1] %v334_v35  ;;  %v339_v37 = vld [vmem:[#allocation2 + $0x3c] sm:$0x1]  ;;  %2667 = vmatpush3.bf16.msra.mxu0 %v2861_v49 }
  0x15   : > { %v310_v38 = vld [vmem:[#allocation2 + $0x30] sm:$0x1]  ;;  %v336_v39 = vld [vmem:[#allocation2 + $0x34] sm:$0x1]  ;;  %v340_v41 = vsel %vm2972_vm6, 0, %v339_v37  ;;  %v2864_v52 = vld [vmem:[%s3591_s4 + $0x48] sm:$0xff]   ;;  %2668 = vmatprep.subr.bf16.mxu0 %v2863_v51 }
  0x16   : > { %505 = vrot.lane.b32.xlu0 %v2855_v7, %s2898_s8  ;;  %v311_v42 = vsel %vm2964_vm4, 0, %v310_v38  ;;  %v337_v43 = vsel %vm2972_vm6, 0, %v336_v39  ;;  %315 = vst [vmem:[#allocation2 + $0x38] sm:$0x1] %v314_v40  ;;  %341 = vst [vmem:[#allocation2 + $0x3c] sm:$0x1] %v340_v41  ;;  %2716 = vmatprep.subr.bf16.mxu1 %v2864_v52 }
  0x17   : > { %509 = vrot.lane.b32.xlu1 %v2856_v9, %s2898_s8  ;;  %v316_v44 = vld [vmem:[#allocation2 + $0x40] sm:$0x1]  ;;  %v342_v45 = vld [vmem:[#allocation2 + $0x44] sm:$0x1]  ;;  %312 = vst [vmem:[#allocation2 + $0x30] sm:$0x1] %v311_v42  ;;  %2717 = vmatpush3.bf16.msra.mxu1 %v2864_v52 }
  0x18   : > { %338 = vst [vmem:[#allocation2 + $0x34] sm:$0x1] %v337_v43  ;;  %v317_v46 = vsel %vm2964_vm4, 0, %v316_v44  ;;  %v343_v47 = vsel %vm2972_vm6, 0, %v342_v45  ;;  %285 = vst.msk [vmem:[#allocation2] sm:$0xf] %vm284_vm7, %v2899_v48  ;;  %2669 = vmatpush3.bf16.msra.mxu0 %v2863_v51 }
  0x19   : > { %318 = vst [vmem:[#allocation2 + $0x40] sm:$0x1] %v317_v46  ;;  %344 = vst [vmem:[#allocation2 + $0x44] sm:$0x1] %v343_v47  ;;  %v3025_v53 = vld [vmem:[%s3591_s4 + $0x50] sm:$0xff]   ;;  %v3031_v54 = vld [vmem:[%s3591_s4] sm:$0xff]  }
  0x1a   : > { %2663 = vmatmul.mubr.msk.bf16.gmra.mrb[4].mxu0 %vm381_vm1, %v2852_v8  ;;  %511 = vrot.lane.b32.xlu0 %v2857_v10, %s2898_s8  ;;  %287 = vst.msk [vmem:[#allocation2 + $0x4] sm:$0x1] %vm286_vm2, %v2899_v48  ;;  %290 = vst.msk [vmem:[#allocation2 + $0x4c] sm:$0x1] %vm286_vm2, %v2899_v48  ;;  %v3037_v57 = vld [vmem:[%s3590_s3] ss:$0 sm:$0xff] }
  0x1b   : > { %513 = vrot.lane.b32.xlu1 %v2858_v11, %s2898_s8  ;;  %289 = vst.msk [vmem:[#allocation2 + $0x48] sm:$0xf] %vm284_vm7, %v2899_v48  ;;  %2726 = vmatprep.subr.bf16.mxu1 %v3025_v53  ;;  %v662_v33 = vld [vmem:[#allocation2 + $0x18] sm:$0xf]  ;;  %v665_v41 = vld [vmem:[#allocation2 + $0x1c] sm:$0x1] }
  0x1c   : > { %2678 = vmatprep.subr.bf16.mxu0 %v3031_v54  ;;  %v650_v46 = vld [vmem:[#allocation2 + $0x8] sm:$0xf]  ;;  %v653_v47 = vld [vmem:[#allocation2 + $0xc] sm:$0x1]  ;;  %vm718_vm10 = vsmask.f32 3328 }
  0x1d   : > { %vm719_vm11 = vsmask.f32 7440  ;;  %vm862_vm13 = vcmask 261120   ;;  %vm1057_vm14 = vcmask 1042432   ;;  %vm1058_vm15 = vcmask 1046532   ;;  %s2420_s25 = sshll.u32 %s3605_s22, 1 }
  0x1e   : > { %515 = vrot.lane.b32.xlu0 %v2859_v12, %s2898_s8  ;;  %vm3110_vm12 = vmor %vm718_vm10, %vm719_vm11  ;;  %s282_s10 = scalar_lea.vmem %s3593_s6, %s2420_s25 }
  0x1f   : > { %517 = vrot.lane.b32.xlu1 %v2860_v13, %s2898_s8  ;;  %v3039_v59 = vld [vmem:[#allocation2] sm:$0xf]  ;;  %vm3292_vm0 = vmor %vm1057_vm14, %vm1058_vm15 }
  0x20   : > { %v722_v5 = vshrl.u32 %v3039_v59, 16  ;;  %v725_v6 = vshll.u32 %v3039_v59, 16 }
  0x21   : > { %v3048_v11 = vld [vmem:[#allocation2 + $0x4] sm:$0x1] }
  0x22   : > { %v731_v16 = vshll.u32 %v3048_v11, 16  ;;  %v3053_v19 = vrot.slane %v722_v5, 4  ;;  %v3055_v20 = vrot.slane %v725_v6, 5 }
  0x84   : > { %v504_v55 = vpop.permute.xlu0 %503 }
  0x85   : > { %v508_v56 = vpop.permute.xlu1 %507 }
  0x88   : > { %v506_v0 = vpop.permute.xlu0 %505 }
  0x89   : > { %v510_v4 = vpop.permute.xlu1 %509 }
  0x8c   : > { %v512_v25 = vpop.permute.xlu0 %511 }
  0x8d   : > { %v3059_v32 = vpop.permute.xlu1 %513 }
  0xe5   : > { %v2660_v58 = vpop.f32.mrb[0].mxu0 }
  0xe6   : > { %v441_v60 = vadd.f32 %v2660_v58, %v3037_v57  ;;  %v432_v61 = vpop.f32.mrb[1].mxu0  ;;  %v668_v58 = vld [vmem:[#allocation2 + $0x20] sm:$0xf] }
  0xe7   : > { %v433_v62 = vadd.f32 %v3037_v57, %v432_v61  ;;  %v2661_v63 = vpop.f32.mrb[2].mxu0 }
  0xe8   : > { %v465_v1 = vpack.c.bf16 %v441_v60, %v441_v60  ;;  %v444_v2 = vadd.f32 %v2661_v63, %v3037_v57  ;;  %v435_v3 = vpop.f32.mrb[3].mxu0  ;;  %v671_v60 = vld [vmem:[#allocation2 + $0x24] sm:$0x1] }
  0xe9   : > { %v463_v7 = vpack.c.bf16 %v433_v62, %v433_v62  ;;  %v436_v8 = vadd.f32 %v3037_v57, %v435_v3 }
  0xea   : > { %v528_v9 = vsel %vm519_vm8, %v465_v1, %v508_v56  ;;  %v466_v10 = vpack.c.bf16 %v444_v2, %v444_v2  ;;  %v659_v1 = vld [vmem:[#allocation2 + $0x14] sm:$0x1] }
  0xeb   : > { %v522_v12 = vsel %vm519_vm8, %v463_v7, %v504_v55  ;;  %v2440_v13 = vcombine.low %v528_v9, %v528_v9  ;;  %v464_v14 = vpack.c.bf16 %v436_v8, %v436_v8  ;;  %v516_v8 = vpop.permute.xlu0 %515  ;;  %v518_v9 = vpop.permute.xlu1 %517 }
  0xec   : > { %v2438_v17 = vcombine.low %v522_v12, %v522_v12  ;;  %v531_v18 = vsel %vm519_vm8, %v466_v10, %v510_v4 }
  0xed   : > { %v585_v21 = vshrl.u32 %v2440_v13, 16  ;;  %v588_v22 = vshll.u32 %v2440_v13, 16  ;;  %v525_v23 = vsel %vm519_vm8, %v464_v14, %v506_v0  ;;  %v2441_v24 = vcombine.low %v531_v18, %v531_v18  ;;  %v2664_v26 = vpop.f32.mrb[4].mxu0  ;;  %v656_v0 = vld [vmem:[#allocation2 + $0x10] sm:$0xf] }
  0xee   : > { %v569_v27 = vshrl.u32 %v2438_v17, 16  ;;  %v572_v28 = vshll.u32 %v2438_v17, 16  ;;  %v2439_v29 = vcombine.low %v525_v23, %v525_v23  ;;  %v457_v30 = vadd.f32 %v2664_v26, %v3037_v57  ;;  %v448_v31 = vpop.f32.mrb[5].mxu0 }
  0xef   : > { %v587_v34 = vrot.slane %v585_v21, 7  ;;  %v593_v35 = vshrl.u32 %v2441_v24, 16  ;;  %v596_v36 = vshll.u32 %v2441_v24, 16  ;;  %v449_v37 = vadd.f32 %v3037_v57, %v448_v31  ;;  %v2665_v38 = vpop.f32.mrb[6].mxu0 }
  0xf0   : > { %v571_v39 = vrot.slane %v569_v27, 7  ;;  %v577_v42 = vshrl.u32 %v2439_v29, 16  ;;  %v580_v43 = vshll.u32 %v2439_v29, 16  ;;  %v469_v44 = vpack.c.bf16 %v457_v30, %v457_v30  ;;  %v451_v45 = vpop.f32.mrb[7].mxu0  ;;  %v674_v29 = vld [vmem:[#allocation2 + $0x28] sm:$0xf] }
  0xf1   : > { %v590_v48 = vor.u32 %v588_v22, %v587_v34  ;;  %v591_v49 = vrot.slane %v587_v34, 4  ;;  %v595_v50 = vrot.slane %v593_v35, 7  ;;  %v467_v51 = vpack.c.bf16 %v449_v37, %v449_v37  ;;  %v677_v34 = vld [vmem:[#allocation2 + $0x2c] sm:$0x1] }
  0xf2   : > { %v574_v52 = vor.u32 %v572_v28, %v571_v39  ;;  %v575_v55 = vrot.slane %v571_v39, 4  ;;  %v579_v56 = vrot.slane %v577_v42, 7  ;;  %v460_v61 = vadd.f32 %v2665_v38, %v3037_v57 }
  0xf3   : > { %v663_v62 = vsel %vm3064_vm9, %v590_v48, %v662_v33  ;;  %v666_v63 = vsel %vm2964_vm4, %v591_v49, %v665_v41  ;;  %v598_v2 = vor.u32 %v596_v36, %v595_v50  ;;  %v599_v3 = vrot.slane %v595_v50, 4 }
  0xf4   : > { %v651_v4 = vsel %vm3064_vm9, %v574_v52, %v650_v46  ;;  %v654_v5 = vsel %vm2964_vm4, %v575_v55, %v653_v47  ;;  %664 = vst [vmem:[#allocation2 + $0x18] sm:$0xf] %v663_v62  ;;  %667 = vst [vmem:[#allocation2 + $0x1c] sm:$0x1] %v666_v63  ;;  %v582_v6 = vor.u32 %v580_v43, %v579_v56  ;;  %v583_v7 = vrot.slane %v579_v56, 4 }
  0xf5   : > { %652 = vst [vmem:[#allocation2 + $0x8] sm:$0xf] %v651_v4  ;;  %655 = vst [vmem:[#allocation2 + $0xc] sm:$0x1] %v654_v5  ;;  %v669_v10 = vsel %vm3064_vm9, %v598_v2, %v668_v58  ;;  %v672_v12 = vsel %vm2964_vm4, %v599_v3, %v671_v60  ;;  %v534_v13 = vsel %vm519_vm8, %v467_v51, %v512_v25  ;;  %v3093_v31 = vrot.slane %v731_v16, 5 }
  0xf6   : > { %v470_v14 = vpack.c.bf16 %v460_v61, %v460_v61  ;;  %v657_v17 = vsel %vm3064_vm9, %v582_v6, %v656_v0  ;;  %v660_v18 = vsel %vm2964_vm4, %v583_v7, %v659_v1  ;;  %670 = vst [vmem:[#allocation2 + $0x20] sm:$0xf] %v669_v10  ;;  %673 = vst [vmem:[#allocation2 + $0x24] sm:$0x1] %v672_v12  ;;  %v680_v55 = vld [vmem:[#allocation2 + $0x30] sm:$0xf] }
  0xf7   : > { %v2442_v21 = vcombine.low %v534_v13, %v534_v13  ;;  %v452_v22 = vadd.f32 %v3037_v57, %v451_v45  ;;  %658 = vst [vmem:[#allocation2 + $0x10] sm:$0xf] %v657_v17  ;;  %661 = vst [vmem:[#allocation2 + $0x14] sm:$0x1] %v660_v18  ;;  %v540_v23 = vsel %vm519_vm8, %v469_v44, %v516_v8  ;;  %v692_v45 = vld [vmem:[#allocation2 + $0x40] sm:$0xf] }
  0xf8   : > { %v543_v24 = vsel %vm519_vm8, %v470_v14, %v518_v9  ;;  %v728_v25 = vor.u32 %v3055_v20, %v3053_v19  ;;  %v2444_v28 = vcombine.low %v540_v23, %v540_v23  ;;  %v686_v19 = vld [vmem:[#allocation2 + $0x38] sm:$0xf]  ;;  %v689_v20 = vld [vmem:[#allocation2 + $0x3c] sm:$0x1]  ;;  %v683_v56 = vld [vmem:[#allocation2 + $0x34] sm:$0x1] }
  0xf9   : > { %v601_v26 = vshrl.u32 %v2442_v21, 16  ;;  %v468_v27 = vpack.c.bf16 %v452_v22, %v452_v22  ;;  %v2445_v30 = vcombine.low %v543_v24, %v543_v24  ;;  %v604_v33 = vshll.u32 %v2442_v21, 16  ;;  %v695_v61 = vld [vmem:[#allocation2 + $0x44] sm:$0x1] }
  0xfa   : > { %v617_v36 = vshrl.u32 %v2444_v28, 16  ;;  %v620_v38 = vshll.u32 %v2444_v28, 16  ;;  %v3097_v41 = vrot.slane %v728_v25, 4 }
  0xfb   : > { %v603_v57 = vrot.slane %v601_v26, 7  ;;  %v537_v35 = vsel %vm519_vm8, %v468_v27, %v3059_v32  ;;  %v625_v39 = vshrl.u32 %v2445_v30, 16  ;;  %v628_v16 = vshll.u32 %v2445_v30, 16  ;;  %v3124_v9 = vld [vmem:[#allocation2 + $0x18] sm:$0xf] }
  0xfc   : > { %v2443_v37 = vcombine.low %v537_v35, %v537_v35  ;;  %v619_v44 = vrot.slane %v617_v36, 7  ;;  %v3099_v46 = vld [vmem:[#allocation2 + $0x8] sm:$0xf]  ;;  %v3101_v50 = vld [vmem:[#allocation2 + $0xc] sm:$0x1]  ;;  %v734_v18 = vsel %vm3110_vm12, %v3097_v41, %v3093_v31  ;;  %v764_v28 = vshrl.u32 %v3124_v9, 16 }
  0xfd   : > { %v606_v42 = vor.u32 %v604_v33, %v603_v57  ;;  %v607_v43 = vrot.slane %v603_v57, 4  ;;  %v627_v49 = vrot.slane %v625_v39, 7  ;;  %v736_v32 = vshrl.u32 %v3099_v46, 16  ;;  %v3130_v17 = vld [vmem:[#allocation2 + $0x1c] sm:$0x1] }
  0xfe   : > { %v609_v47 = vshrl.u32 %v2443_v37, 16  ;;  %v612_v48 = vshll.u32 %v2443_v37, 16  ;;  %v622_v58 = vor.u32 %v620_v38, %v619_v44  ;;  %v623_v60 = vrot.slane %v619_v44, 4  ;;  %v3114_v3 = vld [vmem:[#allocation2 + $0x10] sm:$0xf] }
  0xff   : > { %v675_v51 = vsel %vm3064_vm9, %v606_v42, %v674_v29  ;;  %v678_v52 = vsel %vm2964_vm4, %v607_v43, %v677_v34  ;;  %v630_v63 = vor.u32 %v628_v16, %v627_v49  ;;  %v631_v0 = vrot.slane %v627_v49, 4  ;;  %v3122_v8 = vld [vmem:[#allocation2 + $0x14] sm:$0x1]  ;;  %v3138_v24 = vld [vmem:[#allocation2 + $0x8] sm:$0xf] }
 0x100   : > { %676 = vst [vmem:[#allocation2 + $0x28] sm:$0xf] %v675_v51  ;;  %679 = vst [vmem:[#allocation2 + $0x2c] sm:$0x1] %v678_v52  ;;  %v611_v62 = vrot.slane %v609_v47, 7  ;;  %v738_v2 = vrot.slane %v736_v32, 4  ;;  %v687_v4 = vsel %vm3064_vm9, %v622_v58, %v686_v19  ;;  %v690_v5 = vsel %vm2964_vm4, %v623_v60, %v689_v20 }
 0x101   : > { %v739_v6 = vshll.u32 %v3099_v46, 16  ;;  %v745_v7 = vshll.u32 %v3101_v50, 16  ;;  %688 = vst [vmem:[#allocation2 + $0x38] sm:$0xf] %v687_v4  ;;  %691 = vst [vmem:[#allocation2 + $0x3c] sm:$0x1] %v690_v5  ;;  %v693_v13 = vsel %vm3064_vm9, %v630_v63, %v692_v45  ;;  %v696_v14 = vsel %vm2964_vm4, %v631_v0, %v695_v61 }
 0x102   : > { %v614_v10 = vor.u32 %v612_v48, %v611_v62  ;;  %v615_v12 = vrot.slane %v611_v62, 4  ;;  %694 = vst [vmem:[#allocation2 + $0x40] sm:$0xf] %v693_v13  ;;  %697 = vst [vmem:[#allocation2 + $0x44] sm:$0x1] %v696_v14  ;;  %v750_v22 = vshrl.u32 %v3114_v3, 16 }
 0x103   : > { %v741_v21 = vrot.slane %v739_v6, 5  ;;  %v753_v23 = vshll.u32 %v3114_v3, 16  ;;  %v759_v27 = vshll.u32 %v3122_v8, 16  ;;  %v767_v57 = vshll.u32 %v3124_v9, 16  ;;  %v3147_v33 = vld [vmem:[#allocation2 + $0x10] sm:$0xf] }
 0x104   : > { %v681_v25 = vsel %vm3064_vm9, %v614_v10, %v680_v55  ;;  %v684_v26 = vsel %vm2964_vm4, %v615_v12, %v683_v56  ;;  %v752_v30 = vrot.slane %v750_v22, 4  ;;  %v747_v34 = vrot.slane %v745_v7, 5  ;;  %v3152_v39 = vld [vmem:[#allocation2 + $0xc] sm:$0x1]  ;;  %v3157_v16 = vld [vmem:[#allocation2 + $0x14] sm:$0x1] }
 0x105   : > { %682 = vst [vmem:[#allocation2 + $0x30] sm:$0xf] %v681_v25  ;;  %685 = vst [vmem:[#allocation2 + $0x34] sm:$0x1] %v684_v26  ;;  %v742_v29 = vor.u32 %v741_v21, %v738_v2  ;;  %v755_v31 = vrot.slane %v753_v23, 5  ;;  %v766_v35 = vrot.slane %v764_v28, 4 }
 0x106   : > { %v773_v40 = vshll.u32 %v3130_v17, 16  ;;  %v1345_v15 = vshrl.u32 %v3138_v24, 16  ;;  %v769_v19 = vrot.slane %v767_v57, 5  ;;  %v1348_v20 = vshll.u32 %v3138_v24, 16  ;;  %v3159_v48 = vld [vmem:[#allocation2 + $0x18] sm:$0xf] }
 0x107   : > { %v743_v36 = vrot.slane %v742_v29, 4  ;;  %v756_v37 = vor.u32 %v755_v31, %v752_v30  ;;  %v761_v38 = vrot.slane %v759_v27, 5  ;;  %v1359_v42 = vshrl.u32 %v3147_v33, 16  ;;  %v3164_v60 = vld [vmem:[#allocation2 + $0x1c] sm:$0x1]  ;;  %v2868_v14 = vld [vmem:[%s3591_s4 + $0x8] sm:$0xff]  }
 0x108   : > { %v1347_v41 = vrot.slane %v1345_v15, 4  ;;  %v770_v45 = vor.u32 %v769_v19, %v766_v35  ;;  %v1350_v47 = vrot.slane %v1348_v20, 5  ;;  %v1362_v51 = vshll.u32 %v3147_v33, 16  ;;  %v3169_v0 = vld [vmem:[#allocation2 + $0x20] sm:$0xf] }
 0x109   : > { %v748_v43 = vsel %vm3110_vm12, %v743_v36, %v747_v34  ;;  %v757_v44 = vrot.slane %v756_v37, 4  ;;  %v1361_v32 = vrot.slane %v1359_v42, 4  ;;  %v775_v56 = vrot.slane %v773_v40, 5  ;;  %v3175_v12 = vld [vmem:[#allocation2 + $0x24] sm:$0x1] }
 0x10a   : > { %v2450_v49 = vcombine.low %v734_v18, %v748_v43  ;;  %v771_v55 = vrot.slane %v770_v45, 4  ;;  %v1351_v58 = vor.u32 %v1350_v47, %v1347_v41  ;;  %v1354_v61 = vshll.u32 %v3152_v39, 16  ;;  %v3183_v25 = vld [vmem:[#allocation2 + $0x20] sm:$0xf]  ;;  %v3187_v34 = vld [vmem:[#allocation2 + $0x28] sm:$0xf] }
 0x10b   : > { %v762_v52 = vsel %vm3110_vm12, %v757_v44, %v761_v38  ;;  %v1364_v62 = vrot.slane %v1362_v51, 5  ;;  %v1368_v63 = vshll.u32 %v3157_v16, 16  ;;  %v1373_v2 = vshrl.u32 %v3159_v48, 16  ;;  %v3193_v35 = vld [vmem:[%s3591_s4 + $0x20] sm:$0xff]   ;;  %v3201_v37 = vld [vmem:[#allocation2 + $0x2c] sm:$0x1] }
 0x10c   : > { %2670 = vmatprep.mubr.msk.bf16.mxu0 %vm862_vm13, %v2450_v49  ;;  %v776_v4 = vsel %vm3110_vm12, %v771_v55, %v775_v56  ;;  %v1376_v5 = vshll.u32 %v3159_v48, 16  ;;  %v1352_v7 = vrot.slane %v1351_v58, 4  ;;  %v1382_v21 = vshll.u32 %v3164_v60, 16  ;;  %v3199_v36 = vld [vmem:[#allocation2 + $0x24] sm:$0x1] }
 0x10d   : > { %v2451_v6 = vcombine.low %v762_v52, %v776_v4  ;;  %v1365_v10 = vor.u32 %v1364_v62, %v1361_v32  ;;  %v1375_v13 = vrot.slane %v1373_v2, 4  ;;  %v1387_v22 = vshrl.u32 %v3169_v0, 16  ;;  %v3205_v43 = vld [vmem:[#allocation2 + $0x30] sm:$0xf]  ;;  %v3209_v32 = vld [vmem:[#allocation2 + $0x34] sm:$0x1] }
 0x10e   : > { %v1378_v18 = vrot.slane %v1376_v5, 5  ;;  %v1390_v23 = vshll.u32 %v3169_v0, 16  ;;  %v1356_v26 = vrot.slane %v1354_v61, 5  ;;  %v1370_v28 = vrot.slane %v1368_v63, 5  ;;  %v3214_v63 = vld [vmem:[#allocation2 + $0x38] sm:$0xf] }
 0x10f   : > { %2671 = vmatmul.mubr.msk.bf16.vlgmr.msra.gmra.mrb[8].mxu0 %vm862_vm13, %v2451_v6  ;;  %v1366_v27 = vrot.slane %v1365_v10, 4  ;;  %v1389_v30 = vrot.slane %v1387_v22, 4  ;;  %v1396_v57 = vshll.u32 %v3175_v12, 16  ;;  %v778_v19 = vshrl.u32 %v3183_v25, 16  ;;  %v3222_v6 = vld [vmem:[#allocation2 + $0x3c] sm:$0x1] }
 0x110   : > { %v1379_v29 = vor.u32 %v1378_v18, %v1375_v13  ;;  %v1392_v31 = vrot.slane %v1390_v23, 5  ;;  %2679 = vmatpush3.bf16.msra.mxu0 %v3031_v54  ;;  %v1357_v40 = vsel %vm3110_vm12, %v1352_v7, %v1356_v26  ;;  %v781_v20 = vshll.u32 %v3183_v25, 16  ;;  %v3226_v13 = vld [vmem:[#allocation2 + $0x28] sm:$0xf]  ;;  %v2867_v23 = vld [vmem:[%s3591_s4 + $0x58] sm:$0xff]  }
 0x111   : > { %v1371_v15 = vsel %vm3110_vm12, %v1366_v27, %v1370_v28  ;;  %2680 = vmatprep.subr.bf16.mxu0 %v2868_v14  ;;  %v1384_v41 = vrot.slane %v1382_v21, 5  ;;  %v780_v44 = vrot.slane %v778_v19, 4  ;;  %v792_v47 = vshrl.u32 %v3187_v34, 16 }
 0x112   : > { %v2510_v54 = vcombine.low %v1357_v40, %v1371_v15  ;;  %v1380_v38 = vrot.slane %v1379_v29, 4  ;;  %v1393_v42 = vor.u32 %v1392_v31, %v1389_v30  ;;  %v783_v45 = vrot.slane %v781_v20, 5 }
 0x113   : > { %v795_v49 = vshll.u32 %v3187_v34, 16  ;;  %v1398_v52 = vrot.slane %v1396_v57, 5  ;;  %v787_v55 = vshll.u32 %v3199_v36, 16  ;;  %v801_v56 = vshll.u32 %v3201_v37, 16 }
 0x114   : > { %2718 = vmatprep.mubr.msk.bf16.mxu1 %vm862_vm13, %v2510_v54  ;;  %v1394_v51 = vrot.slane %v1393_v42, 4  ;;  %2681 = vmatpush3.bf16.msra.mxu0 %v2868_v14  ;;  %v784_v58 = vor.u32 %v783_v45, %v780_v44  ;;  %v794_v61 = vrot.slane %v792_v47, 4  ;;  %v806_v2 = vshrl.u32 %v3205_v43, 16  ;;  %v3237_v54 = vld [vmem:[#allocation2 + $0x30] sm:$0xf] }
 0x115   : > { %v797_v62 = vrot.slane %v795_v49, 5  ;;  %2690 = vmatprep.subr.bf16.mxu0 %v3193_v35  ;;  %v1385_v4 = vsel %vm3110_vm12, %v1380_v38, %v1384_v41  ;;  %v809_v7 = vshll.u32 %v3205_v43, 16  ;;  %v815_v10 = vshll.u32 %v3209_v32, 16  ;;  %v3244_v45 = vld [vmem:[#allocation2 + $0x2c] sm:$0x1] }
 0x116   : > { %v1399_v5 = vsel %vm3110_vm12, %v1394_v51, %v1398_v52  ;;  %v785_v18 = vrot.slane %v784_v58, 4  ;;  %v808_v22 = vrot.slane %v806_v2, 4  ;;  %v789_v26 = vrot.slane %v787_v55, 5  ;;  %v3251_v55 = vld [vmem:[#allocation2 + $0x34] sm:$0x1] }
 0x117   : > { %v2511_v14 = vcombine.low %v1385_v4, %v1399_v5  ;;  %v798_v21 = vor.u32 %v797_v62, %v794_v61  ;;  %v811_v27 = vrot.slane %v809_v7, 5  ;;  %v820_v28 = vshrl.u32 %v3214_v63, 16  ;;  %v3253_v58 = vld [vmem:[#allocation2 + $0x38] sm:$0xf] }
 0x118   : > { %v823_v29 = vshll.u32 %v3214_v63, 16  ;;  %v803_v31 = vrot.slane %v801_v56, 5  ;;  %v829_v57 = vshll.u32 %v3222_v6, 16  ;;  %v1401_v40 = vshrl.u32 %v3226_v13, 16 }
 0x119   : > { %2719 = vmatmul.mubr.msk.bf16.vlgmr.msra.gmra.mrb[0].mxu1 %vm862_vm13, %v2511_v14  ;;  %v799_v30 = vrot.slane %v798_v21, 4  ;;  %v812_v15 = vor.u32 %v811_v27, %v808_v22  ;;  %v822_v19 = vrot.slane %v820_v28, 4  ;;  %v1404_v38 = vshll.u32 %v3226_v13, 16  ;;  %v3261_v14 = vld [vmem:[#allocation2 + $0x40] sm:$0xf] }
 0x11a   : > { %2727 = vmatpush3.bf16.msra.mxu1 %v3025_v53  ;;  %v825_v20 = vrot.slane %v823_v29, 5  ;;  %v790_v41 = vsel %vm3110_vm12, %v785_v18, %v789_v26  ;;  %v817_v44 = vrot.slane %v815_v10, 5  ;;  %v1403_v47 = vrot.slane %v1401_v40, 4  ;;  %v3249_v53 = vld [vmem:[%s3591_s4 + $0x60] sm:$0xff]  }
 0x11b   : > { %v804_v42 = vsel %vm3110_vm12, %v799_v30, %v803_v31  ;;  %2728 = vmatprep.subr.bf16.mxu1 %v2867_v23  ;;  %v813_v51 = vrot.slane %v812_v15, 4  ;;  %v1406_v56 = vrot.slane %v1404_v38, 5  ;;  %v831_v61 = vrot.slane %v829_v57, 5  ;;  %v3269_v57 = vld [vmem:[#allocation2 + $0x3c] sm:$0x1] }
 0x11c   : > { %v2452_v49 = vcombine.low %v790_v41, %v804_v42  ;;  %v826_v52 = vor.u32 %v825_v20, %v822_v19  ;;  %v1415_v62 = vshrl.u32 %v3237_v54, 16  ;;  %v1418_v2 = vshll.u32 %v3237_v54, 16 }
 0x11d   : > { %v818_v4 = vsel %vm3110_vm12, %v813_v51, %v817_v44  ;;  %v1407_v7 = vor.u32 %v1406_v56, %v1403_v47  ;;  %v1410_v10 = vshll.u32 %v3244_v45, 16  ;;  %v1424_v22 = vshll.u32 %v3251_v55, 16 }
 0x11e   : > { %2674 = vmatprep.mubr.msk.bf16.mxu0 %vm862_vm13, %v2452_v49  ;;  %v827_v5 = vrot.slane %v826_v52, 4  ;;  %2729 = vmatpush3.bf16.msra.mxu1 %v2867_v23  ;;  %v1417_v18 = vrot.slane %v1415_v62, 4  ;;  %v1420_v21 = vrot.slane %v1418_v2, 5  ;;  %v1429_v26 = vshrl.u32 %v3253_v58, 16  ;;  %v3271_v23 = vld [vmem:[#allocation2 + $0x44] sm:$0x1] }
 0x11f   : > { %2738 = vmatprep.subr.bf16.mxu1 %v3249_v53  ;;  %v1408_v28 = vrot.slane %v1407_v7, 4  ;;  %v1432_v29 = vshll.u32 %v3253_v58, 16  ;;  %v1443_v15 = vshrl.u32 %v3261_v14, 16  ;;  %v2460_v19 = vcombine.low %v3039_v59, %v3099_v46 }
 0x120   : > { %v832_v27 = vsel %vm3110_vm12, %v827_v5, %v831_v61  ;;  %v1421_v31 = vor.u32 %v1420_v21, %v1417_v18  ;;  %v1431_v40 = vrot.slane %v1429_v26, 4  ;;  %v1446_v38 = vshll.u32 %v3261_v14, 16 }
 0x121   : > { %v2453_v30 = vcombine.low %v818_v4, %v832_v27  ;;  %v1434_v20 = vrot.slane %v1432_v29, 5  ;;  %v1412_v41 = vrot.slane %v1410_v10, 5  ;;  %v1426_v44 = vrot.slane %v1424_v22, 5 }
 0x122   : > { %v1422_v42 = vrot.slane %v1421_v31, 4  ;;  %v1445_v47 = vrot.slane %v1443_v15, 4  ;;  %v1438_v51 = vshll.u32 %v3269_v57, 16  ;;  %v1448_v52 = vrot.slane %v1446_v38, 5  ;;  %v2876_v31 = vld [vmem:[%s3591_s4 + $0x28] sm:$0xff]  }
 0x123   : > { %2675 = vmatmul.mubr.msk.bf16.gmra.mrb[12].mxu0 %vm862_vm13, %v2453_v30  ;;  %v1435_v49 = vor.u32 %v1434_v20, %v1431_v40  ;;  %v1452_v56 = vshll.u32 %v3271_v23, 16  ;;  %v1584_v61 = vrot.slane %v3157_v16, 5  ;;  %v1413_v62 = vsel %vm3110_vm12, %v1408_v28, %v1412_v41 }
 0x124   : > { %2682 = vmatprep.mubr.msk.bf16.mxu0 %vm862_vm13, %v2460_v19  ;;  %v1427_v2 = vsel %vm3110_vm12, %v1422_v42, %v1426_v44  ;;  %v2521_v4 = vrot.slane %v3147_v33, 9  ;;  %v1449_v10 = vor.u32 %v1448_v52, %v1445_v47  ;;  %v1580_v18 = vrot.slane %v3152_v39, 5 }
 0x125   : > { %v2512_v5 = vcombine.low %v1413_v62, %v1427_v2  ;;  %v1436_v7 = vrot.slane %v1435_v49, 4  ;;  %v2520_v21 = vrot.slane %v3138_v24, 9  ;;  %v1440_v22 = vrot.slane %v1438_v51, 5 }
 0x126   : > { %v1450_v26 = vrot.slane %v1449_v10, 4  ;;  %v1454_v16 = vrot.slane %v1452_v56, 5  ;;  %v1585_v28 = vsel %vm3292_vm0, %v2521_v4, %v1584_v61  ;;  %v2461_v29 = vcombine.low %v3114_v3, %v3124_v9 }
 0x127   : > { %2722 = vmatprep.mubr.msk.bf16.mxu1 %vm862_vm13, %v2512_v5  ;;  %v2470_v39 = vrot.slane %v3039_v59, 9  ;;  %v1062_v30 = vrot.slane %v3048_v11, 5  ;;  %v1592_v40 = vrot.slane %v3175_v12, 5  ;;  %v1441_v15 = vsel %vm3110_vm12, %v1436_v7, %v1440_v22 }
 0x128   : > { %v1455_v19 = vsel %vm3110_vm12, %v1450_v26, %v1454_v16  ;;  %v2462_v20 = vcombine.low %v3183_v25, %v3187_v34  ;;  %v1581_v59 = vsel %vm3292_vm0, %v2520_v21, %v1580_v18  ;;  %v2471_v11 = vrot.slane %v3099_v46, 9  ;;  %v2880_v46 = vld [vmem:[%s3591_s4 + $0x30] sm:$0xff]   ;;  %v2874_v18 = vld [vmem:[%s3591_s4 + $0x68] sm:$0xff]  }
 0x129   : > { %v2513_v38 = vcombine.low %v1441_v15, %v1455_v19  ;;  %v1066_v41 = vrot.slane %v3101_v50, 5  ;;  %v2532_v12 = vcombine.low %v1581_v59, %v1585_v28  ;;  %v2523_v42 = vrot.slane %v3169_v0, 9  ;;  %v2884_v15 = vld [vmem:[%s3591_s4 + $0x38] sm:$0xff]  }
 0x12a   : > { %v2525_v44 = vrot.slane %v3237_v54, 9  ;;  %v1600_v47 = vrot.slane %v3251_v55, 5  ;;  %v1588_v49 = vrot.slane %v3164_v60, 5  ;;  %v2522_v51 = vrot.slane %v3159_v48, 9 }
 0x12b   : > { %2683 = vmatmul.mubr.msk.bf16.vlgmr.msra.gmra.mrb[8].mxu0 %vm862_vm13, %v2461_v29  ;;  %2723 = vmatmul.mubr.msk.bf16.gmra.mrb[4].mxu1 %vm862_vm13, %v2513_v38  ;;  %v2524_v50 = vrot.slane %v3226_v13, 9  ;;  %v1596_v52 = vrot.slane %v3244_v45, 5  ;;  %v1067_v60 = vsel %vm3292_vm0, %v2471_v11, %v1066_v41  ;;  %v1593_v55 = vsel %vm3292_vm0, %v2523_v42, %v1592_v40 }
 0x12c   : > { %2686 = vmatprep.mubr.msk.bf16.mxu0 %vm862_vm13, %v2462_v20  ;;  %2691 = vmatpush3.bf16.msra.mxu0 %v3193_v35  ;;  %v1063_v35 = vsel %vm3292_vm0, %v2470_v39, %v1062_v30  ;;  %v1601_v56 = vsel %vm3292_vm0, %v2525_v44, %v1600_v47  ;;  %v1589_v61 = vsel %vm3292_vm0, %v2522_v51, %v1588_v49  ;;  %v2472_v4 = vrot.slane %v3114_v3, 9  ;;  %v3365_v39 = vld [vmem:[#allocation2 + $0x10] sm:$0xf]  ;;  %v3405_v47 = vld [vmem:[#allocation2 + $0x28] sm:$0xf] }
 0x12d   : > { %2692 = vmatprep.subr.bf16.mxu0 %v2876_v31  ;;  %2730 = vmatprep.mubr.msk.bf16.mxu1 %vm862_vm13, %v2532_v12  ;;  %v2463_v62 = vcombine.low %v3205_v43, %v3214_v63  ;;  %v1597_v45 = vsel %vm3292_vm0, %v2524_v50, %v1596_v52  ;;  %v2482_v2 = vcombine.low %v1063_v35, %v1067_v60  ;;  %v1070_v5 = vrot.slane %v3122_v8, 5  ;;  %v3408_v50 = vld [vmem:[#allocation2 + $0x30] sm:$0xf] }
 0x12e   : > { %v2533_v7 = vcombine.low %v1589_v61, %v1593_v55  ;;  %v2534_v10 = vcombine.low %v1597_v45, %v1601_v56  ;;  %v2475_v21 = vrot.slane %v3187_v34, 9  ;;  %v1082_v22 = vrot.slane %v3201_v37, 5  ;;  %v3418_v61 = vld [vmem:[#allocation2 + $0x38] sm:$0xf]  ;;  %v3422_v45 = vld [vmem:[#allocation2 + $0x14] sm:$0x1] }
 0x12f   : > { %v2527_v26 = vrot.slane %v3261_v14, 9  ;;  %v1608_v3 = vrot.slane %v3271_v23, 5  ;;  %v2473_v8 = vrot.slane %v3124_v9, 9  ;;  %v1074_v16 = vrot.slane %v3130_v17, 5  ;;  %v3372_v17 = vld [vmem:[%s3591_s4 + $0x70] sm:$0xff]  }
 0x130   : > { %2693 = vmatpush3.bf16.msra.mxu0 %v2876_v31  ;;  %v2474_v28 = vrot.slane %v3183_v25, 9  ;;  %v1078_v29 = vrot.slane %v3199_v36, 5  ;;  %v2526_v34 = vrot.slane %v3253_v58, 9  ;;  %v1604_v37 = vrot.slane %v3269_v57, 5 }
 0x131   : > { %2702 = vmatprep.subr.bf16.mxu0 %v2880_v46  ;;  %v1071_v9 = vsel %vm3292_vm0, %v2472_v4, %v1070_v5  ;;  %v1083_v25 = vsel %vm3292_vm0, %v2475_v21, %v1082_v22  ;;  %v1609_v36 = vsel %vm3292_vm0, %v2527_v26, %v1608_v3  ;;  %v1075_v57 = vsel %vm3292_vm0, %v2473_v8, %v1074_v16  ;;  %v3432_v26 = vld [vmem:[#allocation2 + $0x1c] sm:$0x1] }
 0x132   : > { %v1864_v23 = vshrl.u32 %v3365_v39, 16  ;;  %v1867_v30 = vshll.u32 %v3365_v39, 16  ;;  %v2483_v31 = vcombine.low %v1071_v9, %v1075_v57  ;;  %v1079_v40 = vsel %vm3292_vm0, %v2474_v28, %v1078_v29  ;;  %v2881_v16 = vld [vmem:[%s3591_s4 + $0x78] sm:$0xff]  }
 0x133   : > { %2687 = vmatmul.mubr.msk.bf16.gmra.mrb[12].mxu0 %vm862_vm13, %v2463_v62  ;;  %2731 = vmatmul.mubr.msk.bf16.vlgmr.msra.gmra.mrb[0].mxu1 %vm862_vm13, %v2533_v7  ;;  %v1605_v19 = vsel %vm3292_vm0, %v2526_v34, %v1604_v37  ;;  %v2484_v20 = vcombine.low %v1079_v40, %v1083_v25  ;;  %v2476_v38 = vrot.slane %v3205_v43, 9  ;;  %v1086_v59 = vrot.slane %v3209_v32, 5  ;;  %v3402_v32 = vld [vmem:[#allocation2 + $0x48] sm:$0xf]  ;;  %v3445_v37 = vld [vmem:[#allocation2 + $0x40] sm:$0xf] }
 0x134   : > { %2694 = vmatprep.mubr.msk.bf16.mxu0 %vm862_vm13, %v2482_v2  ;;  %2739 = vmatpush3.bf16.msra.mxu1 %v3249_v53  ;;  %v3378_v53 = vld [vmem:[#allocation2 + $0x18] sm:$0xf]  ;;  %v2535_v11 = vcombine.low %v1605_v19, %v1609_v36  ;;  %v2477_v44 = vrot.slane %v3214_v63, 9  ;;  %v1090_v43 = vrot.slane %v3222_v6, 5  ;;  %v1866_v49 = vrot.slane %v1864_v23, 4  ;;  %v3453_v23 = vld [vmem:[%s3591_s4 + $0x80] sm:$0xff]  }
 0x135   : > { %2734 = vmatprep.mubr.msk.bf16.mxu1 %vm862_vm13, %v2534_v10  ;;  %2740 = vmatprep.subr.bf16.mxu1 %v2874_v18  ;;  %v1878_v41 = vshrl.u32 %v3378_v53, 16  ;;  %v1881_v12 = vshll.u32 %v3378_v53, 16  ;;  %v2546_v42 = vcombine.low %v3365_v39, %v3378_v53  ;;  %v1869_v51 = vrot.slane %v1867_v30, 5  ;;  %v3412_v63 = vld [vmem:[#allocation2 + $0x20] sm:$0xf] }
 0x136   : > { %v1087_v52 = vsel %vm3292_vm0, %v2476_v38, %v1086_v59  ;;  %v1962_v6 = vshrl.u32 %v3402_v32, 16  ;;  %v1906_v55 = vshrl.u32 %v3405_v47, 16  ;;  %v1909_v56 = vshll.u32 %v3405_v47, 16  ;;  %v3455_v38 = vld [vmem:[#allocation2 + $0x2c] sm:$0x1] }
 0x137   : > { %v1880_v35 = vrot.slane %v1878_v41, 4  ;;  %v1883_v60 = vrot.slane %v1881_v12, 5  ;;  %v1091_v62 = vsel %vm3292_vm0, %v2477_v44, %v1090_v43  ;;  %v1920_v2 = vshrl.u32 %v3408_v50, 16  ;;  %v3459_v12 = vld [vmem:[#allocation2 + $0x24] sm:$0x1] }
 0x138   : > { %2741 = vmatpush3.bf16.msra.mxu1 %v2874_v18  ;;  %v1923_v4 = vshll.u32 %v3408_v50, 16  ;;  %v2485_v5 = vcombine.low %v1087_v52, %v1091_v62  ;;  %v1870_v7 = vor.u32 %v1869_v51, %v1866_v49  ;;  %v2547_v10 = vcombine.low %v3412_v63, %v3405_v47  ;;  %v3461_v44 = vld [vmem:[#allocation2 + $0x34] sm:$0x1] }
 0x139   : > { %2750 = vmatprep.subr.bf16.mxu1 %v3372_v17  ;;  %v1892_v18 = vshrl.u32 %v3412_v63, 16  ;;  %v1895_v21 = vshll.u32 %v3412_v63, 16  ;;  %v2496_v22 = vcombine.low %v3138_v24, %v3147_v33  ;;  %v1934_v3 = vshrl.u32 %v3418_v61, 16 }
 0x13a   : > { %v1937_v8 = vshll.u32 %v3418_v61, 16  ;;  %v1873_v28 = vshll.u32 %v3422_v45, 16  ;;  %v1884_v29 = vor.u32 %v1883_v60, %v1880_v35  ;;  %v2548_v34 = vcombine.low %v3408_v50, %v3418_v61 }
 0x13b   : > { %2695 = vmatmul.mubr.msk.bf16.vlgmr.msra.gmra.mrb[8].mxu0 %vm862_vm13, %v2483_v31  ;;  %2735 = vmatmul.mubr.msk.bf16.gmra.mrb[4].mxu1 %vm862_vm13, %v2535_v11  ;;  %v1908_v24 = vrot.slane %v1906_v55, 4  ;;  %v1911_v33 = vrot.slane %v1909_v56, 5  ;;  %v1871_v9 = vrot.slane %v1870_v7, 4  ;;  %v1887_v25 = vshll.u32 %v3432_v26, 16  ;;  %v3472_v55 = vld [vmem:[#allocation2 + $0x3c] sm:$0x1] }
 0x13c   : > { %2698 = vmatprep.mubr.msk.bf16.mxu0 %vm862_vm13, %v2484_v20  ;;  %2703 = vmatpush3.bf16.msra.mxu0 %v2880_v46  ;;  %v1965_v46 = vshll.u32 %v3402_v32, 16  ;;  %v1922_v36 = vrot.slane %v1920_v2, 4  ;;  %v1925_v57 = vrot.slane %v1923_v4, 5  ;;  %v1894_v30 = vrot.slane %v1892_v18, 4 }
 0x13d   : > { %2704 = vmatprep.subr.bf16.mxu0 %v2884_v15  ;;  %2742 = vmatprep.mubr.msk.bf16.mxu1 %vm862_vm13, %v2546_v42  ;;  %v1897_v31 = vrot.slane %v1895_v21, 5  ;;  %v1964_v40 = vrot.slane %v1962_v6, 4  ;;  %v1875_v19 = vrot.slane %v1873_v28, 5  ;;  %v1885_v20 = vrot.slane %v1884_v29, 4 }
 0x13e   : > { %v1936_v59 = vrot.slane %v1934_v3, 4  ;;  %v1939_v11 = vrot.slane %v1937_v8, 5  ;;  %v1951_v41 = vshll.u32 %v3445_v37, 16  ;;  %v1912_v42 = vor.u32 %v1911_v33, %v1908_v24  ;;  %v1738_v3 = vld [vmem:[#allocation2 + $0x44] sm:$0x1] }
 0x13f   : > { %v1876_v43 = vsel %vm3110_vm12, %v1871_v9, %v1875_v19  ;;  %v1889_v49 = vrot.slane %v1887_v25, 5  ;;  %v2497_v51 = vcombine.low %v3159_v48, %v3169_v0  ;;  %v1926_v52 = vor.u32 %v1925_v57, %v1922_v36  ;;  %v1740_v8 = vld [vmem:[#allocation2 + $0x4c] sm:$0x1] }
 0x140   : > { %2705 = vmatpush3.bf16.msra.mxu0 %v2884_v15  ;;  %v1967_v15 = vrot.slane %v1965_v46, 5  ;;  %v2549_v6 = vcombine.low %v3445_v37, %v3402_v32  ;;  %v2498_v46 = vcombine.low %v3226_v13, %v3237_v54  ;;  %v1898_v35 = vor.u32 %v1897_v31, %v1894_v30 }
 0x141   : > { %v1915_v60 = vshll.u32 %v3455_v38, 16  ;;  %v1890_v56 = vsel %vm3110_vm12, %v1885_v20, %v1889_v49  ;;  %v1901_v48 = vshll.u32 %v3459_v12, 16  ;;  %v1929_v0 = vshll.u32 %v3461_v44, 16 }
 0x142   : > { %v1940_v62 = vor.u32 %v1939_v11, %v1936_v59  ;;  %v2560_v2 = vcombine.low %v1876_v43, %v1890_v56  ;;  %v1913_v13 = vrot.slane %v1912_v42, 4  ;;  %v1953_v4 = vrot.slane %v1951_v41, 5 }
 0x143   : > { %2699 = vmatmul.mubr.msk.bf16.gmra.mrb[12].mxu0 %vm862_vm13, %v2485_v5  ;;  %2743 = vmatmul.mubr.msk.bf16.vlgmr.msra.gmra.mrb[0].mxu1 %vm862_vm13, %v2547_v10  ;;  %v1927_v5 = vrot.slane %v1926_v52, 4  ;;  %v1943_v7 = vshll.u32 %v3472_v55, 16  ;;  %v1899_v10 = vrot.slane %v1898_v35, 4  ;;  %v1917_v18 = vrot.slane %v1915_v60, 5 }
 0x144   : > { %2706 = vmatprep.mubr.msk.bf16.mxu0 %vm862_vm13, %v2496_v22  ;;  %2751 = vmatpush3.bf16.msra.mxu1 %v3372_v17  ;;  %v1948_v17 = vshrl.u32 %v3445_v37, 16  ;;  %v1931_v21 = vrot.slane %v1929_v0, 5  ;;  %v1941_v22 = vrot.slane %v1940_v62, 4  ;;  %v1903_v28 = vrot.slane %v1901_v48, 5 }
 0x145   : > { %2746 = vmatprep.mubr.msk.bf16.mxu1 %vm862_vm13, %v2548_v34  ;;  %2752 = vmatprep.subr.bf16.mxu1 %v2881_v16  ;;  %v1918_v29 = vsel %vm3110_vm12, %v1913_v13, %v1917_v18  ;;  %v1971_v24 = vshll.u32 %v1740_v8, 16  ;;  %v1945_v9 = vrot.slane %v1943_v7, 5  ;;  %v2499_v25 = vcombine.low %v3253_v58, %v3261_v14 }
 0x146   : > { %v1950_v54 = vrot.slane %v1948_v17, 4  ;;  %v1932_v33 = vsel %vm3110_vm12, %v1927_v5, %v1931_v21  ;;  %v1904_v36 = vsel %vm3110_vm12, %v1899_v10, %v1903_v28  ;;  %v1957_v57 = vshll.u32 %v1738_v3, 16 }
 0x147   : > { %v2561_v30 = vcombine.low %v1904_v36, %v1918_v29  ;;  %v1946_v31 = vsel %vm3110_vm12, %v1941_v22, %v1945_v9  ;;  %v1973_v59 = vrot.slane %v1971_v24, 5  ;;  %v2570_v58 = vrot.slane %v3365_v39, 9 }
 0x148   : > { %2753 = vmatpush3.bf16.msra.mxu1 %v2881_v16  ;;  %v1968_v16 = vor.u32 %v1967_v15, %v1964_v40  ;;  %v1954_v34 = vor.u32 %v1953_v4, %v1950_v54  ;;  %v2889_v40 = vld [vmem:[%s3591_s4 + $0x88] sm:$0xff]   ;;  %v2562_v15 = vcombine.low %v1932_v33, %v1946_v31  ;;  %v2099_v14 = vrot.slane %v3422_v45, 5 }
 0x149   : > { %2762 = vmatprep.subr.bf16.mxu1 %v3453_v23  ;;  %v1959_v11 = vrot.slane %v1957_v57, 5  ;;  %v2571_v17 = vrot.slane %v3378_v53, 9  ;;  %v2103_v41 = vrot.slane %v3432_v26, 5  ;;  %v2111_v53 = vrot.slane %v3455_v38, 5 }
 0x14a   : > { %v1955_v19 = vrot.slane %v1954_v34, 4  ;;  %v1969_v20 = vrot.slane %v1968_v16, 4  ;;  %v2100_v39 = vsel %vm3292_vm0, %v2570_v58, %v2099_v14  ;;  %v2574_v26 = vrot.slane %v3408_v50, 9 }
 0x14b   : > { %2707 = vmatmul.mubr.msk.bf16.vlgmr.msra.gmra.mrb[8].mxu0 %vm862_vm13, %v2497_v51  ;;  %2747 = vmatmul.mubr.msk.bf16.gmra.mrb[4].mxu1 %vm862_vm13, %v2549_v6  ;;  %v2573_v51 = vrot.slane %v3405_v47, 9  ;;  %v2115_v1 = vrot.slane %v3461_v44, 5  ;;  %v2572_v52 = vrot.slane %v3412_v63, 9  ;;  %v2107_v6 = vrot.slane %v3459_v12, 5 }
 0x14c   : > { %2710 = vmatprep.mubr.msk.bf16.mxu0 %vm862_vm13, %v2498_v46  ;;  %2754 = vmatprep.mubr.msk.bf16.mxu1 %vm862_vm13, %v2560_v2  ;;  %v1960_v42 = vsel %vm3110_vm12, %v1955_v19, %v1959_v11  ;;  %v1974_v43 = vsel %vm3110_vm12, %v1969_v20, %v1973_v59  ;;  %v2575_v46 = vrot.slane %v3418_v61, 9  ;;  %v2119_v35 = vrot.slane %v3472_v55, 5 }
 0x14d   : > { %v2563_v45 = vcombine.low %v1960_v42, %v1974_v43  ;;  %v2112_v47 = vsel %vm3292_vm0, %v2573_v51, %v2111_v53  ;;  %v2116_v38 = vsel %vm3292_vm0, %v2574_v26, %v2115_v1  ;;  %v2108_v50 = vsel %vm3292_vm0, %v2572_v52, %v2107_v6 }
 0x14e   : > { %v2583_v44 = vcombine.low %v2108_v50, %v2112_v47  ;;  %v2120_v60 = vsel %vm3292_vm0, %v2575_v46, %v2119_v35  ;;  %v2577_v63 = vrot.slane %v3402_v32, 9  ;;  %v2576_v61 = vrot.slane %v3445_v37, 9 }
 0x14f   : > { %v2584_v12 = vcombine.low %v2116_v38, %v2120_v60  ;;  %v2123_v56 = vrot.slane %v1738_v3, 5  ;;  %v2127_v55 = vrot.slane %v1740_v8, 5 }
 0x151   : > { %v2124_v48 = vsel %vm3292_vm0, %v2576_v61, %v2123_v56  ;;  %v2128_v0 = vsel %vm3292_vm0, %v2577_v63, %v2127_v55 }
 0x152   : > { %v2585_v62 = vcombine.low %v2124_v48, %v2128_v0 }
 0x153   : > { %2711 = vmatmul.mubr.msk.bf16.gmra.mrb[12].mxu0 %vm862_vm13, %v2499_v25  ;;  %2755 = vmatmul.mubr.msk.bf16.vlgmr.msra.gmra.mrb[0].mxu1 %vm862_vm13, %v2561_v30 }
 0x154   : > { %2763 = vmatpush3.bf16.msra.mxu1 %v3453_v23  ;;  %2758 = vmatprep.mubr.msk.bf16.mxu1 %vm862_vm13, %v2562_v15  ;;  %v2104_v23 = vsel %vm3292_vm0, %v2571_v17, %v2103_v41 }
 0x155   : > { %2764 = vmatprep.subr.bf16.mxu1 %v2889_v40  ;;  %v2582_v49 = vcombine.low %v2100_v39, %v2104_v23 }
 0x158   : > { %2765 = vmatpush3.bf16.msra.mxu1 %v2889_v40 }
 0x15b   : > { %2759 = vmatmul.mubr.msk.bf16.gmra.mrb[4].mxu1 %vm862_vm13, %v2563_v45 }
 0x15c   : > { %2766 = vmatprep.mubr.msk.bf16.mxu1 %vm862_vm13, %v2582_v49 }
 0x163   : > { %2767 = vmatmul.mubr.msk.bf16.vlgmr.msra.gmra.mrb[0].mxu1 %vm862_vm13, %v2583_v44 }
 0x164   : > { %2770 = vmatprep.mubr.msk.bf16.mxu1 %vm862_vm13, %v2584_v12 }
 0x16b   : > { %2771 = vmatmul.mubr.msk.bf16.gmra.mrb[4].mxu1 %vm862_vm13, %v2585_v62 }
 0x21e   : > { %v2708_v32 = vpop.f32.mrb[8].mxu0 }
 0x21f   : > { %v1305_v2 = vpop.f32.mrb[9].mxu0 }
 0x220   : > { %v2709_v13 = vpop.f32.mrb[10].mxu0 }
 0x221   : > { %v1308_v37 = vpop.f32.mrb[11].mxu0 }
 0x226   : > { %v2712_v54 = vpop.f32.mrb[12].mxu0 }
 0x227   : > { %v1321_v4 = vpop.f32.mrb[13].mxu0 }
 0x228   : > { %v2713_v5 = vpop.f32.mrb[14].mxu0 }
 0x229   : > { %v1324_v7 = vpop.f32.mrb[15].mxu0 }
 0x236   : > { %v2768_v10 = vpop.f32.mrb[0].mxu1 }
 0x237   : > { %v2774_v18 = vadd.f32 %v2768_v10, %v2708_v32  ;;  %v2204_v21 = vpop.f32.mrb[1].mxu1 }
 0x238   : > { %v2775_v27 = vadd.f32 %v2204_v21, %v1305_v2  ;;  %v2769_v22 = vpop.f32.mrb[2].mxu1 }
 0x239   : > { %v2297_v3 = vpack.c.bf16 %v2774_v18, %v2774_v18  ;;  %v2776_v8 = vadd.f32 %v2769_v22, %v2709_v13  ;;  %v2207_v16 = vpop.f32.mrb[3].mxu1  ;;  %v2267_v24 = vmul.f32 %v2774_v18, %v2774_v18  ;;  %v2246_v40 = vsel %vm862_vm13, %v2774_v18, 0.0 }
 0x23a   : > { %v2265_v28 = vmul.f32 %v2775_v27, %v2775_v27  ;;  %v2295_v29 = vpack.c.bf16 %v2775_v27, %v2775_v27  ;;  %v2777_v34 = vadd.f32 %v2207_v16, %v1308_v37  ;;  %v2243_v9 = vsel %vm862_vm13, %v2775_v27, 0.0 }
 0x23b   : > { %2305 = vst.msk [vmem:[%s3544_s7 + $0x8] sm:$0xf] %vm284_vm7, %v2297_v3  ;;  %v2298_v33 = vpack.c.bf16 %v2776_v8, %v2776_v8  ;;  %v2268_v30 = vmul.f32 %v2776_v8, %v2776_v8  ;;  %v2276_v17 = vsel %vm862_vm13, %v2267_v24, 0.0  ;;  %v2248_v43 = vsel %vm862_vm13, %v2776_v8, 0.0 }
 0x23c   : > { %2303 = vst.msk [vmem:[%s3544_s7] sm:$0xf] %vm284_vm7, %v2295_v29  ;;  %v2244_v25 = vsel %vm862_vm13, %v2777_v34, 0.0  ;;  %v2266_v36 = vmul.f32 %v2777_v34, %v2777_v34  ;;  %v2296_v57 = vpack.c.bf16 %v2777_v34, %v2777_v34  ;;  %v2273_v15 = vsel %vm862_vm13, %v2265_v28, 0.0 }
 0x23d   : > { %2306 = vst.msk [vmem:[%s3544_s7 + $0xc] sm:$0xf] %vm284_vm7, %v2298_v33  ;;  %v2245_v31 = vadd.f32 %v2244_v25, %v2243_v9  ;;  %v2278_v39 = vsel %vm862_vm13, %v2268_v30, 0.0 }
 0x23e   : > { %v2274_v19 = vsel %vm862_vm13, %v2266_v36, 0.0  ;;  %2304 = vst.msk [vmem:[%s3544_s7 + $0x4] sm:$0xf] %vm284_vm7, %v2296_v57  ;;  %v2772_v20 = vpop.f32.mrb[4].mxu1 }
 0x23f   : > { %v2247_v59 = vadd.f32 %v2246_v40, %v2245_v31  ;;  %v2275_v58 = vadd.f32 %v2274_v19, %v2273_v15  ;;  %v2778_v14 = vadd.f32 %v2772_v20, %v2712_v54  ;;  %v2220_v11 = vpop.f32.mrb[5].mxu1 }
 0x240   : > { %v2779_v41 = vadd.f32 %v2220_v11, %v1321_v4  ;;  %v2773_v42 = vpop.f32.mrb[6].mxu1 }
 0x241   : > { %v2277_v45 = vadd.f32 %v2276_v17, %v2275_v58  ;;  %v2301_v23 = vpack.c.bf16 %v2778_v14, %v2778_v14  ;;  %v2223_v49 = vpop.f32.mrb[7].mxu1  ;;  %v2249_v51 = vadd.f32 %v2248_v43, %v2247_v59  ;;  %v2780_v6 = vadd.f32 %v2773_v42, %v2713_v5 }
 0x242   : > { %v2250_v53 = vsel %vm862_vm13, %v2779_v41, 0.0  ;;  %v2269_v26 = vmul.f32 %v2779_v41, %v2779_v41  ;;  %v2299_v1 = vpack.c.bf16 %v2779_v41, %v2779_v41  ;;  %v2781_v46 = vadd.f32 %v2223_v49, %v1324_v7 }
 0x243   : > { %2309 = vst.msk [vmem:[%s3544_s7 + $0x18] sm:$0xf] %vm284_vm7, %v2301_v23  ;;  %v2279_v52 = vadd.f32 %v2278_v39, %v2277_v45  ;;  %v2251_v35 = vadd.f32 %v2250_v53, %v2249_v51  ;;  %v2302_v50 = vpack.c.bf16 %v2780_v6, %v2780_v6  ;;  %v2271_v44 = vmul.f32 %v2778_v14, %v2778_v14 }
 0x244   : > { %v2280_v47 = vsel %vm862_vm13, %v2269_v26, 0.0  ;;  %2307 = vst.msk [vmem:[%s3544_s7 + $0x10] sm:$0xf] %vm284_vm7, %v2299_v1  ;;  %v2252_v60 = vsel %vm862_vm13, %v2781_v46, 0.0  ;;  %v2270_v63 = vmul.f32 %v2781_v46, %v2781_v46  ;;  %v2300_v12 = vpack.c.bf16 %v2781_v46, %v2781_v46 }
 0x245   : > { %v2281_v38 = vadd.f32 %v2280_v47, %v2279_v52  ;;  %2310 = vst.msk [vmem:[%s3544_s7 + $0x1c] sm:$0xf] %vm284_vm7, %v2302_v50  ;;  %v2253_v61 = vadd.f32 %v2252_v60, %v2251_v35  ;;  %v2254_v56 = vsel %vm862_vm13, %v2778_v14, 0.0  ;;  %v2272_v55 = vmul.f32 %v2780_v6, %v2780_v6 }
 0x246   : > { %v2282_v48 = vsel %vm862_vm13, %v2270_v63, 0.0  ;;  %2308 = vst.msk [vmem:[%s3544_s7 + $0x14] sm:$0xf] %vm284_vm7, %v2300_v12  ;;  %v2284_v32 = vsel %vm862_vm13, %v2271_v44, 0.0  ;;  %v2256_v2 = vsel %vm862_vm13, %v2780_v6, 0.0 }
 0x247   : > { %v2255_v0 = vadd.f32 %v2254_v56, %v2253_v61  ;;  %v2283_v62 = vadd.f32 %v2282_v48, %v2281_v38  ;;  %v2286_v54 = vsel %vm862_vm13, %v2272_v55, 0.0 }
 0x249   : > { %v2257_v13 = vadd.f32 %v2256_v2, %v2255_v0  ;;  %v2285_v37 = vadd.f32 %v2284_v32, %v2283_v62 }
 0x24b   : > { %v2258_v4 = vrot.slane %v2257_v13, 4  ;;  %v2287_v5 = vadd.f32 %v2286_v54, %v2285_v37 }
 0x24d   : > { %v2259_v7 = vadd.f32 %v2258_v4, %v2257_v13  ;;  %v2288_v10 = vrot.slane %v2287_v5, 4 }
 0x24f   : > { %v2260_v18 = vrot.slane %v2259_v7, 2  ;;  %v2289_v21 = vadd.f32 %v2288_v10, %v2287_v5 }
 0x251   : > { %v2261_v27 = vadd.f32 %v2260_v18, %v2259_v7  ;;  %v2290_v22 = vrot.slane %v2289_v21, 2 }
 0x253   : > { %v2262_v3 = vrot.slane %v2261_v27, 1  ;;  %v2291_v8 = vadd.f32 %v2290_v22, %v2289_v21 }
 0x255   : > { %v2263_v16 = vadd.f32 %v2262_v3, %v2261_v27  ;;  %v2292_v28 = vrot.slane %v2291_v8, 1 }
 0x257   : > { %2264 = vst.msk [vmem:[%s282_s10] sm:$0x1] %vm286_vm2, %v2263_v16  ;;  %v2293_v29 = vadd.f32 %v2292_v28, %v2291_v8 }
 0x259   : > { %2294 = vst.msk [vmem:[%s282_s10 + $0x1] sm:$0x1] %vm286_vm2, %v2293_v29 }
 0x25a PF: > { %s17_s21 = sadd.s32 1, %s2896_s21  }
 0x25b   : > { %p14_p4 = scmp.ge.s32.totalorder %s17_s21, 4  }
 0x25d   :  { %16 = sbr.rel (!%p14_p4) target bundleno = 1 (0x1), region = 96 }

// kernel: upblock_forward.3
= control target key start
LH: loop header
LB: loop body
LE: loop exit
PB: predicated region body
PF: predicated region fallthrough
CT: control target
= control target key end

     0   :  { %s2711_s18 = smov 0   ;;  %s3410_s0 = inlined_call_operand.vmem [shape: bf16[2,8,8,32], index: 0, kind: input, shape index: {}]   ;;  %s3411_s1 = inlined_call_operand.vmem [shape: f32[1,32], index: 1, kind: input, shape index: {}]   ;;  %s3412_s2 = inlined_call_operand.vmem [shape: f32[1,32], index: 2, kind: input, shape index: {}]   ;;  %s3413_s3 = inlined_call_operand.vmem [shape: bf16[9,32,32], index: 3, kind: input, shape index: {}]   ;;  %s3414_s4 = inlined_call_operand.vmem [shape: f32[2,8,8,32], index: 4, kind: output, shape index: {0}]   ;;  %s3415_s5 = inlined_call_operand.vmem [shape: f32[2,2,32], index: 5, kind: output, shape index: {1}]  }
   0x1 LB: > { %s2205_s19 = sadd.s32 4294967295, %s2678_s18   ;;  %p2209_p0 = scmp.ge.s32.totalorder %s2678_s18, 1  ;;  %s2678_s18 = sphi %s2711_s18, %s16_s18  }
   0x2   : > { %p190_p1 = scmp.lt.s32.totalorder %s2678_s18, 3 }
   0x4   : > { %p191_p2 = pnand %p2209_p0, %p190_p1 }
   0x6   : > { %194 = sbr.rel (%p191_p2) target bundleno = 394 (0x18a), region = 36 }
   0xd   : > { %v2641_v0 = vld [vmem:[%s3413_s3 + $0x10] sm:$0xff]   ;;  %p222_p3 = scmp.lt.s32.totalorder %s2205_s19, 1  ;;  %v2642_v1 = vld [vmem:[%s3413_s3 + $0x40] sm:$0xff]   ;;  %vm237_vm0 = vcmask 257024   ;;  %v2643_v2 = vld [vmem:[%s3413_s3 + $0x18] sm:$0xff]   ;;  %v2680_v4 = vmov 0  }
   0xe   : > { %2456 = vmatprep.subr.bf16.mxu1 %v2641_v0  ;;  %2504 = vmatprep.subr.bf16.mxu0 %v2642_v1  ;;  %v2644_v3 = vld [vmem:[%s3413_s3 + $0x48] sm:$0xff]   ;;  %238 = vst.msk [vmem:[#allocation2] sm:$0xf] %vm237_vm0, %v2680_v4  ;;  %vm239_vm1 = vcmask 253952   ;;  %vm246_vm2 = vsmask.f32 256 }
   0xf   : > { %s3436_s19 = smov (!%p222_p3, %s2205_s19), 1  ;;  %2457 = vmatpush3.bf16.msra.mxu1 %v2641_v0  ;;  %2505 = vmatpush3.bf16.msra.mxu0 %v2642_v1  ;;  %v248_v5 = vld [vmem:[#allocation2 + $0x8] sm:$0x1]  ;;  %242 = vst.msk [vmem:[#allocation2 + $0x48] sm:$0xf] %vm237_vm0, %v2680_v4  ;;  %vm2743_vm3 = vmand %vm239_vm1, %vm246_vm2  ;;  %v2772_v15 = vld [vmem:[%s3413_s3] sm:$0xff]  }
  0x10   : > { %2458 = vmatprep.subr.bf16.mxu1 %v2643_v2  ;;  %s2373_s28 = sshll.u32 %s3436_s19, 5  ;;  %2506 = vmatprep.subr.bf16.mxu0 %v2644_v3  ;;  %240 = vst.msk [vmem:[#allocation2 + $0x4] sm:$0x1] %vm239_vm1, %v2680_v4  ;;  %vm272_vm4 = vsmask.f32 7938  ;;  %v249_v8 = vsel %vm2743_vm3, 0, %v248_v5 }
  0x11   : > { %s2739_s6 = scalar_lea.vmem %s3410_s0, %s2373_s28  ;;  %v274_v7 = vld [vmem:[#allocation2 + $0xc] sm:$0x1]  ;;  %243 = vst.msk [vmem:[#allocation2 + $0x4c] sm:$0x1] %vm239_vm1, %v2680_v4  ;;  %vm2752_vm5 = vmand %vm239_vm1, %vm272_vm4  ;;  %v2760_v11 = vld [vmem:[%s3411_s1] ss:$0 sm:$0xff] }
  0x12   : > { %v2384_v10 = vld [vmem:[%s2739_s6] sm:$0xff]   ;;  %250 = vst [vmem:[#allocation2 + $0x8] sm:$0x1] %v249_v8  ;;  %v275_v12 = vsel %vm2752_vm5, 0, %v274_v7  ;;  %v251_v18 = vld [vmem:[#allocation2 + $0x10] sm:$0x1]  ;;  %vm2823_vm8 = vmand %vm237_vm0, %vm272_vm4 }
  0x13   : > { %2459 = vmatpush3.bf16.msra.mxu1 %v2643_v2  ;;  %v2385_v13 = vunpack.c.l.bf16 %v2384_v10  ;;  %2507 = vmatpush3.bf16.msra.mxu0 %v2644_v3  ;;  %276 = vst [vmem:[#allocation2 + $0xc] sm:$0x1] %v275_v12  ;;  %v2767_v14 = vld [vmem:[%s3412_s2] ss:$0 sm:$0xff]  ;;  %v2386_v16 = vunpack.c.h.bf16 %v2384_v10  ;;  %v277_v19 = vld [vmem:[#allocation2 + $0x14] sm:$0x1] }
  0x14   : > { %2468 = vmatprep.subr.bf16.mxu1 %v2772_v15  ;;  %v252_v20 = vsel %vm2743_vm3, 0, %v251_v18  ;;  %v278_v21 = vsel %vm2752_vm5, 0, %v277_v19  ;;  %v2784_v23 = vld [vmem:[%s3413_s3 + $0x50] sm:$0xff]   ;;  %v2399_v24 = vld [vmem:[%s2739_s6 + $0x8] sm:$0xff]   ;;  %v254_v27 = vld [vmem:[#allocation2 + $0x18] sm:$0x1] }
  0x15   : > { %v321_v17 = vmul.f32 %v2385_v13, %v2760_v11  ;;  %v322_v22 = vmul.f32 %v2386_v16, %v2760_v11  ;;  %v2788_v26 = vld [vmem:[#allocation2] sm:$0xf]  ;;  %253 = vst [vmem:[#allocation2 + $0x10] sm:$0x1] %v252_v20  ;;  %279 = vst [vmem:[#allocation2 + $0x14] sm:$0x1] %v278_v21  ;;  %v2389_v29 = vunpack.c.l.bf16 %v2399_v24  ;;  %v2390_v30 = vunpack.c.h.bf16 %v2399_v24  ;;  %2516 = vmatprep.subr.bf16.mxu0 %v2784_v23 }
  0x16   : > { %v280_v28 = vld [vmem:[#allocation2 + $0x1c] sm:$0x1]  ;;  %v538_v32 = vshrl.u32 %v2788_v26, 16  ;;  %v541_v33 = vshll.u32 %v2788_v26, 16  ;;  %v255_v35 = vsel %vm2743_vm3, 0, %v254_v27  ;;  %v2803_v42 = vld [vmem:[%s2739_s6 + $0x10] sm:$0xff]  }
  0x17   : > { %v336_v25 = vadd.f32 %v2767_v14, %v321_v17  ;;  %v2790_v31 = vld [vmem:[#allocation2 + $0x4] sm:$0x1]  ;;  %v337_v34 = vadd.f32 %v2767_v14, %v322_v22  ;;  %256 = vst [vmem:[#allocation2 + $0x18] sm:$0x1] %v255_v35  ;;  %v281_v37 = vsel %vm2752_vm5, 0, %v280_v28  ;;  %v323_v41 = vmul.f32 %v2389_v29, %v2760_v11  ;;  %s2374_s22 = sshll.u32 %s3436_s19, 6 }
  0x18   : > { %v257_v38 = vld [vmem:[#allocation2 + $0x20] sm:$0x1]  ;;  %v547_v39 = vshll.u32 %v2790_v31, 16  ;;  %282 = vst [vmem:[#allocation2 + $0x1c] sm:$0x1] %v281_v37  ;;  %v2805_v44 = vrot.slane %v538_v32, 4  ;;  %v324_v47 = vmul.f32 %v2390_v30, %v2760_v11  ;;  %v2393_v57 = vunpack.c.l.bf16 %v2803_v42  ;;  %s3367_s25 = scalar_lea.vmem %s3414_s4, %s2374_s22 }
  0x19   : > { %v344_v36 = vmax.f32 %v336_v25, 0.0  ;;  %v345_v40 = vmax.f32 %v337_v34, 0.0  ;;  %v258_v45 = vsel %vm2743_vm3, 0, %v257_v38  ;;  %v283_v46 = vld [vmem:[#allocation2 + $0x24] sm:$0x1]  ;;  %v2810_v48 = vrot.slane %v541_v33, 5 }
  0x1a   : > { %vm534_vm6 = vsmask.f32 3328  ;;  %vm535_vm7 = vsmask.f32 7440  ;;  %v338_v50 = vadd.f32 %v2767_v14, %v323_v41  ;;  %259 = vst [vmem:[#allocation2 + $0x20] sm:$0x1] %v258_v45  ;;  %v339_v54 = vadd.f32 %v2767_v14, %v324_v47 }
  0x1b   : > { %v2375_v43 = vpack.c.bf16 %v344_v36, %v344_v36  ;;  %v2376_v49 = vpack.c.bf16 %v345_v40, %v345_v40  ;;  %v284_v51 = vsel %vm2752_vm5, 0, %v283_v46  ;;  %v260_v55 = vld [vmem:[#allocation2 + $0x28] sm:$0x1]  ;;  %v286_v56 = vld [vmem:[#allocation2 + $0x2c] sm:$0x1]  ;;  %v2827_v4 = vrot.slane %v547_v39, 5  ;;  %vm2851_vm9 = vmor %vm534_vm6, %vm535_vm7 }
  0x1c   : > { %285 = vst [vmem:[#allocation2 + $0x24] sm:$0x1] %v284_v51  ;;  %v466_v58 = vld [vmem:[#allocation2 + $0x8] sm:$0xf]  ;;  %v346_v61 = vmax.f32 %v338_v50, 0.0  ;;  %v347_v0 = vmax.f32 %v339_v54, 0.0  ;;  %v325_v10 = vmul.f32 %v2393_v57, %v2760_v11  ;;  %v544_v16 = vor.u32 %v2810_v48, %v2805_v44 }
  0x1d   : > { %v385_v52 = vshrl.u32 %v2375_v43, 16  ;;  %v388_v53 = vshll.u32 %v2375_v43, 16  ;;  %v393_v59 = vshrl.u32 %v2376_v49, 16  ;;  %v396_v60 = vshll.u32 %v2376_v49, 16  ;;  %v469_v63 = vld [vmem:[#allocation2 + $0xc] sm:$0x1] }
  0x1e   : > { %v261_v1 = vsel %vm2743_vm3, 0, %v260_v55  ;;  %v287_v2 = vsel %vm2752_vm5, 0, %v286_v56  ;;  %v472_v7 = vld [vmem:[#allocation2 + $0x10] sm:$0xf]  ;;  %v2377_v8 = vpack.c.bf16 %v346_v61, %v346_v61  ;;  %v475_v17 = vld [vmem:[#allocation2 + $0x14] sm:$0x1]  ;;  %v2378_v18 = vpack.c.bf16 %v347_v0, %v347_v0 }
  0x1f   : > { %v387_v62 = vrot.slane %v385_v52, 7  ;;  %v395_v5 = vrot.slane %v393_v59, 7  ;;  %262 = vst [vmem:[#allocation2 + $0x28] sm:$0x1] %v261_v1  ;;  %288 = vst [vmem:[#allocation2 + $0x2c] sm:$0x1] %v287_v2  ;;  %v340_v38 = vadd.f32 %v2767_v14, %v325_v10 }
  0x20   : > { %v401_v21 = vshrl.u32 %v2377_v8, 16  ;;  %v404_v22 = vshll.u32 %v2377_v8, 16  ;;  %v263_v24 = vld [vmem:[#allocation2 + $0x30] sm:$0x1]  ;;  %v478_v28 = vld [vmem:[#allocation2 + $0x18] sm:$0xf] }
  0x21   : > { %v390_v12 = vor.u32 %v388_v53, %v387_v62  ;;  %v391_v13 = vrot.slane %v387_v62, 4  ;;  %v398_v19 = vor.u32 %v396_v60, %v395_v5  ;;  %v399_v20 = vrot.slane %v395_v5, 4  ;;  %v481_v29 = vld [vmem:[#allocation2 + $0x1c] sm:$0x1]  ;;  %v266_v33 = vld [vmem:[#allocation2 + $0x38] sm:$0x1] }
  0x22   : > { %v409_v30 = vshrl.u32 %v2378_v18, 16  ;;  %v412_v32 = vshll.u32 %v2378_v18, 16  ;;  %v403_v36 = vrot.slane %v401_v21, 7  ;;  %v484_v37 = vld [vmem:[#allocation2 + $0x20] sm:$0xf]  ;;  %v264_v41 = vsel %vm2743_vm3, 0, %v263_v24 }
  0x23   : > { %v467_v25 = vsel %vm2823_vm8, %v390_v12, %v466_v58  ;;  %v470_v27 = vsel %vm2743_vm3, %v391_v13, %v469_v63  ;;  %v473_v34 = vsel %vm2823_vm8, %v398_v19, %v472_v7  ;;  %v476_v35 = vsel %vm2743_vm3, %v399_v20, %v475_v17  ;;  %v289_v39 = vld [vmem:[#allocation2 + $0x34] sm:$0x1]  ;;  %v292_v45 = vld [vmem:[#allocation2 + $0x3c] sm:$0x1]  ;;  %v487_v48 = vld [vmem:[#allocation2 + $0x24] sm:$0x1] }
  0x24   : > { %468 = vst [vmem:[#allocation2 + $0x8] sm:$0xf] %v467_v25  ;;  %471 = vst [vmem:[#allocation2 + $0xc] sm:$0x1] %v470_v27  ;;  %v411_v40 = vrot.slane %v409_v30, 7  ;;  %v267_v43 = vsel %vm2743_vm3, 0, %v266_v33  ;;  %v406_v46 = vor.u32 %v404_v22, %v403_v36  ;;  %v2394_v58 = vunpack.c.h.bf16 %v2803_v42 }
  0x25   : > { %474 = vst [vmem:[#allocation2 + $0x10] sm:$0xf] %v473_v34  ;;  %477 = vst [vmem:[#allocation2 + $0x14] sm:$0x1] %v476_v35  ;;  %v290_v44 = vsel %vm2752_vm5, 0, %v289_v39  ;;  %v407_v47 = vrot.slane %v403_v36, 4 }
  0x26   : > { %265 = vst [vmem:[#allocation2 + $0x30] sm:$0x1] %v264_v41  ;;  %268 = vst [vmem:[#allocation2 + $0x38] sm:$0x1] %v267_v43  ;;  %v293_v49 = vsel %vm2752_vm5, 0, %v292_v45  ;;  %v2855_v51 = vrot.slane %v544_v16, 4  ;;  %v414_v52 = vor.u32 %v412_v32, %v411_v40  ;;  %v479_v56 = vsel %vm2823_vm8, %v406_v46, %v478_v28 }
  0x27   : > { %291 = vst [vmem:[#allocation2 + $0x34] sm:$0x1] %v290_v44  ;;  %v415_v53 = vrot.slane %v411_v40, 4  ;;  %v348_v54 = vmax.f32 %v340_v38, 0.0  ;;  %294 = vst [vmem:[#allocation2 + $0x3c] sm:$0x1] %v293_v49  ;;  %v482_v57 = vsel %vm2743_vm3, %v407_v47, %v481_v29  ;;  %v326_v12 = vmul.f32 %v2394_v58, %v2760_v11 }
  0x28   : > { %v2858_v55 = vld [vmem:[%s2739_s6 + $0x18] sm:$0xff]   ;;  %480 = vst [vmem:[#allocation2 + $0x18] sm:$0xf] %v479_v56  ;;  %483 = vst [vmem:[#allocation2 + $0x1c] sm:$0x1] %v482_v57  ;;  %v485_v59 = vsel %vm2823_vm8, %v414_v52, %v484_v37  ;;  %v550_v42 = vsel %vm2851_vm9, %v2855_v51, %v2827_v4  ;;  %vm678_vm10 = vcmask 261120  }
  0x29   : > { %v488_v60 = vsel %vm2743_vm3, %v415_v53, %v487_v48  ;;  %v269_v61 = vld [vmem:[#allocation2 + $0x40] sm:$0x1]  ;;  %486 = vst [vmem:[#allocation2 + $0x20] sm:$0xf] %v485_v59  ;;  %v2397_v62 = vunpack.c.l.bf16 %v2858_v55  ;;  %v2894_v18 = vpack.c.bf16 %v348_v54, %v348_v54  ;;  %v2398_v19 = vunpack.c.h.bf16 %v2858_v55  ;;  %s2214_s26 = sshll.u32 %s3436_s19, 1 }
  0x2a   : > { %489 = vst [vmem:[#allocation2 + $0x24] sm:$0x1] %v488_v60  ;;  %v270_v63 = vsel %vm2743_vm3, 0, %v269_v61  ;;  %v2911_v37 = vadd.f32 %v2767_v14, %v326_v12  ;;  %vm873_vm11 = vcmask 1042432   ;;  %vm874_vm12 = vcmask 1046532   ;;  %s235_s29 = scalar_lea.vmem %s3415_s5, %s2214_s26 }
  0x2b   : > { %v2872_v0 = vld [vmem:[#allocation2 + $0x8] sm:$0xf]  ;;  %v2874_v1 = vld [vmem:[#allocation2 + $0xc] sm:$0x1]  ;;  %271 = vst [vmem:[#allocation2 + $0x40] sm:$0x1] %v270_v63  ;;  %v2899_v24 = vmul.f32 %v2397_v62, %v2760_v11  ;;  %vm2973_vm13 = vmor %vm873_vm11, %vm874_vm12 }
  0x2c   : > { %v2880_v2 = vld [vmem:[#allocation2 + $0x8] sm:$0xf]  ;;  %v552_v5 = vshrl.u32 %v2872_v0, 16  ;;  %v555_v7 = vshll.u32 %v2872_v0, 16  ;;  %v561_v8 = vshll.u32 %v2874_v1, 16  ;;  %v882_v3 = vrot.slane %v2874_v1, 5 }
  0x2d   : > { %v2885_v10 = vld [vmem:[#allocation2 + $0xc] sm:$0x1]  ;;  %v2888_v13 = vld [vmem:[#allocation2 + $0x10] sm:$0xf]  ;;  %v2890_v16 = vld [vmem:[#allocation2 + $0x14] sm:$0x1] }
  0x2e   : > { %v1161_v4 = vshrl.u32 %v2880_v2, 16  ;;  %v1164_v17 = vshll.u32 %v2880_v2, 16  ;;  %v554_v20 = vrot.slane %v552_v5, 4  ;;  %v557_v21 = vrot.slane %v555_v7, 5  ;;  %v2903_v30 = vld [vmem:[#allocation2 + $0x10] sm:$0xf] }
  0x2f   : > { %v1170_v22 = vshll.u32 %v2885_v10, 16  ;;  %v1175_v28 = vshrl.u32 %v2888_v13, 16  ;;  %v1178_v29 = vshll.u32 %v2888_v13, 16  ;;  %v563_v33 = vrot.slane %v561_v8, 5  ;;  %v2906_v35 = vld [vmem:[#allocation2 + $0x14] sm:$0x1] }
  0x30   : > { %v1163_v25 = vrot.slane %v1161_v4, 4  ;;  %v1166_v27 = vrot.slane %v1164_v17, 5  ;;  %v558_v32 = vor.u32 %v557_v21, %v554_v20  ;;  %v1184_v34 = vshll.u32 %v2890_v16, 16  ;;  %v2908_v36 = vld [vmem:[#allocation2 + $0x18] sm:$0xf] }
  0x31   : > { %v1172_v39 = vrot.slane %v1170_v22, 5  ;;  %v1177_v40 = vrot.slane %v1175_v28, 4  ;;  %v1180_v41 = vrot.slane %v1178_v29, 5  ;;  %v566_v45 = vshrl.u32 %v2903_v30, 16  ;;  %v2915_v49 = vld [vmem:[#allocation2 + $0x1c] sm:$0x1] }
  0x32   : > { %v1167_v38 = vor.u32 %v1166_v27, %v1163_v25  ;;  %v559_v43 = vrot.slane %v558_v32, 4  ;;  %v1186_v44 = vrot.slane %v1184_v34, 5  ;;  %v569_v46 = vshll.u32 %v2903_v30, 16  ;;  %v2922_v58 = vld [vmem:[#allocation2 + $0x18] sm:$0xf] }
  0x33   : > { %v1181_v48 = vor.u32 %v1180_v41, %v1177_v40  ;;  %v575_v51 = vshll.u32 %v2906_v35, 16  ;;  %v580_v52 = vshrl.u32 %v2908_v36, 16  ;;  %v568_v54 = vrot.slane %v566_v45, 4  ;;  %v2926_v63 = vld [vmem:[#allocation2 + $0x1c] sm:$0x1] }
  0x34   : > { %v1168_v47 = vrot.slane %v1167_v38, 4  ;;  %v564_v53 = vsel %vm2851_vm9, %v559_v43, %v563_v33  ;;  %v571_v56 = vrot.slane %v569_v46, 5  ;;  %v583_v57 = vshll.u32 %v2908_v36, 16  ;;  %v2929_v4 = vld [vmem:[#allocation2 + $0x20] sm:$0xf] }
  0x35   : > { %v2229_v59 = vcombine.low %v550_v42, %v564_v53  ;;  %v1182_v61 = vrot.slane %v1181_v48, 4  ;;  %v577_v62 = vrot.slane %v575_v51, 5  ;;  %v582_v7 = vrot.slane %v580_v52, 4  ;;  %v2934_v17 = vld [vmem:[#allocation2 + $0x24] sm:$0x1] }
  0x36   : > { %v1173_v60 = vsel %vm2851_vm9, %v1168_v47, %v1172_v39  ;;  %v572_v5 = vor.u32 %v571_v56, %v568_v54  ;;  %v585_v8 = vrot.slane %v583_v57, 5  ;;  %v589_v12 = vshll.u32 %v2915_v49, 16  ;;  %v2947_v43 = vld [vmem:[#allocation2 + $0x20] sm:$0xf]  ;;  %v2648_v54 = vld [vmem:[%s3413_s3 + $0x8] sm:$0xff]  }
  0x37   : > { %2460 = vmatprep.mubr.msk.bf16.mxu1 %vm678_vm10, %v2229_v59  ;;  %v1187_v42 = vsel %vm2851_vm9, %v1182_v61, %v1186_v44  ;;  %v1189_v20 = vshrl.u32 %v2922_v58, 16  ;;  %v417_v21 = vshrl.u32 %v2894_v18, 16  ;;  %v420_v22 = vshll.u32 %v2894_v18, 16 }
  0x38   : > { %v2289_v25 = vcombine.low %v1173_v60, %v1187_v42  ;;  %v573_v27 = vrot.slane %v572_v5, 4  ;;  %v586_v28 = vor.u32 %v585_v8, %v582_v7  ;;  %v591_v29 = vrot.slane %v589_v12, 5  ;;  %v493_v60 = vld [vmem:[#allocation2 + $0x2c] sm:$0x1] }
  0x39   : > { %v1191_v32 = vrot.slane %v1189_v20, 4  ;;  %v1192_v33 = vshll.u32 %v2922_v58, 16  ;;  %v1198_v34 = vshll.u32 %v2926_v63, 16  ;;  %v1203_v38 = vshrl.u32 %v2929_v4, 16 }
  0x3a   : > { %2508 = vmatprep.mubr.msk.bf16.mxu0 %vm678_vm10, %v2289_v25  ;;  %v578_v39 = vsel %vm2851_vm9, %v573_v27, %v577_v62  ;;  %v587_v40 = vrot.slane %v586_v28, 4  ;;  %v1206_v41 = vshll.u32 %v2929_v4, 16  ;;  %v1212_v18 = vshll.u32 %v2934_v17, 16  ;;  %v2990_v28 = vld [vmem:[#allocation2 + $0x24] sm:$0x1] }
  0x3b   : > { %v1194_v44 = vrot.slane %v1192_v33, 5  ;;  %v1205_v45 = vrot.slane %v1203_v38, 4  ;;  %v342_v46 = vadd.f32 %v2767_v14, %v2899_v24  ;;  %v2954_v47 = vmul.f32 %v2398_v19, %v2760_v11  ;;  %v490_v24 = vld [vmem:[#allocation2 + $0x28] sm:$0xf]  ;;  %v2647_v38 = vld [vmem:[%s3413_s3 + $0x58] sm:$0xff]  }
  0x3c   : > { %v1396_v48 = vrot.slane %v2885_v10, 5  ;;  %v592_v51 = vsel %vm2851_vm9, %v587_v40, %v591_v29  ;;  %v1200_v52 = vrot.slane %v1198_v34, 5  ;;  %v1208_v53 = vrot.slane %v1206_v41, 5 }
  0x3d   : > { %v2230_v56 = vcombine.low %v578_v39, %v592_v51  ;;  %v1195_v57 = vor.u32 %v1194_v44, %v1191_v32  ;;  %v419_v59 = vrot.slane %v417_v21, 7  ;;  %v594_v55 = vshrl.u32 %v2947_v43, 16  ;;  %v496_v51 = vld [vmem:[#allocation2 + $0x30] sm:$0xf] }
  0x3e   : > { %v1209_v11 = vor.u32 %v1208_v53, %v1205_v45  ;;  %v1214_v19 = vrot.slane %v1212_v18, 5  ;;  %v597_v10 = vshll.u32 %v2947_v43, 16  ;;  %v349_v61 = vmax.f32 %v2911_v37, 0.0  ;;  %v295_v18 = vld [vmem:[#allocation2 + $0x44] sm:$0x1] }
  0x3f   : > { %v1400_v62 = vrot.slane %v2890_v16, 5  ;;  %2461 = vmatmul.mubr.msk.bf16.vlgmr.msra.gmra.mrb[0].mxu1 %vm678_vm10, %v2230_v56  ;;  %v1196_v5 = vrot.slane %v1195_v57, 4  ;;  %v422_v7 = vor.u32 %v420_v22, %v419_v59  ;;  %v423_v8 = vrot.slane %v419_v59, 4  ;;  %v2980_v16 = vld [vmem:[%s3413_s3 + $0x20] sm:$0xff]   ;;  %v499_v56 = vld [vmem:[#allocation2 + $0x34] sm:$0x1] }
  0x40   : > { %2469 = vmatpush3.bf16.msra.mxu1 %v2772_v15  ;;  %v1210_v12 = vrot.slane %v1209_v11, 4  ;;  %v1404_v42 = vrot.slane %v2926_v63, 5  ;;  %v2969_v20 = vrot.slane %v594_v55, 4  ;;  %v350_v21 = vmax.f32 %v342_v46, 0.0 }
  0x41   : > { %v1201_v15 = vsel %vm2851_vm9, %v1196_v5, %v1200_v52  ;;  %v491_v37 = vsel %vm2823_vm8, %v422_v7, %v490_v24  ;;  %v494_v63 = vsel %vm2743_vm3, %v423_v8, %v493_v60  ;;  %2470 = vmatprep.subr.bf16.mxu1 %v2648_v54  ;;  %v2380_v22 = vpack.c.bf16 %v349_v61, %v349_v61 }
  0x42   : > { %v1215_v27 = vsel %vm2851_vm9, %v1210_v12, %v1214_v19  ;;  %492 = vst [vmem:[#allocation2 + $0x28] sm:$0xf] %v491_v37  ;;  %495 = vst [vmem:[#allocation2 + $0x2c] sm:$0x1] %v494_v63  ;;  %v599_v29 = vrot.slane %v597_v10, 5  ;;  %v2381_v32 = vpack.c.bf16 %v350_v21, %v350_v21  ;;  %v2299_v33 = vrot.slane %v2880_v2, 9 }
  0x43   : > { %v2290_v34 = vcombine.low %v1201_v15, %v1215_v27  ;;  %v425_v39 = vshrl.u32 %v2380_v22, 16  ;;  %v428_v40 = vshll.u32 %v2380_v22, 16  ;;  %v2300_v41 = vrot.slane %v2888_v13, 9 }
  0x44   : > { %v1408_v44 = vrot.slane %v2934_v17, 5  ;;  %v433_v45 = vshrl.u32 %v2381_v32, 16  ;;  %v436_v46 = vshll.u32 %v2381_v32, 16  ;;  %2471 = vmatpush3.bf16.msra.mxu1 %v2648_v54  ;;  %v1397_v52 = vsel %vm2973_vm13, %v2299_v33, %v1396_v48  ;;  %v502_v54 = vld [vmem:[#allocation2 + $0x38] sm:$0xf]  ;;  %v2649_v48 = vld [vmem:[%s3413_s3 + $0x60] sm:$0xff]  }
  0x45   : > { %2509 = vmatmul.mubr.msk.bf16.vlgmr.msra.gmra.mrb[0].mxu0 %vm678_vm10, %v2290_v34  ;;  %v427_v53 = vrot.slane %v425_v39, 7  ;;  %v1401_v57 = vsel %vm2973_vm13, %v2300_v41, %v1400_v62  ;;  %v2301_v59 = vrot.slane %v2922_v58, 9  ;;  %v2302_v24 = vrot.slane %v2929_v4, 9  ;;  %2480 = vmatprep.subr.bf16.mxu1 %v2980_v16  ;;  %v505_v62 = vld [vmem:[#allocation2 + $0x3c] sm:$0x1] }
  0x46   : > { %2517 = vmatpush3.bf16.msra.mxu0 %v2784_v23  ;;  %v435_v17 = vrot.slane %v433_v45, 7  ;;  %v2311_v60 = vcombine.low %v1397_v52, %v1401_v57  ;;  %v343_v55 = vadd.f32 %v2767_v14, %v2954_v47  ;;  %v600_v11 = vor.u32 %v599_v29, %v2969_v20 }
  0x47   : > { %2518 = vmatprep.subr.bf16.mxu0 %v2647_v38  ;;  %v603_v19 = vshll.u32 %v2990_v28, 16  ;;  %v430_v10 = vor.u32 %v428_v40, %v427_v53  ;;  %v431_v61 = vrot.slane %v427_v53, 4  ;;  %v1405_v7 = vsel %vm2973_vm13, %v2301_v59, %v1404_v42 }
  0x48   : > { %v438_v5 = vor.u32 %v436_v46, %v435_v17  ;;  %v439_v23 = vrot.slane %v435_v17, 4  ;;  %2520 = vmatprep.mubr.msk.bf16.mxu0 %vm678_vm10, %v2311_v60  ;;  %v296_v8 = vsel %vm2752_vm5, 0, %v295_v18  ;;  %v1409_v21 = vsel %vm2973_vm13, %v2302_v24, %v1408_v44 }
  0x49   : > { %v3019_v12 = vld [vmem:[#allocation2 + $0x28] sm:$0xf]  ;;  %v3021_v14 = vld [vmem:[#allocation2 + $0x2c] sm:$0x1]  ;;  %v497_v47 = vsel %vm2823_vm8, %v430_v10, %v496_v51  ;;  %v500_v20 = vsel %vm2743_vm3, %v431_v61, %v499_v56  ;;  %297 = vst [vmem:[#allocation2 + $0x44] sm:$0x1] %v296_v8  ;;  %v2312_v40 = vcombine.low %v1405_v7, %v1409_v21 }
  0x4a   : > { %2519 = vmatpush3.bf16.msra.mxu0 %v2647_v38  ;;  %v608_v9 = vshrl.u32 %v3019_v12, 16  ;;  %v611_v15 = vshll.u32 %v3019_v12, 16  ;;  %v617_v37 = vshll.u32 %v3021_v14, 16  ;;  %498 = vst [vmem:[#allocation2 + $0x30] sm:$0xf] %v497_v47  ;;  %v503_v63 = vsel %vm2823_vm8, %v438_v5, %v502_v54  ;;  %v2652_v51 = vld [vmem:[%s3413_s3 + $0x68] sm:$0xff]  }
  0x4b   : > { %501 = vst [vmem:[#allocation2 + $0x34] sm:$0x1] %v500_v20  ;;  %v601_v22 = vrot.slane %v600_v11, 4  ;;  %v605_v27 = vrot.slane %v603_v19, 5  ;;  %504 = vst [vmem:[#allocation2 + $0x38] sm:$0xf] %v503_v63  ;;  %v506_v29 = vsel %vm2743_vm3, %v439_v23, %v505_v62  ;;  %2528 = vmatprep.subr.bf16.mxu0 %v2649_v48 }
  0x4c   : > { %v351_v32 = vmax.f32 %v343_v55, 0.0  ;;  %v610_v33 = vrot.slane %v608_v9, 4  ;;  %v613_v34 = vrot.slane %v611_v15, 5  ;;  %507 = vst [vmem:[#allocation2 + $0x3c] sm:$0x1] %v506_v29  ;;  %v619_v44 = vrot.slane %v617_v37, 5 }
  0x4d   : > { %v3038_v38 = vld [vmem:[#allocation2 + $0x28] sm:$0xf]  ;;  %v3040_v39 = vld [vmem:[#allocation2 + $0x2c] sm:$0x1]  ;;  %v606_v52 = vsel %vm2851_vm9, %v601_v22, %v605_v27  ;;  %v3068_v10 = vld [vmem:[%s3413_s3 + $0x70] sm:$0xff]   ;;  %v886_v6 = vrot.slane %v2906_v35, 5 }
  0x4e   : > { %v2382_v41 = vpack.c.bf16 %v351_v32, %v351_v32  ;;  %v614_v18 = vor.u32 %v613_v34, %v610_v33  ;;  %v2303_v45 = vrot.slane %v3038_v38, 9  ;;  %v1412_v46 = vrot.slane %v3040_v39, 5 }
  0x50   : > { %v615_v53 = vrot.slane %v614_v18, 4  ;;  %v441_v56 = vshrl.u32 %v2382_v41, 16  ;;  %v1413_v8 = vsel %vm2973_vm13, %v2303_v45, %v1412_v46  ;;  %v444_v21 = vshll.u32 %v2382_v41, 16  ;;  %v511_v18 = vld [vmem:[#allocation2 + $0x44] sm:$0x1] }
  0x51   : > { %v3049_v57 = vld [vmem:[#allocation2 + $0x30] sm:$0xf]  ;;  %2521 = vmatmul.mubr.msk.bf16.vlgmr.msra.gmra.mrb[0].mxu0 %vm678_vm10, %v2312_v40  ;;  %v508_v40 = vld [vmem:[#allocation2 + $0x40] sm:$0xf] }
  0x52   : > { %v3051_v59 = vld [vmem:[#allocation2 + $0x34] sm:$0x1]  ;;  %v3054_v24 = vld [vmem:[#allocation2 + $0x30] sm:$0xf]  ;;  %v620_v54 = vsel %vm2851_vm9, %v615_v53, %v619_v44  ;;  %v3060_v60 = vld [vmem:[#allocation2 + $0x38] sm:$0xf]  ;;  %2529 = vmatpush3.bf16.msra.mxu0 %v2649_v48 }
  0x53   : > { %v622_v55 = vshrl.u32 %v3049_v57, 16  ;;  %v625_v11 = vshll.u32 %v3049_v57, 16  ;;  %v631_v19 = vshll.u32 %v3051_v59, 16  ;;  %v2231_v61 = vcombine.low %v606_v52, %v620_v54  ;;  %v3070_v62 = vld [vmem:[#allocation2 + $0x3c] sm:$0x1]  ;;  %2530 = vmatprep.subr.bf16.mxu0 %v2652_v51 }
  0x54   : > { %v636_v5 = vshrl.u32 %v3060_v60, 16  ;;  %v639_v23 = vshll.u32 %v3060_v60, 16  ;;  %v3074_v7 = vld [vmem:[#allocation2 + $0x34] sm:$0x1]  ;;  %v645_v20 = vshll.u32 %v3070_v62, 16  ;;  %v2304_v37 = vrot.slane %v3054_v24, 9 }
  0x55   : > { %v624_v47 = vrot.slane %v622_v55, 4  ;;  %v627_v48 = vrot.slane %v625_v11, 5  ;;  %2464 = vmatprep.mubr.msk.bf16.mxu1 %vm678_vm10, %v2231_v61  ;;  %v1416_v63 = vrot.slane %v3074_v7, 5  ;;  %v633_v27 = vrot.slane %v631_v19, 5  ;;  %v3096_v19 = vld [vmem:[#allocation2 + $0x38] sm:$0xf] }
  0x56   : > { %v638_v9 = vrot.slane %v636_v5, 4  ;;  %v641_v15 = vrot.slane %v639_v23, 5  ;;  %v443_v29 = vrot.slane %v441_v56, 7  ;;  %2531 = vmatpush3.bf16.msra.mxu0 %v2652_v51  ;;  %v647_v33 = vrot.slane %v645_v20, 5  ;;  %v3098_v61 = vld [vmem:[#allocation2 + $0x3c] sm:$0x1] }
  0x57   : > { %v628_v22 = vor.u32 %v627_v48, %v624_v47  ;;  %v1417_v34 = vsel %vm2973_vm13, %v2304_v37, %v1416_v63  ;;  %2540 = vmatprep.subr.bf16.mxu0 %v3068_v10  ;;  %v2239_v55 = vcombine.low %v2788_v26, %v2872_v0  ;;  %3428 = vst [vmem:[#allocation3_spill] sm:$0xff] %v3098_v61  ;;  %v878_v5 = vrot.slane %v2790_v31, 5  ;;  %v3108_v47 = vld [vmem:[#allocation2 + $0x18] sm:$0xf]  ;;  %v3110_v48 = vld [vmem:[#allocation2 + $0x20] sm:$0xf] }
  0x58   : > { %v642_v32 = vor.u32 %v641_v15, %v638_v9  ;;  %v2313_v44 = vcombine.low %v1413_v8, %v1417_v34  ;;  %v446_v45 = vor.u32 %v444_v21, %v443_v29  ;;  %v447_v46 = vrot.slane %v443_v29, 4  ;;  %v3106_v8 = vld [vmem:[#allocation2 + $0x10] sm:$0xf] }
  0x59   : > { %v629_v41 = vrot.slane %v628_v22, 4  ;;  %v890_v23 = vrot.slane %v2915_v49, 5  ;;  %v2240_v20 = vcombine.low %v2903_v30, %v2908_v36  ;;  %v2305_v31 = vrot.slane %v3096_v19, 9  ;;  %v3117_v49 = vld [vmem:[#allocation2 + $0x28] sm:$0xf] }
  0x5a   : > { %v643_v52 = vrot.slane %v642_v32, 4  ;;  %2524 = vmatprep.mubr.msk.bf16.mxu0 %vm678_vm10, %v2313_v44  ;;  %v509_v51 = vsel %vm2823_vm8, %v446_v45, %v508_v40  ;;  %v512_v56 = vsel %vm2743_vm3, %v447_v46, %v511_v18  ;;  %v1420_v1 = vrot.slane %v3098_v61, 5 }
  0x5b   : > { %v634_v53 = vsel %vm2851_vm9, %v629_v41, %v633_v27  ;;  %510 = vst [vmem:[#allocation2 + $0x40] sm:$0xf] %v509_v51  ;;  %513 = vst [vmem:[#allocation2 + $0x44] sm:$0x1] %v512_v56  ;;  %v1680_v35 = vshrl.u32 %v3106_v8, 16  ;;  %v1683_v21 = vshll.u32 %v3106_v8, 16  ;;  %v2241_v27 = vcombine.low %v2947_v43, %v3019_v12 }
  0x5c   : > { %v648_v54 = vsel %vm2851_vm9, %v643_v52, %v647_v33  ;;  %v1694_v9 = vshrl.u32 %v3108_v47, 16  ;;  %v2249_v15 = vrot.slane %v2788_v26, 9  ;;  %v2250_v37 = vrot.slane %v2872_v0, 9  ;;  %v3153_v51 = vld [vmem:[#allocation2 + $0x14] sm:$0x1] }
  0x5d   : > { %v2232_v11 = vcombine.low %v634_v53, %v648_v54  ;;  %v2325_v29 = vcombine.low %v3106_v8, %v3108_v47  ;;  %v2251_v32 = vrot.slane %v2903_v30, 9  ;;  %v2252_v33 = vrot.slane %v2908_v36, 9  ;;  %v2654_v30 = vld [vmem:[%s3413_s3 + $0x28] sm:$0xff]  }
  0x5e   : > { %v1697_v26 = vshll.u32 %v3108_v47, 16  ;;  %v1708_v40 = vshrl.u32 %v3110_v48, 16  ;;  %v1421_v18 = vsel %vm2973_vm13, %v2305_v31, %v1420_v1  ;;  %v1711_v36 = vshll.u32 %v3110_v48, 16 }
  0x5f   : > { %2465 = vmatmul.mubr.msk.bf16.gmra.mrb[4].mxu1 %vm678_vm10, %v2232_v11  ;;  %v1722_v44 = vshrl.u32 %v3117_v49, 16  ;;  %v2242_v45 = vcombine.low %v3049_v57, %v3060_v60  ;;  %v1725_v46 = vshll.u32 %v3117_v49, 16  ;;  %v879_v52 = vsel %vm2973_vm13, %v2249_v15, %v878_v5  ;;  %v3166_v11 = vld [vmem:[#allocation2 + $0x30] sm:$0xf]  ;;  %v3168_v5 = vld [vmem:[#allocation2 + $0x38] sm:$0xf] }
  0x60   : > { %2472 = vmatprep.mubr.msk.bf16.mxu1 %vm678_vm10, %v2239_v55  ;;  %v883_v53 = vsel %vm2973_vm13, %v2250_v37, %v882_v3  ;;  %v3160_v54 = vsel %vm2973_vm13, %v2251_v32, %v886_v6  ;;  %v3164_v55 = vsel %vm2973_vm13, %v2252_v33, %v890_v23  ;;  %v1682_v3 = vrot.slane %v1680_v35, 4  ;;  %v3174_v6 = vld [vmem:[#allocation2 + $0x1c] sm:$0x1]  ;;  %v3179_v23 = vld [vmem:[%s3413_s3 + $0x30] sm:$0xff]   ;;  %v3189_v33 = vld [vmem:[#allocation2 + $0x48] sm:$0xf] }
  0x61   : > { %v894_v1 = vrot.slane %v2990_v28, 5  ;;  %v1685_v15 = vrot.slane %v1683_v21, 5  ;;  %v2254_v35 = vrot.slane %v3019_v12, 9  ;;  %v1696_v37 = vrot.slane %v1694_v9, 4 }
  0x62   : > { %v3123_v63 = vld [vmem:[#allocation2 + $0x40] sm:$0xf]  ;;  %v3125_v22 = vld [vmem:[#allocation2 + $0x44] sm:$0x1]  ;;  %v1699_v32 = vrot.slane %v1697_v26, 5  ;;  %v2327_v28 = vcombine.low %v3166_v11, %v3168_v5  ;;  %v1736_v21 = vshrl.u32 %v3166_v11, 16  ;;  %v2262_v26 = vcombine.low %v3160_v54, %v3164_v55 }
  0x63   : > { %3429 = vst [vmem:[#allocation4_spill] sm:$0xff] %v3125_v22  ;;  %v2306_v34 = vrot.slane %v3123_v63, 9  ;;  %v1424_v41 = vrot.slane %v3125_v22, 5  ;;  %v1689_v12 = vshll.u32 %v3153_v51, 16  ;;  %v1703_v9 = vshll.u32 %v3174_v6, 16  ;;  %v2661_v54 = vld [vmem:[%s3413_s3 + $0x78] sm:$0xff]  }
  0x64   : > { %v3210_v55 = vld [vmem:[#allocation2 + $0x2c] sm:$0x1]  ;;  %v1738_v42 = vrot.slane %v1736_v21, 4 }
  0x65   : > { %v1425_v56 = vsel %vm2973_vm13, %v2306_v34, %v1424_v41  ;;  %v1686_v34 = vor.u32 %v1685_v15, %v1682_v3  ;;  %v1753_v41 = vshll.u32 %v3168_v5, 16  ;;  %v3205_v3 = vld [vmem:[#allocation2 + $0x24] sm:$0x1]  ;;  %v1713_v15 = vrot.slane %v1711_v36, 5 }
  0x66   : > { %v2314_v31 = vcombine.low %v1421_v18, %v1425_v56  ;;  %v1750_v18 = vshrl.u32 %v3168_v5, 16  ;;  %v902_v36 = vrot.slane %v3051_v59, 5 }
  0x67   : > { %2473 = vmatmul.mubr.msk.bf16.vlgmr.msra.gmra.mrb[0].mxu1 %vm678_vm10, %v2240_v20  ;;  %v2253_v20 = vrot.slane %v2947_v43, 9  ;;  %v2261_v43 = vcombine.low %v879_v52, %v883_v53  ;;  %v1778_v52 = vshrl.u32 %v3189_v33, 16  ;;  %v1755_v61 = vrot.slane %v1753_v41, 5 }
  0x68   : > { %2481 = vmatpush3.bf16.msra.mxu1 %v2980_v16  ;;  %2476 = vmatprep.mubr.msk.bf16.mxu1 %vm678_vm10, %v2241_v27  ;;  %v898_v16 = vrot.slane %v3021_v14, 5  ;;  %v1739_v27 = vshll.u32 %v3166_v11, 16  ;;  %v1700_v14 = vor.u32 %v1699_v32, %v1696_v37  ;;  %v1724_v37 = vrot.slane %v1722_v44, 4 }
  0x69   : > { %2482 = vmatprep.subr.bf16.mxu1 %v2654_v30  ;;  %2525 = vmatmul.mubr.msk.bf16.gmra.mrb[4].mxu0 %vm678_vm10, %v2314_v31  ;;  %v895_v53 = vsel %vm2973_vm13, %v2253_v20, %v894_v1  ;;  %v1710_v31 = vrot.slane %v1708_v40, 4  ;;  %v1727_v32 = vrot.slane %v1725_v46, 5  ;;  %v1687_v20 = vrot.slane %v1686_v34, 4  ;;  %v3218_v40 = vld [vmem:[#allocation2 + $0x40] sm:$0xf] }
  0x6a   : > { %2532 = vmatprep.mubr.msk.bf16.mxu0 %vm678_vm10, %v2325_v29  ;;  %v1781_v29 = vshll.u32 %v3189_v33, 16  ;;  %v899_v56 = vsel %vm2973_vm13, %v2254_v35, %v898_v16  ;;  %v1691_v1 = vrot.slane %v1689_v12, 5  ;;  %v1701_v17 = vrot.slane %v1700_v14, 4  ;;  %v3213_v16 = vld [vmem:[#allocation2 + $0x34] sm:$0x1] }
  0x6b   : > { %v1705_v35 = vrot.slane %v1703_v9, 5  ;;  %v1741_v0 = vrot.slane %v1739_v27, 5  ;;  %v1752_v22 = vrot.slane %v1750_v18, 4  ;;  %v2256_v44 = vrot.slane %v3060_v60, 9 }
  0x6c   : > { %2483 = vmatpush3.bf16.msra.mxu1 %v2654_v30  ;;  %v2255_v30 = vrot.slane %v3049_v57, 9  ;;  %v3216_v57 = vld [vmem:[#allocation2 + $0x3c] sm:$0x1]  ;;  %v1717_v46 = vshll.u32 %v3205_v3, 16  ;;  %v3430_v34 = vcombine.low %v3110_v48, %v3117_v49  ;;  %v1714_v21 = vor.u32 %v1713_v15, %v1710_v31 }
  0x6d   : > { %2492 = vmatprep.subr.bf16.mxu1 %v3179_v23  ;;  %v1728_v27 = vor.u32 %v1727_v32, %v1724_v37  ;;  %v1731_v12 = vshll.u32 %v3210_v55, 16  ;;  %v1767_v59 = vshll.u32 %v3218_v40, 16  ;;  %v2263_v60 = vcombine.low %v895_v53, %v899_v56  ;;  %v3254_v37 = vld [vmem:[#allocation2 + $0x44] sm:$0x1] }
  0x6e   : > { %v1706_v14 = vsel %vm2851_vm9, %v1701_v17, %v1705_v35  ;;  %v1742_v9 = vor.u32 %v1741_v0, %v1738_v42  ;;  %v1745_v18 = vshll.u32 %v3213_v16, 16  ;;  %v1756_v41 = vor.u32 %v1755_v61, %v1752_v22  ;;  %v3251_v42 = vld [vmem:[%s3413_s3 + $0x80] sm:$0xff]  }
  0x6f   : > { %2477 = vmatmul.mubr.msk.bf16.gmra.mrb[4].mxu1 %vm678_vm10, %v2242_v45  ;;  %v906_v45 = vrot.slane %v3070_v62, 5  ;;  %v1692_v62 = vsel %vm2851_vm9, %v1687_v20, %v1691_v1  ;;  %v1759_v31 = vshll.u32 %v3216_v57, 16  ;;  %v903_v53 = vsel %vm2973_vm13, %v2255_v30, %v902_v36 }
  0x70   : > { %2484 = vmatprep.mubr.msk.bf16.mxu1 %vm678_vm10, %v2261_v43  ;;  %v1764_v43 = vshrl.u32 %v3218_v40, 16  ;;  %v1719_v61 = vrot.slane %v1717_v46, 5  ;;  %v2339_v22 = vcombine.low %v1692_v62, %v1706_v14  ;;  %v1715_v0 = vrot.slane %v1714_v21, 4  ;;  %v3258_v46 = vld [vmem:[#allocation2 + $0x4c] sm:$0x1] }
  0x71   : > { %2533 = vmatmul.mubr.msk.bf16.vlgmr.msra.gmra.mrb[0].mxu0 %vm678_vm10, %v3430_v34  ;;  %v907_v17 = vsel %vm2973_vm13, %v2256_v44, %v906_v45  ;;  %v1729_v56 = vrot.slane %v1728_v27, 4  ;;  %v1733_v15 = vrot.slane %v1731_v12, 5  ;;  %v1769_v30 = vrot.slane %v1767_v59, 5 }
  0x72   : > { %2541 = vmatpush3.bf16.msra.mxu0 %v3068_v10  ;;  %2536 = vmatprep.mubr.msk.bf16.mxu0 %vm678_vm10, %v2327_v28  ;;  %v2328_v10 = vcombine.low %v3218_v40, %v3189_v33  ;;  %v2663_v28 = vld [vmem:[%s3413_s3 + $0x38] sm:$0xff]   ;;  %v1766_v32 = vrot.slane %v1764_v43, 4  ;;  %v1780_v20 = vrot.slane %v1778_v52, 4  ;;  %v1783_v1 = vrot.slane %v1781_v29, 5 }
  0x73   : > { %2542 = vmatprep.subr.bf16.mxu0 %v2661_v54  ;;  %v1743_v35 = vrot.slane %v1742_v9, 4  ;;  %v1747_v36 = vrot.slane %v1745_v18, 5  ;;  %v1757_v44 = vrot.slane %v1756_v41, 4  ;;  %v1761_v45 = vrot.slane %v1759_v31, 5  ;;  %v2670_v9 = vld [vmem:[%s3413_s3 + $0x40] sm:$0xff]  }
  0x74   : > { %v2264_v34 = vcombine.low %v903_v53, %v907_v17  ;;  %v1720_v52 = vsel %vm2851_vm9, %v1715_v0, %v1719_v61  ;;  %v1773_v29 = vshll.u32 %v3254_v37, 16  ;;  %v1770_v43 = vor.u32 %v1769_v30, %v1766_v32  ;;  %v2667_v32 = vld [vmem:[%s3413_s3 + $0x88] sm:$0xff]  }
  0x75   : > { %v1784_v21 = vor.u32 %v1783_v1, %v1780_v20  ;;  %v1787_v27 = vshll.u32 %v3258_v46, 16  ;;  %v1231_v12 = vshrl.u32 %v3054_v24, 16  ;;  %v1748_v59 = vsel %vm2851_vm9, %v1743_v35, %v1747_v36 }
  0x76   : > { %2543 = vmatpush3.bf16.msra.mxu0 %v2661_v54  ;;  %v1220_v54 = vshll.u32 %v3038_v38, 16  ;;  %v1234_v62 = vshll.u32 %v3054_v24, 16  ;;  %v1245_v14 = vshrl.u32 %v3096_v19, 16  ;;  %v1775_v53 = vrot.slane %v1773_v29, 5 }
  0x77   : > { %2485 = vmatmul.mubr.msk.bf16.vlgmr.msra.gmra.mrb[0].mxu1 %vm678_vm10, %v2262_v26  ;;  %2552 = vmatprep.subr.bf16.mxu0 %v3251_v42  ;;  %v1217_v26 = vshrl.u32 %v3038_v38, 16  ;;  %v1233_v31 = vrot.slane %v1231_v12, 4  ;;  %v1785_v0 = vrot.slane %v1784_v21, 4  ;;  %v2349_v30 = vrot.slane %v3106_v8, 9 }
  0x78   : > { %2493 = vmatpush3.bf16.msra.mxu1 %v3179_v23  ;;  %2488 = vmatprep.mubr.msk.bf16.mxu1 %vm678_vm10, %v2263_v60  ;;  %v1734_v23 = vsel %vm2851_vm9, %v1729_v56, %v1733_v15  ;;  %v1762_v60 = vsel %vm2851_vm9, %v1757_v44, %v1761_v45  ;;  %v1222_v41 = vrot.slane %v1220_v54, 5  ;;  %v1236_v17 = vrot.slane %v1234_v62, 5 }
  0x79   : > { %2494 = vmatprep.subr.bf16.mxu1 %v2663_v28  ;;  %2537 = vmatmul.mubr.msk.bf16.gmra.mrb[4].mxu0 %vm678_vm10, %v2328_v10  ;;  %v1219_v18 = vrot.slane %v1217_v26, 4  ;;  %v1248_v10 = vshll.u32 %v3096_v19, 16  ;;  %v2341_v61 = vcombine.low %v1748_v59, %v1762_v60  ;;  %v1789_v56 = vrot.slane %v1787_v27, 5 }
  0x7a   : > { %2544 = vmatprep.mubr.msk.bf16.mxu0 %vm678_vm10, %v2339_v22  ;;  %v1771_v22 = vrot.slane %v1770_v43, 4  ;;  %v3431_v15 = vcombine.low %v2880_v2, %v2888_v13  ;;  %v1915_v20 = vrot.slane %v3153_v51, 5  ;;  %v2350_v1 = vrot.slane %v3108_v47, 9 }
  0x7b   : > { %v1919_v35 = vrot.slane %v3174_v6, 5  ;;  %v1223_v36 = vor.u32 %v1222_v41, %v1219_v18  ;;  %v1226_v44 = vshll.u32 %v3040_v39, 16  ;;  %v1237_v45 = vor.u32 %v1236_v17, %v1233_v31 }
  0x7c   : > { %2495 = vmatpush3.bf16.msra.mxu1 %v2663_v28  ;;  %v2340_v28 = vcombine.low %v1720_v52, %v1734_v23  ;;  %v1240_v2 = vshll.u32 %v3074_v7, 16  ;;  %v1259_v13 = vshrl.u32 %v3123_v63, 16  ;;  %v1247_v26 = vrot.slane %v1245_v14, 4 }
  0x7d   : > { %2564 = vmatprep.subr.bf16.mxu1 %v2670_v9  ;;  %v1776_v8 = vsel %vm2851_vm9, %v1771_v22, %v1775_v53  ;;  %v1790_v39 = vsel %vm2851_vm9, %v1785_v0, %v1789_v56  ;;  %v1250_v47 = vrot.slane %v1248_v10, 5  ;;  %v2277_v7 = vcombine.low %v3038_v38, %v3054_v24 }
  0x7e   : > { %v1916_v51 = vsel %vm2973_vm13, %v2349_v30, %v1915_v20  ;;  %v1920_v6 = vsel %vm2973_vm13, %v2350_v1, %v1919_v35  ;;  %v1228_v52 = vrot.slane %v1226_v44, 5  ;;  %v1238_v23 = vrot.slane %v1237_v45, 4 }
  0x7f   : > { %2489 = vmatmul.mubr.msk.bf16.gmra.mrb[4].mxu1 %vm678_vm10, %v2264_v34  ;;  %v1262_v34 = vshll.u32 %v3123_v63, 16  ;;  %v1242_v29 = vrot.slane %v1240_v2, 5  ;;  %v1261_v54 = vrot.slane %v1259_v13, 4  ;;  %v2342_v21 = vcombine.low %v1776_v8, %v1790_v39 }
  0x80   : > { %2496 = vmatprep.mubr.msk.bf16.mxu1 %vm678_vm10, %v3431_v15  ;;  %v2351_v27 = vrot.slane %v3110_v48, 9  ;;  %v3432_v12 = vcombine.low %v2922_v58, %v2929_v4  ;;  %v2361_v38 = vcombine.low %v1916_v51, %v1920_v6  ;;  %v1923_v24 = vrot.slane %v3205_v3, 5  ;;  %v2671_v4 = vld [vmem:[%s3413_s3 + $0x48] sm:$0xff]  }
  0x81   : > { %2545 = vmatmul.mubr.msk.bf16.vlgmr.msra.gmra.mrb[0].mxu0 %vm678_vm10, %v2340_v28  ;;  %v1264_v43 = vrot.slane %v1262_v34, 5  ;;  %v2352_v59 = vrot.slane %v3117_v49, 9  ;;  %v1927_v60 = vrot.slane %v3210_v55, 5  ;;  %v2353_v62 = vrot.slane %v3166_v11, 9  ;;  %v3433_v55 = vld [vmem:[#allocation3_spill] sm:$0xff] }
  0x82   : > { %2553 = vmatpush3.bf16.msra.mxu0 %v3251_v42  ;;  %2548 = vmatprep.mubr.msk.bf16.mxu0 %vm678_vm10, %v2341_v61  ;;  %v1224_v42 = vrot.slane %v1223_v36, 4  ;;  %v1931_v48 = vrot.slane %v3213_v16, 5  ;;  %v2354_v14 = vrot.slane %v3168_v5, 9  ;;  %v1935_v58 = vrot.slane %v3216_v57, 5  ;;  %v3434_v16 = vld [vmem:[#allocation4_spill] sm:$0xff] }
  0x83   : > { %2554 = vmatprep.subr.bf16.mxu0 %v2667_v32  ;;  %v1243_v3 = vsel %vm2851_vm9, %v1238_v23, %v1242_v29  ;;  %v1251_v11 = vor.u32 %v1250_v47, %v1247_v26  ;;  %v1268_v5 = vshll.u32 %v3434_v16, 16  ;;  %v2278_v57 = vcombine.low %v3096_v19, %v3123_v63 }
  0x84   : > { %v1229_v49 = vsel %vm2851_vm9, %v1224_v42, %v1228_v52  ;;  %v1924_v18 = vsel %vm2973_vm13, %v2351_v27, %v1923_v24  ;;  %v1928_v41 = vsel %vm2973_vm13, %v2352_v59, %v1927_v60  ;;  %v1932_v10 = vsel %vm2973_vm13, %v2353_v62, %v1931_v48 }
  0x85   : > { %v2291_v31 = vcombine.low %v1229_v49, %v1243_v3  ;;  %v1936_v28 = vsel %vm2973_vm13, %v2354_v14, %v1935_v58  ;;  %v1265_v53 = vor.u32 %v1264_v43, %v1261_v54  ;;  %v2362_v17 = vcombine.low %v1924_v18, %v1928_v41 }
  0x86   : > { %2555 = vmatpush3.bf16.msra.mxu0 %v2667_v32  ;;  %v2355_v19 = vrot.slane %v3218_v40, 9  ;;  %v2363_v63 = vcombine.low %v1932_v10, %v1936_v28  ;;  %v1939_v61 = vrot.slane %v3254_v37, 5  ;;  %v2356_v22 = vrot.slane %v3189_v33, 9 }
  0x87   : > { %2497 = vmatmul.mubr.msk.bf16.vlgmr.msra.gmra.mrb[0].mxu1 %vm678_vm10, %v3432_v12  ;;  %v1943_v0 = vrot.slane %v3258_v46, 5  ;;  %v1270_v15 = vrot.slane %v1268_v5, 5  ;;  %v1252_v32 = vrot.slane %v1251_v11, 4  ;;  %v1266_v30 = vrot.slane %v1265_v53, 4 }
  0x88   : > { %2566 = vmatpush3.bf16.msra.mxu1 %v2670_v9  ;;  %2500 = vmatprep.mubr.msk.bf16.mxu1 %vm678_vm10, %v2277_v7  ;;  %v1254_v9 = vshll.u32 %v3433_v55, 16  ;;  %v1940_v40 = vsel %vm2973_vm13, %v2355_v19, %v1939_v61 }
  0x89   : > { %2565 = vmatprep.subr.bf16.mxu1 %v2671_v4  ;;  %2549 = vmatmul.mubr.msk.bf16.gmra.mrb[4].mxu0 %vm678_vm10, %v2342_v21  ;;  %v1944_v37 = vsel %vm2973_vm13, %v2356_v22, %v1943_v0  ;;  %v1271_v46 = vsel %vm2851_vm9, %v1266_v30, %v1270_v15 }
  0x8a   : > { %2556 = vmatprep.mubr.msk.bf16.mxu0 %vm678_vm10, %v2361_v38  ;;  %v1256_v56 = vrot.slane %v1254_v9, 5  ;;  %v2364_v20 = vcombine.low %v1940_v40, %v1944_v37 }
  0x8c   : > { %2567 = vmatpush3.bf16.msra.mxu1 %v2671_v4  ;;  %v1257_v33 = vsel %vm2851_vm9, %v1252_v32, %v1256_v56 }
  0x8d   : > { %v2292_v1 = vcombine.low %v1257_v33, %v1271_v46 }
  0x8f   : > { %2501 = vmatmul.mubr.msk.bf16.gmra.mrb[4].mxu1 %vm678_vm10, %v2278_v57 }
  0x90   : > { %2512 = vmatprep.mubr.msk.bf16.mxu1 %vm678_vm10, %v2291_v31 }
  0x91   : > { %2557 = vmatmul.mubr.msk.bf16.vlgmr.msra.gmra.mrb[0].mxu0 %vm678_vm10, %v2362_v17 }
  0x92   : > { %2560 = vmatprep.mubr.msk.bf16.mxu0 %vm678_vm10, %v2363_v63 }
  0x99   : > { %2561 = vmatmul.mubr.msk.bf16.gmra.mrb[4].mxu0 %vm678_vm10, %v2364_v20 }
  0x9b   : > { %2513 = vmatmul.mubr.msk.bf16.vlgmr.msra.gmra.mrb[4].mxu1 %vm678_vm10, %v2292_v1 }
 0x15a   : > { %v2498_v35 = vpop.f32.mrb[0].mxu1 }
 0x15b   : > { %v1121_v36 = vpop.f32.mrb[1].mxu1 }
 0x15c   : > { %v2499_v44 = vpop.f32.mrb[2].mxu1 }
 0x15d   : > { %v1124_v45 = vpop.f32.mrb[3].mxu1 }
 0x164   : > { %v2558_v50 = vpop.f32.mrb[0].mxu0 }
 0x165   : > { %v2568_v25 = vadd.f32 %v2558_v50, %v2498_v35  ;;  %v2020_v2 = vpop.f32.mrb[1].mxu0 }
 0x166   : > { %v2569_v13 = vadd.f32 %v2020_v2, %v1121_v36  ;;  %v2559_v34 = vpop.f32.mrb[2].mxu0 }
 0x167   : > { %2113 = vst.msk [vmem:[%s3367_s25 + $0x10] sm:$0xff] %vm678_vm10, %v2568_v25  ;;  %v2570_v26 = vadd.f32 %v2559_v34, %v2499_v44  ;;  %v2023_v8 = vpop.f32.mrb[3].mxu0  ;;  %v2083_v7 = vmul.f32 %v2568_v25, %v2568_v25  ;;  %v2062_v23 = vsel %vm678_vm10, %v2568_v25, 0.0 }
 0x168   : > { %v2081_v39 = vmul.f32 %v2569_v13, %v2569_v13  ;;  %2111 = vst.msk [vmem:[%s3367_s25] sm:$0xff] %vm678_vm10, %v2569_v13  ;;  %v2571_v47 = vadd.f32 %v2023_v8, %v1124_v45  ;;  %v2059_v51 = vsel %vm678_vm10, %v2569_v13, 0.0 }
 0x169   : > { %2114 = vst.msk [vmem:[%s3367_s25 + $0x18] sm:$0xff] %vm678_vm10, %v2570_v26  ;;  %v2084_v54 = vmul.f32 %v2570_v26, %v2570_v26  ;;  %v2092_v59 = vsel %vm678_vm10, %v2083_v7, 0.0  ;;  %v2064_v60 = vsel %vm678_vm10, %v2570_v26, 0.0 }
 0x16a   : > { %v2060_v6 = vsel %vm678_vm10, %v2571_v47, 0.0  ;;  %v2082_v42 = vmul.f32 %v2571_v47, %v2571_v47  ;;  %2112 = vst.msk [vmem:[%s3367_s25 + $0x8] sm:$0xff] %vm678_vm10, %v2571_v47  ;;  %v2089_v29 = vsel %vm678_vm10, %v2081_v39, 0.0 }
 0x16b   : > { %v2061_v52 = vadd.f32 %v2060_v6, %v2059_v51  ;;  %v2094_v9 = vsel %vm678_vm10, %v2084_v54, 0.0 }
 0x16c   : > { %v2090_v43 = vsel %vm678_vm10, %v2082_v42, 0.0  ;;  %v2562_v21 = vpop.f32.mrb[4].mxu0 }
 0x16d   : > { %v2063_v27 = vadd.f32 %v2062_v23, %v2061_v52  ;;  %v2091_v12 = vadd.f32 %v2090_v43, %v2089_v29  ;;  %v2036_v24 = vpop.f32.mrb[5].mxu0 }
 0x16e   : > { %v2514_v38 = vpop.f32.mrb[4].mxu1  ;;  %v2563_v14 = vpop.f32.mrb[6].mxu0 }
 0x16f   : > { %v2572_v62 = vadd.f32 %v2562_v21, %v2514_v38  ;;  %v1363_v48 = vpop.f32.mrb[5].mxu1  ;;  %v2093_v58 = vadd.f32 %v2092_v59, %v2091_v12  ;;  %v2065_v49 = vadd.f32 %v2064_v60, %v2063_v27  ;;  %v2039_v55 = vpop.f32.mrb[7].mxu0 }
 0x170   : > { %v2573_v4 = vadd.f32 %v2036_v24, %v1363_v48  ;;  %v2515_v3 = vpop.f32.mrb[6].mxu1 }
 0x171   : > { %2117 = vst.msk [vmem:[%s3367_s25 + $0x30] sm:$0xff] %vm678_vm10, %v2572_v62  ;;  %v2574_v11 = vadd.f32 %v2563_v14, %v2515_v3  ;;  %v1366_v16 = vpop.f32.mrb[7].mxu1  ;;  %v2095_v18 = vadd.f32 %v2094_v9, %v2093_v58  ;;  %v2087_v10 = vmul.f32 %v2572_v62, %v2572_v62  ;;  %v2070_v61 = vsel %vm678_vm10, %v2572_v62, 0.0 }
 0x172   : > { %v2066_v5 = vsel %vm678_vm10, %v2573_v4, 0.0  ;;  %v2085_v57 = vmul.f32 %v2573_v4, %v2573_v4  ;;  %2115 = vst.msk [vmem:[%s3367_s25 + $0x20] sm:$0xff] %vm678_vm10, %v2573_v4  ;;  %v2575_v41 = vadd.f32 %v2039_v55, %v1366_v16 }
 0x173   : > { %v2067_v31 = vadd.f32 %v2066_v5, %v2065_v49  ;;  %2118 = vst.msk [vmem:[%s3367_s25 + $0x38] sm:$0xff] %vm678_vm10, %v2574_v11  ;;  %v2088_v22 = vmul.f32 %v2574_v11, %v2574_v11  ;;  %v2100_v32 = vsel %vm678_vm10, %v2087_v10, 0.0  ;;  %v2072_v30 = vsel %vm678_vm10, %v2574_v11, 0.0 }
 0x174   : > { %v2096_v28 = vsel %vm678_vm10, %v2085_v57, 0.0  ;;  %v2068_v53 = vsel %vm678_vm10, %v2575_v41, 0.0  ;;  %v2086_v17 = vmul.f32 %v2575_v41, %v2575_v41  ;;  %2116 = vst.msk [vmem:[%s3367_s25 + $0x28] sm:$0xff] %vm678_vm10, %v2575_v41 }
 0x175   : > { %v2097_v19 = vadd.f32 %v2096_v28, %v2095_v18  ;;  %v2069_v63 = vadd.f32 %v2068_v53, %v2067_v31  ;;  %v2102_v33 = vsel %vm678_vm10, %v2088_v22, 0.0 }
 0x176   : > { %v2098_v0 = vsel %vm678_vm10, %v2086_v17, 0.0 }
 0x177   : > { %v2071_v56 = vadd.f32 %v2070_v61, %v2069_v63  ;;  %v2099_v15 = vadd.f32 %v2098_v0, %v2097_v19 }
 0x179   : > { %v2073_v40 = vadd.f32 %v2072_v30, %v2071_v56  ;;  %v2101_v37 = vadd.f32 %v2100_v32, %v2099_v15 }
 0x17b   : > { %v2074_v46 = vrot.slane %v2073_v40, 4  ;;  %v2103_v20 = vadd.f32 %v2102_v33, %v2101_v37 }
 0x17d   : > { %v2075_v1 = vadd.f32 %v2074_v46, %v2073_v40  ;;  %v2104_v35 = vrot.slane %v2103_v20, 4 }
 0x17f   : > { %v2076_v36 = vrot.slane %v2075_v1, 2  ;;  %v2105_v44 = vadd.f32 %v2104_v35, %v2103_v20 }
 0x181   : > { %v2077_v45 = vadd.f32 %v2076_v36, %v2075_v1  ;;  %v2106_v50 = vrot.slane %v2105_v44, 2 }
 0x183   : > { %v2078_v25 = vrot.slane %v2077_v45, 1  ;;  %v2107_v2 = vadd.f32 %v2106_v50, %v2105_v44 }
 0x185   : > { %v2079_v13 = vadd.f32 %v2078_v25, %v2077_v45  ;;  %v2108_v34 = vrot.slane %v2107_v2, 1 }
 0x187   : > { %2080 = vst.msk [vmem:[%s235_s29] sm:$0x1] %vm239_vm1, %v2079_v13  ;;  %v2109_v26 = vadd.f32 %v2108_v34, %v2107_v2 }
 0x189   : > { %2110 = vst.msk [vmem:[%s235_s29 + $0x1] sm:$0x1] %vm239_vm1, %v2109_v26 }
 0x18a PF: > { %s16_s18 = sadd.s32 1, %s2678_s18  }
 0x18b   : > { %p13_p4 = scmp.ge.s32.totalorder %s16_s18, 4  }
 0x18d   :  { %15 = sbr.rel (!%p13_p4) target bundleno = 1 (0x1), region = 89 }

</bundles_post_ra>
